<compile_context>
chip_gen: v6e
topology: v6e:2x2x1
jax: 0.10.0
libtpu: 0.0.40
codegen_flags: <defaults>
</compile_context>

<pallas_src>
import math
import functools

import jax
import jax.numpy as jnp
from jax.experimental import pallas as pl
from jax.experimental.pallas import tpu as pltpu


N_HEAD_INPUTS = 10   # patches, et, eex, tok_w, tok_b, fin_w, fin_b, vmask, block_ones, rowq
N_PER_LAYER = 31     # packed per-layer tensors (see _pack_layer)


# ----------------------------------------------------------------------------
# In-kernel helpers (traced inside the Pallas kernel)
# ----------------------------------------------------------------------------

def _mm(a, b):
    # bf16 MXU operands, f32 accumulation (native on v5e/v6e/v7x MXUs)
    return jnp.dot(a.astype(jnp.bfloat16), b.astype(jnp.bfloat16),
                   preferred_element_type=jnp.float32)


def _mm_t(a, b):
    # a @ b^T without an explicit transpose (contract dim 1 of both on the MXU)
    return jax.lax.dot_general(a.astype(jnp.bfloat16), b.astype(jnp.bfloat16),
                               dimension_numbers=(((1,), (1,)), ((), ())),
                               preferred_element_type=jnp.float32)


def _layer_norm(x, g, b):
    m = jnp.mean(x, axis=-1, keepdims=True)
    v = jnp.mean((x - m) ** 2, axis=-1, keepdims=True)
    return (x - m) * jax.lax.rsqrt(v + 1e-5) * g + b


def _conformer_layer(tok, lw, consts, *, T, D, H, K):
    vmask, bones, rowq = consts
    (ln1_g, ln1_b, ff1_w1, ff1_b1, ff1_w2, ff1_b2,
     ln2_g, ln2_b, wqkv, bqkv, u_row, vb_row, pgflat, wo, bo,
     ln3_g, ln3_b, pw1_w, pw1_b, dw_w, dw_b, pw2_w, pw2_b,
     ln4_g, ln4_b, ff2_w1, ff2_b1, ff2_w2, ff2_b2,
     ln5_g, ln5_b) = lw
    dh = D // H
    x = tok

    # ---- macaron feed-forward 1 (SiLU), scaled by 0.5 ----
    h = _layer_norm(x, ln1_g, ln1_b)
    h = _mm(h, ff1_w1) + ff1_b1
    h = h * jax.nn.sigmoid(h)
    h = _mm(h, ff1_w2) + ff1_b2
    x = x + 0.5 * h

    # ---- relative multi-head self-attention (Transformer-XL style) ----
    # All heads at once: scores laid out (T, H*T), heads as consecutive 8-lane blocks.
    h = _layer_norm(x, ln2_g, ln2_b)
    qkv = _mm(h, wqkv) + bqkv                       # (T, 3D) merged QKV projection
    q = qkv[:, 0:D]
    k = qkv[:, D:2 * D]
    v = qkv[:, 2 * D:3 * D]
    q_u = q + u_row                                 # content bias (per-head, laid over D)
    q_v = q + vb_row                                # positional bias

    k_rep = jnp.tile(k, (H, 1)) * vmask             # (H*T, D): head-masked tiled keys
    v_rep = jnp.tile(v, (H, 1)) * vmask             # (H*T, D): head-masked tiled values

    ac = _mm_t(q_u, k_rep)                          # (T, H*T) content scores, all heads
    # positional scores: (q+v) placed block-diagonally over (T, T*D), contracted with the
    # constant pre-gathered / head-masked PE projection (built at trace time).
    qv_aug = jnp.tile(q_v, (1, T)) * rowq           # (T, T*D)
    bd = _mm(qv_aug, pgflat)                        # (T, H*T)

    s = (ac + bd) * (1.0 / math.sqrt(dh))
    s = s - jnp.max(s, axis=-1, keepdims=True)      # row-wide shift; per-block softmax invariant
    p = jnp.exp(s)
    denom = jnp.dot(p, bones, preferred_element_type=jnp.float32)   # per-head block sums (f32)
    probs = p / denom
    o = _mm(probs, v_rep)                           # (T, D): heads already concatenated
    x = x + _mm(o, wo) + bo

    # ---- convolution module: pw-conv (GLU) -> depthwise conv -> BN(eval) -> SiLU -> pw-conv
    h = _layer_norm(x, ln3_g, ln3_b)
    pw1 = _mm(h, pw1_w) + pw1_b                     # (T, 2D) merged GLU projection
    g = pw1[:, 0:D] * jax.nn.sigmoid(pw1[:, D:2 * D])
    pad = (K - 1) // 2
    zpad = jnp.zeros((pad, D), jnp.float32)
    gp = jnp.concatenate([zpad, g, zpad], axis=0)   # (T + K - 1, D), 'same' padding
    acc = jnp.zeros((T, D), jnp.float32)
    for kk in range(K):                             # depthwise conv1d, unrolled
        acc = acc + gp[kk:kk + T, :] * dw_w[kk:kk + 1, :]
    acc = acc + dw_b
    acc = acc * (1.0 / math.sqrt(1.0 + 1e-5))       # BatchNorm1d eval with init stats (0, 1)
    acc = acc * jax.nn.sigmoid(acc)                 # Swish
    x = x + _mm(acc, pw2_w) + pw2_b

    # ---- macaron feed-forward 2 ----
    h = _layer_norm(x, ln4_g, ln4_b)
    h = _mm(h, ff2_w1) + ff2_b1
    h = h * jax.nn.sigmoid(h)
    h = _mm(h, ff2_w2) + ff2_b2
    x = x + 0.5 * h

    # ---- final layer norm of the block ----
    return _layer_norm(x, ln5_g, ln5_b)


def _vq_bert_kernel(*refs, C, P, T, D, H, K, n_layers):
    del C  # implied by the ref shapes
    out_ref = refs[-1]
    in_refs = refs[:-1]
    (pat_ref, et_ref, eex_ref, tokw_ref, tokb_ref, finw_ref, finb_ref,
     vmask_ref, bones_ref, rowq_ref) = in_refs[:N_HEAD_INPUTS]

    pat = pat_ref[0]                                # (T, C*P) raw patches for this batch element
    et = et_ref[...]                                # (C*P, C)  column -> channel reducer
    eex = eex_ref[...]                              # (C, C*P)  channel -> column expander
    L = T * P

    # InstanceNorm1d (affine=False, eps=1e-5) folded onto the patch layout:
    # per-channel stats are obtained by reducing patch columns through Et, then expanded
    # back to a per-column scale/shift through Eex (tiny f32 matmuls on the MXU).
    colsum = jnp.sum(pat, axis=0, keepdims=True)                                     # (1, C*P)
    colsq = jnp.sum(pat * pat, axis=0, keepdims=True)                                # (1, C*P)
    ch_mean = jnp.dot(colsum, et, preferred_element_type=jnp.float32) * (1.0 / L)    # (1, C)
    ch_msq = jnp.dot(colsq, et, preferred_element_type=jnp.float32) * (1.0 / L)      # (1, C)
    ch_var = ch_msq - ch_mean * ch_mean
    ch_inv = jax.lax.rsqrt(ch_var + 1e-5)
    mean_vec = jnp.dot(ch_mean, eex, preferred_element_type=jnp.float32)             # (1, C*P)
    inv_vec = jnp.dot(ch_inv, eex, preferred_element_type=jnp.float32)               # (1, C*P)
    patn = (pat - mean_vec) * inv_vec

    # Tokenizer: Linear(C*P -> D)
    token = _mm(patn, tokw_ref[...]) + tokb_ref[...]               # (T, D)

    consts = (vmask_ref[...], bones_ref[...], rowq_ref[...])

    # Conformer blocks.  NOTE: the PyTorch reference feeds `token` (not the previous
    # block's output) to every block -- reproduced intentionally.
    xm = token
    for l in range(n_layers):
        base = N_HEAD_INPUTS + l * N_PER_LAYER
        lw = tuple(r[...] for r in in_refs[base:base + N_PER_LAYER])
        xm = _conformer_layer(token, lw, consts, T=T, D=D, H=H, K=K)

    # dropout(p=0.5) -> identity at eval; final projector Linear(D, 1) computed as a
    # lane-dense (1, T) row, then temperature-softmax aggregation over time.
    scores = _mm_t(finw_ref[...].astype(jnp.float32), xm) + finb_ref[...]            # (1, T)
    m = jnp.max(scores, axis=-1, keepdims=True)
    temp = 5.0 * (1.0 - jax.nn.sigmoid(m)) + 1e-8
    z = scores / temp
    z = z - jnp.max(z, axis=-1, keepdims=True)
    e = jnp.exp(z)
    sm = e / jnp.sum(e, axis=-1, keepdims=True)
    out_ref[0] = jnp.sum(scores * sm, axis=-1, keepdims=True)      # (1, 1)


# ----------------------------------------------------------------------------
# Wrapper: trace-time parameter repacking + the single pallas_call
# ----------------------------------------------------------------------------

def rel_positional_encoding(T, D):
    # sinusoidal encoding over relative positions -(T-1) .. (T-1); row m holds rel m-(T-1)
    pos = jnp.arange(-(T - 1), T, dtype=jnp.float32)[:, None]
    div = jnp.exp(jnp.arange(0, D, 2, dtype=jnp.float32) * (-math.log(10000.0) / D))
    pe = jnp.zeros((2 * T - 1, D), jnp.float32)
    pe = pe.at[:, 0::2].set(jnp.sin(pos * div))
    pe = pe.at[:, 1::2].set(jnp.cos(pos * div))
    return pe


def _attn_constants(T, D, H):
    dh = D // H
    HT = H * T
    head_of_d = jnp.arange(D) // dh                                   # (D,)
    head_of_m = jnp.arange(HT) // T                                   # (HT,)
    vmask = (head_of_m[:, None] == head_of_d[None, :]).astype(jnp.float32)      # (HT, D)
    block_ones = (head_of_m[:, None] == head_of_m[None, :]).astype(jnp.float32) # (HT, HT)
    rowq = (jnp.arange(T)[:, None] ==
            (jnp.arange(T * D) // D)[None, :]).astype(jnp.float32)              # (T, T*D)
    return vmask, block_ones, rowq


def _pack_layer(lp, pe, T, D, H):
    dh = D // H
    HT = H * T
    wqkv = jnp.concatenate([lp['wq'], lp['wk'], lp['wv']], axis=1)      # (D, 3D)
    bqkv = jnp.concatenate([lp['bq'], lp['bk'], lp['bv']], axis=1)      # (1, 3D)
    u_row = lp['u'].reshape(1, D)
    vb_row = lp['vb'].reshape(1, D)
    # Pre-baked positional-score operand (parameter-only -> trace time, never on data path):
    #   pgflat[i*D + d, h*T + j] = (PE(i-j) @ Wpos)[d] * [d in head h]
    p_proj = pe @ lp['wpos']                                            # (2T-1, D)
    idx = (jnp.arange(T)[:, None] - jnp.arange(T)[None, :]) + (T - 1)   # (T, T)
    pg = p_proj[idx]                                                    # (T, T, D)  [i, j, d]
    pg_idm = jnp.transpose(pg, (0, 2, 1))                               # (T, D, T)  [i, d, j]
    head_of_d = jnp.arange(D) // dh
    head_of_m = jnp.arange(HT) // T
    hmask = (head_of_d[:, None] == head_of_m[None, :]).astype(jnp.float32)       # (D, HT)
    pgflat = (jnp.tile(pg_idm, (1, 1, H)) * hmask[None, :, :]).reshape(T * D, HT)
    return [
        lp['ln1_g'], lp['ln1_b'], lp['ff1_w1'], lp['ff1_b1'], lp['ff1_w2'], lp['ff1_b2'],
        lp['ln2_g'], lp['ln2_b'], wqkv, bqkv, u_row, vb_row, pgflat, lp['wo'], lp['bo'],
        lp['ln3_g'], lp['ln3_b'], lp['pw1_w'], lp['pw1_b'], lp['dw_w'], lp['dw_b'],
        lp['pw2_w'], lp['pw2_b'],
        lp['ln4_g'], lp['ln4_b'], lp['ff2_w1'], lp['ff2_b1'], lp['ff2_w2'], lp['ff2_b2'],
        lp['ln5_g'], lp['ln5_b'],
    ]


def model_forward(params, x, *, C, P, T, D, H, K, n_layers):
    B = x.shape[0]
    CP = C * P

    # Layout plumbing only (no compute): (B, L, C) -> (B, C, L) -> patch matrix (B, T, C*P)
    xc = jnp.transpose(x, (0, 2, 1))
    patches = xc.reshape(B, C, T, P).transpose(0, 2, 1, 3).reshape(B, T, CP)

    # Constant reducers/expanders that fold InstanceNorm1d onto the patch layout.
    ch_of_col = jnp.arange(CP) // P
    eex = (jnp.arange(C)[:, None] == ch_of_col[None, :]).astype(jnp.float32)   # (C, CP)
    et = eex.T                                                                  # (CP, C)

    pe = rel_positional_encoding(T, D)
    vmask, block_ones, rowq = _attn_constants(T, D, H)
    fin_w = params['final_w'].reshape(1, D)                                     # (1, D)

    inputs = [patches, et, eex, params['tok_w'], params['tok_b'], fin_w, params['final_b'],
              vmask, block_ones, rowq]
    for lp in params['layers']:
        inputs += _pack_layer(lp, pe, T, D, H)
    assert len(inputs) == N_HEAD_INPUTS + n_layers * N_PER_LAYER

    # Input 0 (patches) is partitioned over the batch grid; everything else is a full,
    # grid-invariant block -> fetched once and kept resident in VMEM across grid steps.
    in_specs = [pl.BlockSpec((1, T, CP), lambda b: (b, 0, 0))]
    for a in inputs[1:]:
        nd = a.ndim
        in_specs.append(pl.BlockSpec(a.shape, lambda b, _nd=nd: (0,) * _nd))

    kernel = functools.partial(_vq_bert_kernel, C=C, P=P, T=T, D=D, H=H, K=K,
                               n_layers=n_layers)
    out = pl.pallas_call(
        kernel,
        out_shape=jax.ShapeDtypeStruct((B, 1, 1), jnp.float32),
        grid=(B,),
        in_specs=in_specs,
        out_specs=pl.BlockSpec((1, 1, 1), lambda b: (b, 0, 0)),
        compiler_params=pltpu.CompilerParams(
            dimension_semantics=("parallel",),       # shards batch across the 2 TCs on v7x
            vmem_limit_bytes=32 * 1024 * 1024,
        ),
    )(*inputs)
    return out.reshape(B, 1)


# ----------------------------------------------------------------------------
# Deterministic parameter initialization (same structure as the PyTorch module)
# ----------------------------------------------------------------------------

def init_params(key, C, P, T, D, H, n_layers, K):
    ff_hidden = 4 * D
    dh = D // H
    keys = iter(jax.random.split(key, 64 * (n_layers + 1)))

    def w(shape, scale=0.02):
        return (scale * jax.random.normal(next(keys), shape)).astype(jnp.float32)

    def ones(shape):
        return jnp.ones(shape, jnp.float32)

    def zeros(shape):
        return jnp.zeros(shape, jnp.float32)

    params = {
        'tok_w': w((C * P, D)), 'tok_b': zeros((1, D)),
        'final_w': w((D, 1)), 'final_b': zeros((1, 1)),
        'layers': [],
    }
    for _ in range(n_layers):
        lp = {
            'ln1_g': ones((1, D)), 'ln1_b': zeros((1, D)),
            'ff1_w1': w((D, ff_hidden)), 'ff1_b1': zeros((1, ff_hidden)),
            'ff1_w2': w((ff_hidden, D)), 'ff1_b2': zeros((1, D)),
            'ln2_g': ones((1, D)), 'ln2_b': zeros((1, D)),
            'wq': w((D, D)), 'bq': zeros((1, D)),
            'wk': w((D, D)), 'bk': zeros((1, D)),
            'wv': w((D, D)), 'bv': zeros((1, D)),
            'wo': w((D, D)), 'bo': zeros((1, D)),
            'wpos': w((D, D)),
            'u': w((H, dh)), 'vb': w((H, dh)),
            'ln3_g': ones((1, D)), 'ln3_b': zeros((1, D)),
            'pw1_w': w((D, 2 * D)), 'pw1_b': zeros((1, 2 * D)),
            'dw_w': w((K, D)), 'dw_b': zeros((1, D)),
            'pw2_w': w((D, D)), 'pw2_b': zeros((1, D)),
            'ln4_g': ones((1, D)), 'ln4_b': zeros((1, D)),
            'ff2_w1': w((D, ff_hidden)), 'ff2_b1': zeros((1, ff_hidden)),
            'ff2_w2': w((ff_hidden, D)), 'ff2_b2': zeros((1, D)),
            'ln5_g': ones((1, D)), 'ln5_b': zeros((1, D)),
        }
        params['layers'].append(lp)
    return params


# ----------------------------------------------------------------------------
# Main
# ----------------------------------------------------------------------------

if __name__ == "__main__":
    # small configuration: num_nodes=4, freq(patch_size)=4, input_len(patch_num)=8,
    # d_model=32, e_layers=2, attn_heads=4, kernel_size=5, task_name='anomaly_detection'
    B, C, P, T = 2, 4, 4, 8
    D, H, N_LAYERS, K = 32, 4, 2, 5
    L = T * P

    key = jax.random.PRNGKey(0)
    pkey, xkey = jax.random.split(key)
    params = init_params(pkey, C, P, T, D, H, N_LAYERS, K)
    x = jax.random.normal(xkey, (B, L, C), jnp.float32)   # (batch, seq_len, num_nodes)

    fwd = jax.jit(functools.partial(model_forward, C=C, P=P, T=T, D=D, H=H, K=K,
                                    n_layers=N_LAYERS))
    out = fwd(params, x)
    jax.block_until_ready(out)
    assert out.shape == (B, 1)
    print("KERNEL_OK")
</pallas_src>

<mosaic_0001>
module attributes {stable_mosaic.version = 11 : i64} {
  func.func @_vq_bert_kernel(%arg0: i32, %arg1: memref<1x8x16xf32, #tpu.memory_space<vmem>>, %arg2: memref<16x4xf32, #tpu.memory_space<vmem>>, %arg3: memref<4x16xf32, #tpu.memory_space<vmem>>, %arg4: memref<16x32xf32, #tpu.memory_space<vmem>>, %arg5: memref<1x32xf32, #tpu.memory_space<vmem>>, %arg6: memref<1x32xf32, #tpu.memory_space<vmem>>, %arg7: memref<1x1xf32, #tpu.memory_space<vmem>>, %arg8: memref<32x32xf32, #tpu.memory_space<vmem>>, %arg9: memref<32x32xf32, #tpu.memory_space<vmem>>, %arg10: memref<8x256xf32, #tpu.memory_space<vmem>>, %arg11: memref<1x32xf32, #tpu.memory_space<vmem>>, %arg12: memref<1x32xf32, #tpu.memory_space<vmem>>, %arg13: memref<32x128xf32, #tpu.memory_space<vmem>>, %arg14: memref<1x128xf32, #tpu.memory_space<vmem>>, %arg15: memref<128x32xf32, #tpu.memory_space<vmem>>, %arg16: memref<1x32xf32, #tpu.memory_space<vmem>>, %arg17: memref<1x32xf32, #tpu.memory_space<vmem>>, %arg18: memref<1x32xf32, #tpu.memory_space<vmem>>, %arg19: memref<32x96xf32, #tpu.memory_space<vmem>>, %arg20: memref<1x96xf32, #tpu.memory_space<vmem>>, %arg21: memref<1x32xf32, #tpu.memory_space<vmem>>, %arg22: memref<1x32xf32, #tpu.memory_space<vmem>>, %arg23: memref<256x32xf32, #tpu.memory_space<vmem>>, %arg24: memref<32x32xf32, #tpu.memory_space<vmem>>, %arg25: memref<1x32xf32, #tpu.memory_space<vmem>>, %arg26: memref<1x32xf32, #tpu.memory_space<vmem>>, %arg27: memref<1x32xf32, #tpu.memory_space<vmem>>, %arg28: memref<32x64xf32, #tpu.memory_space<vmem>>, %arg29: memref<1x64xf32, #tpu.memory_space<vmem>>, %arg30: memref<5x32xf32, #tpu.memory_space<vmem>>, %arg31: memref<1x32xf32, #tpu.memory_space<vmem>>, %arg32: memref<32x32xf32, #tpu.memory_space<vmem>>, %arg33: memref<1x32xf32, #tpu.memory_space<vmem>>, %arg34: memref<1x32xf32, #tpu.memory_space<vmem>>, %arg35: memref<1x32xf32, #tpu.memory_space<vmem>>, %arg36: memref<32x128xf32, #tpu.memory_space<vmem>>, %arg37: memref<1x128xf32, #tpu.memory_space<vmem>>, %arg38: memref<128x32xf32, #tpu.memory_space<vmem>>, %arg39: memref<1x32xf32, #tpu.memory_space<vmem>>, %arg40: memref<1x32xf32, #tpu.memory_space<vmem>>, %arg41: memref<1x32xf32, #tpu.memory_space<vmem>>, %arg42: memref<1x32xf32, #tpu.memory_space<vmem>>, %arg43: memref<1x32xf32, #tpu.memory_space<vmem>>, %arg44: memref<32x128xf32, #tpu.memory_space<vmem>>, %arg45: memref<1x128xf32, #tpu.memory_space<vmem>>, %arg46: memref<128x32xf32, #tpu.memory_space<vmem>>, %arg47: memref<1x32xf32, #tpu.memory_space<vmem>>, %arg48: memref<1x32xf32, #tpu.memory_space<vmem>>, %arg49: memref<1x32xf32, #tpu.memory_space<vmem>>, %arg50: memref<32x96xf32, #tpu.memory_space<vmem>>, %arg51: memref<1x96xf32, #tpu.memory_space<vmem>>, %arg52: memref<1x32xf32, #tpu.memory_space<vmem>>, %arg53: memref<1x32xf32, #tpu.memory_space<vmem>>, %arg54: memref<256x32xf32, #tpu.memory_space<vmem>>, %arg55: memref<32x32xf32, #tpu.memory_space<vmem>>, %arg56: memref<1x32xf32, #tpu.memory_space<vmem>>, %arg57: memref<1x32xf32, #tpu.memory_space<vmem>>, %arg58: memref<1x32xf32, #tpu.memory_space<vmem>>, %arg59: memref<32x64xf32, #tpu.memory_space<vmem>>, %arg60: memref<1x64xf32, #tpu.memory_space<vmem>>, %arg61: memref<5x32xf32, #tpu.memory_space<vmem>>, %arg62: memref<1x32xf32, #tpu.memory_space<vmem>>, %arg63: memref<32x32xf32, #tpu.memory_space<vmem>>, %arg64: memref<1x32xf32, #tpu.memory_space<vmem>>, %arg65: memref<1x32xf32, #tpu.memory_space<vmem>>, %arg66: memref<1x32xf32, #tpu.memory_space<vmem>>, %arg67: memref<32x128xf32, #tpu.memory_space<vmem>>, %arg68: memref<1x128xf32, #tpu.memory_space<vmem>>, %arg69: memref<128x32xf32, #tpu.memory_space<vmem>>, %arg70: memref<1x32xf32, #tpu.memory_space<vmem>>, %arg71: memref<1x32xf32, #tpu.memory_space<vmem>>, %arg72: memref<1x32xf32, #tpu.memory_space<vmem>>, %arg73: memref<1x1x1xf32, #tpu.memory_space<vmem>>) attributes {dimension_semantics = [#tpu.dimension_semantics<parallel>], iteration_bounds = array<i64: 2>, scalar_prefetch = 0 : i64, scratch_operands = 0 : i64, tpu.core_type = #tpu.core_type<tc>, window_params = [{transform_indices = @transform_0, window_bounds = array<i64: 1, 8, 16>}, {pipeline_mode = #tpu.pipeline_mode<synchronous>, transform_indices = @transform_1, window_bounds = array<i64: 16, 4>}, {pipeline_mode = #tpu.pipeline_mode<synchronous>, transform_indices = @transform_2, window_bounds = array<i64: 4, 16>}, {pipeline_mode = #tpu.pipeline_mode<synchronous>, transform_indices = @transform_3, window_bounds = array<i64: 16, 32>}, {pipeline_mode = #tpu.pipeline_mode<synchronous>, transform_indices = @transform_4, window_bounds = array<i64: 1, 32>}, {pipeline_mode = #tpu.pipeline_mode<synchronous>, transform_indices = @transform_5, window_bounds = array<i64: 1, 32>}, {pipeline_mode = #tpu.pipeline_mode<synchronous>, transform_indices = @transform_6, window_bounds = array<i64: 1, 1>}, {pipeline_mode = #tpu.pipeline_mode<synchronous>, transform_indices = @transform_7, window_bounds = array<i64: 32, 32>}, {pipeline_mode = #tpu.pipeline_mode<synchronous>, transform_indices = @transform_8, window_bounds = array<i64: 32, 32>}, {pipeline_mode = #tpu.pipeline_mode<synchronous>, transform_indices = @transform_9, window_bounds = array<i64: 8, 256>}, {pipeline_mode = #tpu.pipeline_mode<synchronous>, transform_indices = @transform_10, window_bounds = array<i64: 1, 32>}, {pipeline_mode = #tpu.pipeline_mode<synchronous>, transform_indices = @transform_11, window_bounds = array<i64: 1, 32>}, {pipeline_mode = #tpu.pipeline_mode<synchronous>, transform_indices = @transform_12, window_bounds = array<i64: 32, 128>}, {pipeline_mode = #tpu.pipeline_mode<synchronous>, transform_indices = @transform_13, window_bounds = array<i64: 1, 128>}, {pipeline_mode = #tpu.pipeline_mode<synchronous>, transform_indices = @transform_14, window_bounds = array<i64: 128, 32>}, {pipeline_mode = #tpu.pipeline_mode<synchronous>, transform_indices = @transform_15, window_bounds = array<i64: 1, 32>}, {pipeline_mode = #tpu.pipeline_mode<synchronous>, transform_indices = @transform_16, window_bounds = array<i64: 1, 32>}, {pipeline_mode = #tpu.pipeline_mode<synchronous>, transform_indices = @transform_17, window_bounds = array<i64: 1, 32>}, {pipeline_mode = #tpu.pipeline_mode<synchronous>, transform_indices = @transform_18, window_bounds = array<i64: 32, 96>}, {pipeline_mode = #tpu.pipeline_mode<synchronous>, transform_indices = @transform_19, window_bounds = array<i64: 1, 96>}, {pipeline_mode = #tpu.pipeline_mode<synchronous>, transform_indices = @transform_20, window_bounds = array<i64: 1, 32>}, {pipeline_mode = #tpu.pipeline_mode<synchronous>, transform_indices = @transform_21, window_bounds = array<i64: 1, 32>}, {pipeline_mode = #tpu.pipeline_mode<synchronous>, transform_indices = @transform_22, window_bounds = array<i64: 256, 32>}, {pipeline_mode = #tpu.pipeline_mode<synchronous>, transform_indices = @transform_23, window_bounds = array<i64: 32, 32>}, {pipeline_mode = #tpu.pipeline_mode<synchronous>, transform_indices = @transform_24, window_bounds = array<i64: 1, 32>}, {pipeline_mode = #tpu.pipeline_mode<synchronous>, transform_indices = @transform_25, window_bounds = array<i64: 1, 32>}, {pipeline_mode = #tpu.pipeline_mode<synchronous>, transform_indices = @transform_26, window_bounds = array<i64: 1, 32>}, {pipeline_mode = #tpu.pipeline_mode<synchronous>, transform_indices = @transform_27, window_bounds = array<i64: 32, 64>}, {pipeline_mode = #tpu.pipeline_mode<synchronous>, transform_indices = @transform_28, window_bounds = array<i64: 1, 64>}, {pipeline_mode = #tpu.pipeline_mode<synchronous>, transform_indices = @transform_29, window_bounds = array<i64: 5, 32>}, {pipeline_mode = #tpu.pipeline_mode<synchronous>, transform_indices = @transform_30, window_bounds = array<i64: 1, 32>}, {pipeline_mode = #tpu.pipeline_mode<synchronous>, transform_indices = @transform_31, window_bounds = array<i64: 32, 32>}, {pipeline_mode = #tpu.pipeline_mode<synchronous>, transform_indices = @transform_32, window_bounds = array<i64: 1, 32>}, {pipeline_mode = #tpu.pipeline_mode<synchronous>, transform_indices = @transform_33, window_bounds = array<i64: 1, 32>}, {pipeline_mode = #tpu.pipeline_mode<synchronous>, transform_indices = @transform_34, window_bounds = array<i64: 1, 32>}, {pipeline_mode = #tpu.pipeline_mode<synchronous>, transform_indices = @transform_35, window_bounds = array<i64: 32, 128>}, {pipeline_mode = #tpu.pipeline_mode<synchronous>, transform_indices = @transform_36, window_bounds = array<i64: 1, 128>}, {pipeline_mode = #tpu.pipeline_mode<synchronous>, transform_indices = @transform_37, window_bounds = array<i64: 128, 32>}, {pipeline_mode = #tpu.pipeline_mode<synchronous>, transform_indices = @transform_38, window_bounds = array<i64: 1, 32>}, {pipeline_mode = #tpu.pipeline_mode<synchronous>, transform_indices = @transform_39, window_bounds = array<i64: 1, 32>}, {pipeline_mode = #tpu.pipeline_mode<synchronous>, transform_indices = @transform_40, window_bounds = array<i64: 1, 32>}, {pipeline_mode = #tpu.pipeline_mode<synchronous>, transform_indices = @transform_41, window_bounds = array<i64: 1, 32>}, {pipeline_mode = #tpu.pipeline_mode<synchronous>, transform_indices = @transform_42, window_bounds = array<i64: 1, 32>}, {pipeline_mode = #tpu.pipeline_mode<synchronous>, transform_indices = @transform_43, window_bounds = array<i64: 32, 128>}, {pipeline_mode = #tpu.pipeline_mode<synchronous>, transform_indices = @transform_44, window_bounds = array<i64: 1, 128>}, {pipeline_mode = #tpu.pipeline_mode<synchronous>, transform_indices = @transform_45, window_bounds = array<i64: 128, 32>}, {pipeline_mode = #tpu.pipeline_mode<synchronous>, transform_indices = @transform_46, window_bounds = array<i64: 1, 32>}, {pipeline_mode = #tpu.pipeline_mode<synchronous>, transform_indices = @transform_47, window_bounds = array<i64: 1, 32>}, {pipeline_mode = #tpu.pipeline_mode<synchronous>, transform_indices = @transform_48, window_bounds = array<i64: 1, 32>}, {pipeline_mode = #tpu.pipeline_mode<synchronous>, transform_indices = @transform_49, window_bounds = array<i64: 32, 96>}, {pipeline_mode = #tpu.pipeline_mode<synchronous>, transform_indices = @transform_50, window_bounds = array<i64: 1, 96>}, {pipeline_mode = #tpu.pipeline_mode<synchronous>, transform_indices = @transform_51, window_bounds = array<i64: 1, 32>}, {pipeline_mode = #tpu.pipeline_mode<synchronous>, transform_indices = @transform_52, window_bounds = array<i64: 1, 32>}, {pipeline_mode = #tpu.pipeline_mode<synchronous>, transform_indices = @transform_53, window_bounds = array<i64: 256, 32>}, {pipeline_mode = #tpu.pipeline_mode<synchronous>, transform_indices = @transform_54, window_bounds = array<i64: 32, 32>}, {pipeline_mode = #tpu.pipeline_mode<synchronous>, transform_indices = @transform_55, window_bounds = array<i64: 1, 32>}, {pipeline_mode = #tpu.pipeline_mode<synchronous>, transform_indices = @transform_56, window_bounds = array<i64: 1, 32>}, {pipeline_mode = #tpu.pipeline_mode<synchronous>, transform_indices = @transform_57, window_bounds = array<i64: 1, 32>}, {pipeline_mode = #tpu.pipeline_mode<synchronous>, transform_indices = @transform_58, window_bounds = array<i64: 32, 64>}, {pipeline_mode = #tpu.pipeline_mode<synchronous>, transform_indices = @transform_59, window_bounds = array<i64: 1, 64>}, {pipeline_mode = #tpu.pipeline_mode<synchronous>, transform_indices = @transform_60, window_bounds = array<i64: 5, 32>}, {pipeline_mode = #tpu.pipeline_mode<synchronous>, transform_indices = @transform_61, window_bounds = array<i64: 1, 32>}, {pipeline_mode = #tpu.pipeline_mode<synchronous>, transform_indices = @transform_62, window_bounds = array<i64: 32, 32>}, {pipeline_mode = #tpu.pipeline_mode<synchronous>, transform_indices = @transform_63, window_bounds = array<i64: 1, 32>}, {pipeline_mode = #tpu.pipeline_mode<synchronous>, transform_indices = @transform_64, window_bounds = array<i64: 1, 32>}, {pipeline_mode = #tpu.pipeline_mode<synchronous>, transform_indices = @transform_65, window_bounds = array<i64: 1, 32>}, {pipeline_mode = #tpu.pipeline_mode<synchronous>, transform_indices = @transform_66, window_bounds = array<i64: 32, 128>}, {pipeline_mode = #tpu.pipeline_mode<synchronous>, transform_indices = @transform_67, window_bounds = array<i64: 1, 128>}, {pipeline_mode = #tpu.pipeline_mode<synchronous>, transform_indices = @transform_68, window_bounds = array<i64: 128, 32>}, {pipeline_mode = #tpu.pipeline_mode<synchronous>, transform_indices = @transform_69, window_bounds = array<i64: 1, 32>}, {pipeline_mode = #tpu.pipeline_mode<synchronous>, transform_indices = @transform_70, window_bounds = array<i64: 1, 32>}, {pipeline_mode = #tpu.pipeline_mode<synchronous>, transform_indices = @transform_71, window_bounds = array<i64: 1, 32>}, {transform_indices = @transform_72, window_bounds = array<i64: 1, 1, 1>}]} {
    %c0 = arith.constant 0 : index
    %c0_0 = arith.constant 0 : index
    %c0_1 = arith.constant 0 : index
    %0 = vector.load %arg1[%c0, %c0_0, %c0_1] : memref<1x8x16xf32, #tpu.memory_space<vmem>>, vector<1x8x16xf32>
    %1 = vector.shape_cast %0 : vector<1x8x16xf32> to vector<8x16xf32>
    %c0_2 = arith.constant 0 : index
    %c0_3 = arith.constant 0 : index
    %2 = vector.load %arg2[%c0_2, %c0_3] : memref<16x4xf32, #tpu.memory_space<vmem>>, vector<16x4xf32>
    %c0_4 = arith.constant 0 : index
    %c0_5 = arith.constant 0 : index
    %3 = vector.load %arg3[%c0_4, %c0_5] : memref<4x16xf32, #tpu.memory_space<vmem>>, vector<4x16xf32>
    %cst = arith.constant dense<0.000000e+00> : vector<16xf32>
    %4 = vector.multi_reduction <add>, %1, %cst [0] : vector<8x16xf32> to vector<16xf32>
    %5 = vector.shape_cast %4 : vector<16xf32> to vector<1x16xf32>
    %6 = arith.mulf %1, %1 : vector<8x16xf32>
    %cst_6 = arith.constant dense<0.000000e+00> : vector<16xf32>
    %7 = vector.multi_reduction <add>, %6, %cst_6 [0] : vector<8x16xf32> to vector<16xf32>
    %8 = vector.shape_cast %7 : vector<16xf32> to vector<1x16xf32>
    %cst_7 = arith.constant dense<0.000000e+00> : vector<1x4xf32>
    %9 = tpu.matmul %5, %2, %cst_7 {dimension_numbers = #tpu.dot_dimension_numbers<[1], [0], [0], [1], [0, 0, 1, 1], [], []>} : vector<1x16xf32>, vector<16x4xf32>, vector<1x4xf32> -> vector<1x4xf32>
    %cst_8 = arith.constant 3.125000e-02 : f32
    %10 = vector.broadcast %cst_8 : f32 to vector<1x4xf32>
    %11 = arith.mulf %9, %10 : vector<1x4xf32>
    %cst_9 = arith.constant dense<0.000000e+00> : vector<1x4xf32>
    %12 = tpu.matmul %8, %2, %cst_9 {dimension_numbers = #tpu.dot_dimension_numbers<[1], [0], [0], [1], [0, 0, 1, 1], [], []>} : vector<1x16xf32>, vector<16x4xf32>, vector<1x4xf32> -> vector<1x4xf32>
    %cst_10 = arith.constant 3.125000e-02 : f32
    %13 = vector.broadcast %cst_10 : f32 to vector<1x4xf32>
    %14 = arith.mulf %12, %13 : vector<1x4xf32>
    %15 = arith.mulf %11, %11 : vector<1x4xf32>
    %16 = arith.subf %14, %15 : vector<1x4xf32>
    %cst_11 = arith.constant 9.99999974E-6 : f32
    %17 = vector.broadcast %cst_11 : f32 to vector<1x4xf32>
    %18 = arith.addf %16, %17 : vector<1x4xf32>
    %19 = math.rsqrt %18 : vector<1x4xf32>
    %cst_12 = arith.constant dense<0.000000e+00> : vector<1x16xf32>
    %20 = tpu.matmul %11, %3, %cst_12 {dimension_numbers = #tpu.dot_dimension_numbers<[1], [0], [0], [1], [0, 0, 1, 1], [], []>} : vector<1x4xf32>, vector<4x16xf32>, vector<1x16xf32> -> vector<1x16xf32>
    %cst_13 = arith.constant dense<0.000000e+00> : vector<1x16xf32>
    %21 = tpu.matmul %19, %3, %cst_13 {dimension_numbers = #tpu.dot_dimension_numbers<[1], [0], [0], [1], [0, 0, 1, 1], [], []>} : vector<1x4xf32>, vector<4x16xf32>, vector<1x16xf32> -> vector<1x16xf32>
    %22 = vector.broadcast %20 : vector<1x16xf32> to vector<8x16xf32>
    %23 = arith.subf %1, %22 : vector<8x16xf32>
    %24 = vector.broadcast %21 : vector<1x16xf32> to vector<8x16xf32>
    %25 = arith.mulf %23, %24 : vector<8x16xf32>
    %c0_14 = arith.constant 0 : index
    %c0_15 = arith.constant 0 : index
    %26 = vector.load %arg4[%c0_14, %c0_15] : memref<16x32xf32, #tpu.memory_space<vmem>>, vector<16x32xf32>
    %27 = arith.truncf %25 : vector<8x16xf32> to vector<8x16xbf16>
    %28 = arith.truncf %26 : vector<16x32xf32> to vector<16x32xbf16>
    %cst_16 = arith.constant dense<0.000000e+00> : vector<8x32xf32>
    %29 = tpu.matmul %27, %28, %cst_16 {dimension_numbers = #tpu.dot_dimension_numbers<[1], [0], [0], [1], [0, 0, 1, 1], [], []>} : vector<8x16xbf16>, vector<16x32xbf16>, vector<8x32xf32> -> vector<8x32xf32>
    %c0_17 = arith.constant 0 : index
    %c0_18 = arith.constant 0 : index
    %30 = vector.load %arg5[%c0_17, %c0_18] : memref<1x32xf32, #tpu.memory_space<vmem>>, vector<1x32xf32>
    %31 = vector.broadcast %30 : vector<1x32xf32> to vector<8x32xf32>
    %32 = arith.addf %29, %31 : vector<8x32xf32>
    %c0_19 = arith.constant 0 : index
    %c0_20 = arith.constant 0 : index
    %33 = vector.load %arg8[%c0_19, %c0_20] : memref<32x32xf32, #tpu.memory_space<vmem>>, vector<32x32xf32>
    %c0_21 = arith.constant 0 : index
    %c0_22 = arith.constant 0 : index
    %34 = vector.load %arg9[%c0_21, %c0_22] : memref<32x32xf32, #tpu.memory_space<vmem>>, vector<32x32xf32>
    %c0_23 = arith.constant 0 : index
    %c0_24 = arith.constant 0 : index
    %35 = vector.load %arg10[%c0_23, %c0_24] : memref<8x256xf32, #tpu.memory_space<vmem>>, vector<8x256xf32>
    %c0_25 = arith.constant 0 : index
    %c0_26 = arith.constant 0 : index
    %36 = vector.load %arg42[%c0_25, %c0_26] : memref<1x32xf32, #tpu.memory_space<vmem>>, vector<1x32xf32>
    %c0_27 = arith.constant 0 : index
    %c0_28 = arith.constant 0 : index
    %37 = vector.load %arg43[%c0_27, %c0_28] : memref<1x32xf32, #tpu.memory_space<vmem>>, vector<1x32xf32>
    %c0_29 = arith.constant 0 : index
    %c0_30 = arith.constant 0 : index
    %38 = vector.load %arg44[%c0_29, %c0_30] : memref<32x128xf32, #tpu.memory_space<vmem>>, vector<32x128xf32>
    %c0_31 = arith.constant 0 : index
    %c0_32 = arith.constant 0 : index
    %39 = vector.load %arg45[%c0_31, %c0_32] : memref<1x128xf32, #tpu.memory_space<vmem>>, vector<1x128xf32>
    %c0_33 = arith.constant 0 : index
    %c0_34 = arith.constant 0 : index
    %40 = vector.load %arg46[%c0_33, %c0_34] : memref<128x32xf32, #tpu.memory_space<vmem>>, vector<128x32xf32>
    %c0_35 = arith.constant 0 : index
    %c0_36 = arith.constant 0 : index
    %41 = vector.load %arg47[%c0_35, %c0_36] : memref<1x32xf32, #tpu.memory_space<vmem>>, vector<1x32xf32>
    %c0_37 = arith.constant 0 : index
    %c0_38 = arith.constant 0 : index
    %42 = vector.load %arg48[%c0_37, %c0_38] : memref<1x32xf32, #tpu.memory_space<vmem>>, vector<1x32xf32>
    %c0_39 = arith.constant 0 : index
    %c0_40 = arith.constant 0 : index
    %43 = vector.load %arg49[%c0_39, %c0_40] : memref<1x32xf32, #tpu.memory_space<vmem>>, vector<1x32xf32>
    %c0_41 = arith.constant 0 : index
    %c0_42 = arith.constant 0 : index
    %44 = vector.load %arg50[%c0_41, %c0_42] : memref<32x96xf32, #tpu.memory_space<vmem>>, vector<32x96xf32>
    %c0_43 = arith.constant 0 : index
    %c0_44 = arith.constant 0 : index
    %45 = vector.load %arg51[%c0_43, %c0_44] : memref<1x96xf32, #tpu.memory_space<vmem>>, vector<1x96xf32>
    %c0_45 = arith.constant 0 : index
    %c0_46 = arith.constant 0 : index
    %46 = vector.load %arg52[%c0_45, %c0_46] : memref<1x32xf32, #tpu.memory_space<vmem>>, vector<1x32xf32>
    %c0_47 = arith.constant 0 : index
    %c0_48 = arith.constant 0 : index
    %47 = vector.load %arg53[%c0_47, %c0_48] : memref<1x32xf32, #tpu.memory_space<vmem>>, vector<1x32xf32>
    %c0_49 = arith.constant 0 : index
    %c0_50 = arith.constant 0 : index
    %48 = vector.load %arg54[%c0_49, %c0_50] : memref<256x32xf32, #tpu.memory_space<vmem>>, vector<256x32xf32>
    %c0_51 = arith.constant 0 : index
    %c0_52 = arith.constant 0 : index
    %49 = vector.load %arg55[%c0_51, %c0_52] : memref<32x32xf32, #tpu.memory_space<vmem>>, vector<32x32xf32>
    %c0_53 = arith.constant 0 : index
    %c0_54 = arith.constant 0 : index
    %50 = vector.load %arg56[%c0_53, %c0_54] : memref<1x32xf32, #tpu.memory_space<vmem>>, vector<1x32xf32>
    %c0_55 = arith.constant 0 : index
    %c0_56 = arith.constant 0 : index
    %51 = vector.load %arg57[%c0_55, %c0_56] : memref<1x32xf32, #tpu.memory_space<vmem>>, vector<1x32xf32>
    %c0_57 = arith.constant 0 : index
    %c0_58 = arith.constant 0 : index
    %52 = vector.load %arg58[%c0_57, %c0_58] : memref<1x32xf32, #tpu.memory_space<vmem>>, vector<1x32xf32>
    %c0_59 = arith.constant 0 : index
    %c0_60 = arith.constant 0 : index
    %53 = vector.load %arg59[%c0_59, %c0_60] : memref<32x64xf32, #tpu.memory_space<vmem>>, vector<32x64xf32>
    %c0_61 = arith.constant 0 : index
    %c0_62 = arith.constant 0 : index
    %54 = vector.load %arg60[%c0_61, %c0_62] : memref<1x64xf32, #tpu.memory_space<vmem>>, vector<1x64xf32>
    %c0_63 = arith.constant 0 : index
    %c0_64 = arith.constant 0 : index
    %55 = vector.load %arg61[%c0_63, %c0_64] : memref<5x32xf32, #tpu.memory_space<vmem>>, vector<5x32xf32>
    %c0_65 = arith.constant 0 : index
    %c0_66 = arith.constant 0 : index
    %56 = vector.load %arg62[%c0_65, %c0_66] : memref<1x32xf32, #tpu.memory_space<vmem>>, vector<1x32xf32>
    %c0_67 = arith.constant 0 : index
    %c0_68 = arith.constant 0 : index
    %57 = vector.load %arg63[%c0_67, %c0_68] : memref<32x32xf32, #tpu.memory_space<vmem>>, vector<32x32xf32>
    %c0_69 = arith.constant 0 : index
    %c0_70 = arith.constant 0 : index
    %58 = vector.load %arg64[%c0_69, %c0_70] : memref<1x32xf32, #tpu.memory_space<vmem>>, vector<1x32xf32>
    %c0_71 = arith.constant 0 : index
    %c0_72 = arith.constant 0 : index
    %59 = vector.load %arg65[%c0_71, %c0_72] : memref<1x32xf32, #tpu.memory_space<vmem>>, vector<1x32xf32>
    %c0_73 = arith.constant 0 : index
    %c0_74 = arith.constant 0 : index
    %60 = vector.load %arg66[%c0_73, %c0_74] : memref<1x32xf32, #tpu.memory_space<vmem>>, vector<1x32xf32>
    %c0_75 = arith.constant 0 : index
    %c0_76 = arith.constant 0 : index
    %61 = vector.load %arg67[%c0_75, %c0_76] : memref<32x128xf32, #tpu.memory_space<vmem>>, vector<32x128xf32>
    %c0_77 = arith.constant 0 : index
    %c0_78 = arith.constant 0 : index
    %62 = vector.load %arg68[%c0_77, %c0_78] : memref<1x128xf32, #tpu.memory_space<vmem>>, vector<1x128xf32>
    %c0_79 = arith.constant 0 : index
    %c0_80 = arith.constant 0 : index
    %63 = vector.load %arg69[%c0_79, %c0_80] : memref<128x32xf32, #tpu.memory_space<vmem>>, vector<128x32xf32>
    %c0_81 = arith.constant 0 : index
    %c0_82 = arith.constant 0 : index
    %64 = vector.load %arg70[%c0_81, %c0_82] : memref<1x32xf32, #tpu.memory_space<vmem>>, vector<1x32xf32>
    %c0_83 = arith.constant 0 : index
    %c0_84 = arith.constant 0 : index
    %65 = vector.load %arg71[%c0_83, %c0_84] : memref<1x32xf32, #tpu.memory_space<vmem>>, vector<1x32xf32>
    %c0_85 = arith.constant 0 : index
    %c0_86 = arith.constant 0 : index
    %66 = vector.load %arg72[%c0_85, %c0_86] : memref<1x32xf32, #tpu.memory_space<vmem>>, vector<1x32xf32>
    %cst_87 = arith.constant dense<0.000000e+00> : vector<8xf32>
    %67 = vector.multi_reduction <add>, %32, %cst_87 [1] : vector<8x32xf32> to vector<8xf32>
    %68 = vector.shape_cast %67 : vector<8xf32> to vector<8x1xf32>
    %cst_88 = arith.constant 3.200000e+01 : f32
    %69 = vector.broadcast %cst_88 : f32 to vector<8x1xf32>
    %70 = arith.divf %68, %69 : vector<8x1xf32>
    %71 = vector.broadcast %70 : vector<8x1xf32> to vector<8x32xf32>
    %72 = arith.subf %32, %71 : vector<8x32xf32>
    %73 = arith.mulf %72, %72 : vector<8x32xf32>
    %cst_89 = arith.constant dense<0.000000e+00> : vector<8xf32>
    %74 = vector.multi_reduction <add>, %73, %cst_89 [1] : vector<8x32xf32> to vector<8xf32>
    %75 = vector.shape_cast %74 : vector<8xf32> to vector<8x1xf32>
    %cst_90 = arith.constant 3.200000e+01 : f32
    %76 = vector.broadcast %cst_90 : f32 to vector<8x1xf32>
    %77 = arith.divf %75, %76 : vector<8x1xf32>
    %78 = vector.broadcast %70 : vector<8x1xf32> to vector<8x32xf32>
    %79 = arith.subf %32, %78 : vector<8x32xf32>
    %cst_91 = arith.constant 9.99999974E-6 : f32
    %80 = vector.broadcast %cst_91 : f32 to vector<8x1xf32>
    %81 = arith.addf %77, %80 : vector<8x1xf32>
    %82 = math.rsqrt %81 : vector<8x1xf32>
    %83 = vector.broadcast %82 : vector<8x1xf32> to vector<8x32xf32>
    %84 = arith.mulf %79, %83 : vector<8x32xf32>
    %85 = vector.broadcast %36 : vector<1x32xf32> to vector<8x32xf32>
    %86 = arith.mulf %84, %85 : vector<8x32xf32>
    %87 = vector.broadcast %37 : vector<1x32xf32> to vector<8x32xf32>
    %88 = arith.addf %86, %87 : vector<8x32xf32>
    %89 = arith.truncf %88 : vector<8x32xf32> to vector<8x32xbf16>
    %90 = arith.truncf %38 : vector<32x128xf32> to vector<32x128xbf16>
    %cst_92 = arith.constant dense<0.000000e+00> : vector<8x128xf32>
    %91 = tpu.matmul %89, %90, %cst_92 {dimension_numbers = #tpu.dot_dimension_numbers<[1], [0], [0], [1], [0, 0, 1, 1], [], []>} : vector<8x32xbf16>, vector<32x128xbf16>, vector<8x128xf32> -> vector<8x128xf32>
    %92 = vector.broadcast %39 : vector<1x128xf32> to vector<8x128xf32>
    %93 = arith.addf %91, %92 : vector<8x128xf32>
    %94 = arith.negf %93 : vector<8x128xf32>
    %95 = math.exp %94 : vector<8x128xf32>
    %cst_93 = arith.constant 1.000000e+00 : f32
    %96 = vector.broadcast %cst_93 : f32 to vector<8x128xf32>
    %97 = arith.addf %96, %95 : vector<8x128xf32>
    %98 = arith.divf %96, %97 : vector<8x128xf32>
    %99 = arith.mulf %93, %98 : vector<8x128xf32>
    %100 = arith.truncf %99 : vector<8x128xf32> to vector<8x128xbf16>
    %101 = arith.truncf %40 : vector<128x32xf32> to vector<128x32xbf16>
    %cst_94 = arith.constant dense<0.000000e+00> : vector<8x32xf32>
    %102 = tpu.matmul %100, %101, %cst_94 {dimension_numbers = #tpu.dot_dimension_numbers<[1], [0], [0], [1], [0, 0, 1, 1], [], []>} : vector<8x128xbf16>, vector<128x32xbf16>, vector<8x32xf32> -> vector<8x32xf32>
    %103 = vector.broadcast %41 : vector<1x32xf32> to vector<8x32xf32>
    %104 = arith.addf %102, %103 : vector<8x32xf32>
    %cst_95 = arith.constant 5.000000e-01 : f32
    %105 = vector.broadcast %cst_95 : f32 to vector<8x32xf32>
    %106 = arith.mulf %105, %104 : vector<8x32xf32>
    %107 = arith.addf %32, %106 : vector<8x32xf32>
    %cst_96 = arith.constant dense<0.000000e+00> : vector<8xf32>
    %108 = vector.multi_reduction <add>, %107, %cst_96 [1] : vector<8x32xf32> to vector<8xf32>
    %109 = vector.shape_cast %108 : vector<8xf32> to vector<8x1xf32>
    %cst_97 = arith.constant 3.200000e+01 : f32
    %110 = vector.broadcast %cst_97 : f32 to vector<8x1xf32>
    %111 = arith.divf %109, %110 : vector<8x1xf32>
    %112 = vector.broadcast %111 : vector<8x1xf32> to vector<8x32xf32>
    %113 = arith.subf %107, %112 : vector<8x32xf32>
    %114 = arith.mulf %113, %113 : vector<8x32xf32>
    %cst_98 = arith.constant dense<0.000000e+00> : vector<8xf32>
    %115 = vector.multi_reduction <add>, %114, %cst_98 [1] : vector<8x32xf32> to vector<8xf32>
    %116 = vector.shape_cast %115 : vector<8xf32> to vector<8x1xf32>
    %cst_99 = arith.constant 3.200000e+01 : f32
    %117 = vector.broadcast %cst_99 : f32 to vector<8x1xf32>
    %118 = arith.divf %116, %117 : vector<8x1xf32>
    %119 = vector.broadcast %111 : vector<8x1xf32> to vector<8x32xf32>
    %120 = arith.subf %107, %119 : vector<8x32xf32>
    %cst_100 = arith.constant 9.99999974E-6 : f32
    %121 = vector.broadcast %cst_100 : f32 to vector<8x1xf32>
    %122 = arith.addf %118, %121 : vector<8x1xf32>
    %123 = math.rsqrt %122 : vector<8x1xf32>
    %124 = vector.broadcast %123 : vector<8x1xf32> to vector<8x32xf32>
    %125 = arith.mulf %120, %124 : vector<8x32xf32>
    %126 = vector.broadcast %42 : vector<1x32xf32> to vector<8x32xf32>
    %127 = arith.mulf %125, %126 : vector<8x32xf32>
    %128 = vector.broadcast %43 : vector<1x32xf32> to vector<8x32xf32>
    %129 = arith.addf %127, %128 : vector<8x32xf32>
    %130 = arith.truncf %129 : vector<8x32xf32> to vector<8x32xbf16>
    %131 = arith.truncf %44 : vector<32x96xf32> to vector<32x96xbf16>
    %cst_101 = arith.constant dense<0.000000e+00> : vector<8x96xf32>
    %132 = tpu.matmul %130, %131, %cst_101 {dimension_numbers = #tpu.dot_dimension_numbers<[1], [0], [0], [1], [0, 0, 1, 1], [], []>} : vector<8x32xbf16>, vector<32x96xbf16>, vector<8x96xf32> -> vector<8x96xf32>
    %133 = vector.broadcast %45 : vector<1x96xf32> to vector<8x96xf32>
    %134 = arith.addf %132, %133 : vector<8x96xf32>
    %135 = vector.extract_strided_slice %134 {offsets = [0, 0], sizes = [8, 32], strides = [1, 1]} : vector<8x96xf32> to vector<8x32xf32>
    %136 = vector.extract_strided_slice %134 {offsets = [0, 32], sizes = [8, 32], strides = [1, 1]} : vector<8x96xf32> to vector<8x32xf32>
    %137 = vector.extract_strided_slice %134 {offsets = [0, 64], sizes = [8, 32], strides = [1, 1]} : vector<8x96xf32> to vector<8x32xf32>
    %138 = vector.broadcast %46 : vector<1x32xf32> to vector<8x32xf32>
    %139 = arith.addf %135, %138 : vector<8x32xf32>
    %140 = vector.broadcast %47 : vector<1x32xf32> to vector<8x32xf32>
    %141 = arith.addf %135, %140 : vector<8x32xf32>
    %142 = tpu.concatenate %136, %136, %136, %136 in 0 : vector<8x32xf32>, vector<8x32xf32>, vector<8x32xf32>, vector<8x32xf32> -> vector<32x32xf32>
    %143 = arith.mulf %142, %33 : vector<32x32xf32>
    %144 = tpu.concatenate %137, %137, %137, %137 in 0 : vector<8x32xf32>, vector<8x32xf32>, vector<8x32xf32>, vector<8x32xf32> -> vector<32x32xf32>
    %145 = arith.mulf %144, %33 : vector<32x32xf32>
    %146 = arith.truncf %139 : vector<8x32xf32> to vector<8x32xbf16>
    %147 = arith.truncf %143 : vector<32x32xf32> to vector<32x32xbf16>
    %cst_102 = arith.constant dense<0.000000e+00> : vector<8x32xf32>
    %148 = tpu.matmul %146, %147, %cst_102 {dimension_numbers = #tpu.dot_dimension_numbers<[1], [1], [0], [0], [0, 0, 1, 0], [], []>} : vector<8x32xbf16>, vector<32x32xbf16>, vector<8x32xf32> -> vector<8x32xf32>
    %149 = tpu.concatenate %141, %141, %141, %141, %141, %141, %141, %141 in 1 : vector<8x32xf32>, vector<8x32xf32>, vector<8x32xf32>, vector<8x32xf32>, vector<8x32xf32>, vector<8x32xf32>, vector<8x32xf32>, vector<8x32xf32> -> vector<8x256xf32>
    %150 = arith.mulf %149, %35 : vector<8x256xf32>
    %151 = arith.truncf %150 : vector<8x256xf32> to vector<8x256xbf16>
    %152 = arith.truncf %48 : vector<256x32xf32> to vector<256x32xbf16>
    %cst_103 = arith.constant dense<0.000000e+00> : vector<8x32xf32>
    %153 = tpu.matmul %151, %152, %cst_103 {dimension_numbers = #tpu.dot_dimension_numbers<[1], [0], [0], [1], [0, 0, 1, 1], [], []>} : vector<8x256xbf16>, vector<256x32xbf16>, vector<8x32xf32> -> vector<8x32xf32>
    %154 = arith.addf %148, %153 : vector<8x32xf32>
    %cst_104 = arith.constant 0.353553385 : f32
    %155 = vector.broadcast %cst_104 : f32 to vector<8x32xf32>
    %156 = arith.mulf %154, %155 : vector<8x32xf32>
    %cst_105 = arith.constant dense<0xFF800000> : vector<8xf32>
    %157 = vector.multi_reduction <maximumf>, %156, %cst_105 [1] : vector<8x32xf32> to vector<8xf32>
    %158 = vector.shape_cast %157 : vector<8xf32> to vector<8x1xf32>
    %159 = vector.broadcast %158 : vector<8x1xf32> to vector<8x32xf32>
    %160 = arith.subf %156, %159 : vector<8x32xf32>
    %161 = math.exp %160 : vector<8x32xf32>
    %cst_106 = arith.constant dense<0.000000e+00> : vector<8x32xf32>
    %162 = tpu.matmul %161, %34, %cst_106 {dimension_numbers = #tpu.dot_dimension_numbers<[1], [0], [0], [1], [0, 0, 1, 1], [], []>} : vector<8x32xf32>, vector<32x32xf32>, vector<8x32xf32> -> vector<8x32xf32>
    %163 = arith.divf %161, %162 : vector<8x32xf32>
    %164 = arith.truncf %163 : vector<8x32xf32> to vector<8x32xbf16>
    %165 = arith.truncf %145 : vector<32x32xf32> to vector<32x32xbf16>
    %cst_107 = arith.constant dense<0.000000e+00> : vector<8x32xf32>
    %166 = tpu.matmul %164, %165, %cst_107 {dimension_numbers = #tpu.dot_dimension_numbers<[1], [0], [0], [1], [0, 0, 1, 1], [], []>} : vector<8x32xbf16>, vector<32x32xbf16>, vector<8x32xf32> -> vector<8x32xf32>
    %167 = arith.truncf %166 : vector<8x32xf32> to vector<8x32xbf16>
    %168 = arith.truncf %49 : vector<32x32xf32> to vector<32x32xbf16>
    %cst_108 = arith.constant dense<0.000000e+00> : vector<8x32xf32>
    %169 = tpu.matmul %167, %168, %cst_108 {dimension_numbers = #tpu.dot_dimension_numbers<[1], [0], [0], [1], [0, 0, 1, 1], [], []>} : vector<8x32xbf16>, vector<32x32xbf16>, vector<8x32xf32> -> vector<8x32xf32>
    %170 = arith.addf %107, %169 : vector<8x32xf32>
    %171 = vector.broadcast %50 : vector<1x32xf32> to vector<8x32xf32>
    %172 = arith.addf %170, %171 : vector<8x32xf32>
    %cst_109 = arith.constant dense<0.000000e+00> : vector<8xf32>
    %173 = vector.multi_reduction <add>, %172, %cst_109 [1] : vector<8x32xf32> to vector<8xf32>
    %174 = vector.shape_cast %173 : vector<8xf32> to vector<8x1xf32>
    %cst_110 = arith.constant 3.200000e+01 : f32
    %175 = vector.broadcast %cst_110 : f32 to vector<8x1xf32>
    %176 = arith.divf %174, %175 : vector<8x1xf32>
    %177 = vector.broadcast %176 : vector<8x1xf32> to vector<8x32xf32>
    %178 = arith.subf %172, %177 : vector<8x32xf32>
    %179 = arith.mulf %178, %178 : vector<8x32xf32>
    %cst_111 = arith.constant dense<0.000000e+00> : vector<8xf32>
    %180 = vector.multi_reduction <add>, %179, %cst_111 [1] : vector<8x32xf32> to vector<8xf32>
    %181 = vector.shape_cast %180 : vector<8xf32> to vector<8x1xf32>
    %cst_112 = arith.constant 3.200000e+01 : f32
    %182 = vector.broadcast %cst_112 : f32 to vector<8x1xf32>
    %183 = arith.divf %181, %182 : vector<8x1xf32>
    %184 = vector.broadcast %176 : vector<8x1xf32> to vector<8x32xf32>
    %185 = arith.subf %172, %184 : vector<8x32xf32>
    %cst_113 = arith.constant 9.99999974E-6 : f32
    %186 = vector.broadcast %cst_113 : f32 to vector<8x1xf32>
    %187 = arith.addf %183, %186 : vector<8x1xf32>
    %188 = math.rsqrt %187 : vector<8x1xf32>
    %189 = vector.broadcast %188 : vector<8x1xf32> to vector<8x32xf32>
    %190 = arith.mulf %185, %189 : vector<8x32xf32>
    %191 = vector.broadcast %51 : vector<1x32xf32> to vector<8x32xf32>
    %192 = arith.mulf %190, %191 : vector<8x32xf32>
    %193 = vector.broadcast %52 : vector<1x32xf32> to vector<8x32xf32>
    %194 = arith.addf %192, %193 : vector<8x32xf32>
    %195 = arith.truncf %194 : vector<8x32xf32> to vector<8x32xbf16>
    %196 = arith.truncf %53 : vector<32x64xf32> to vector<32x64xbf16>
    %cst_114 = arith.constant dense<0.000000e+00> : vector<8x64xf32>
    %197 = tpu.matmul %195, %196, %cst_114 {dimension_numbers = #tpu.dot_dimension_numbers<[1], [0], [0], [1], [0, 0, 1, 1], [], []>} : vector<8x32xbf16>, vector<32x64xbf16>, vector<8x64xf32> -> vector<8x64xf32>
    %198 = vector.broadcast %54 : vector<1x64xf32> to vector<8x64xf32>
    %199 = arith.addf %197, %198 : vector<8x64xf32>
    %200 = vector.extract_strided_slice %199 {offsets = [0, 0], sizes = [8, 32], strides = [1, 1]} : vector<8x64xf32> to vector<8x32xf32>
    %201 = vector.extract_strided_slice %199 {offsets = [0, 32], sizes = [8, 32], strides = [1, 1]} : vector<8x64xf32> to vector<8x32xf32>
    %202 = arith.negf %201 : vector<8x32xf32>
    %203 = math.exp %202 : vector<8x32xf32>
    %cst_115 = arith.constant 1.000000e+00 : f32
    %204 = vector.broadcast %cst_115 : f32 to vector<8x32xf32>
    %205 = arith.addf %204, %203 : vector<8x32xf32>
    %206 = arith.divf %204, %205 : vector<8x32xf32>
    %207 = arith.mulf %200, %206 : vector<8x32xf32>
    %cst_116 = arith.constant 0.000000e+00 : f32
    %208 = vector.broadcast %cst_116 : f32 to vector<2x32xf32>
    %209 = tpu.concatenate %208, %207, %208 in 0 : vector<2x32xf32>, vector<8x32xf32>, vector<2x32xf32> -> vector<12x32xf32>
    %cst_117 = arith.constant 0.000000e+00 : f32
    %210 = vector.broadcast %cst_117 : f32 to vector<8x32xf32>
    %211 = vector.extract_strided_slice %209 {offsets = [0, 0], sizes = [8, 32], strides = [1, 1]} : vector<12x32xf32> to vector<8x32xf32>
    %212 = vector.extract_strided_slice %55 {offsets = [0, 0], sizes = [1, 32], strides = [1, 1]} : vector<5x32xf32> to vector<1x32xf32>
    %213 = vector.broadcast %212 : vector<1x32xf32> to vector<8x32xf32>
    %214 = arith.mulf %211, %213 : vector<8x32xf32>
    %215 = arith.addf %210, %214 : vector<8x32xf32>
    %216 = vector.extract_strided_slice %209 {offsets = [1, 0], sizes = [8, 32], strides = [1, 1]} : vector<12x32xf32> to vector<8x32xf32>
    %217 = vector.extract_strided_slice %55 {offsets = [1, 0], sizes = [1, 32], strides = [1, 1]} : vector<5x32xf32> to vector<1x32xf32>
    %218 = vector.broadcast %217 : vector<1x32xf32> to vector<8x32xf32>
    %219 = arith.mulf %216, %218 : vector<8x32xf32>
    %220 = arith.addf %215, %219 : vector<8x32xf32>
    %221 = vector.extract_strided_slice %209 {offsets = [2, 0], sizes = [8, 32], strides = [1, 1]} : vector<12x32xf32> to vector<8x32xf32>
    %222 = vector.extract_strided_slice %55 {offsets = [2, 0], sizes = [1, 32], strides = [1, 1]} : vector<5x32xf32> to vector<1x32xf32>
    %223 = vector.broadcast %222 : vector<1x32xf32> to vector<8x32xf32>
    %224 = arith.mulf %221, %223 : vector<8x32xf32>
    %225 = arith.addf %220, %224 : vector<8x32xf32>
    %226 = vector.extract_strided_slice %209 {offsets = [3, 0], sizes = [8, 32], strides = [1, 1]} : vector<12x32xf32> to vector<8x32xf32>
    %227 = vector.extract_strided_slice %55 {offsets = [3, 0], sizes = [1, 32], strides = [1, 1]} : vector<5x32xf32> to vector<1x32xf32>
    %228 = vector.broadcast %227 : vector<1x32xf32> to vector<8x32xf32>
    %229 = arith.mulf %226, %228 : vector<8x32xf32>
    %230 = arith.addf %225, %229 : vector<8x32xf32>
    %231 = vector.extract_strided_slice %209 {offsets = [4, 0], sizes = [8, 32], strides = [1, 1]} : vector<12x32xf32> to vector<8x32xf32>
    %232 = vector.extract_strided_slice %55 {offsets = [4, 0], sizes = [1, 32], strides = [1, 1]} : vector<5x32xf32> to vector<1x32xf32>
    %233 = vector.broadcast %232 : vector<1x32xf32> to vector<8x32xf32>
    %234 = arith.mulf %231, %233 : vector<8x32xf32>
    %235 = arith.addf %230, %234 : vector<8x32xf32>
    %236 = vector.broadcast %56 : vector<1x32xf32> to vector<8x32xf32>
    %237 = arith.addf %235, %236 : vector<8x32xf32>
    %cst_118 = arith.constant 0.999994993 : f32
    %238 = vector.broadcast %cst_118 : f32 to vector<8x32xf32>
    %239 = arith.mulf %237, %238 : vector<8x32xf32>
    %240 = arith.negf %239 : vector<8x32xf32>
    %241 = math.exp %240 : vector<8x32xf32>
    %cst_119 = arith.constant 1.000000e+00 : f32
    %242 = vector.broadcast %cst_119 : f32 to vector<8x32xf32>
    %243 = arith.addf %242, %241 : vector<8x32xf32>
    %244 = arith.divf %242, %243 : vector<8x32xf32>
    %245 = arith.mulf %239, %244 : vector<8x32xf32>
    %246 = arith.truncf %245 : vector<8x32xf32> to vector<8x32xbf16>
    %247 = arith.truncf %57 : vector<32x32xf32> to vector<32x32xbf16>
    %cst_120 = arith.constant dense<0.000000e+00> : vector<8x32xf32>
    %248 = tpu.matmul %246, %247, %cst_120 {dimension_numbers = #tpu.dot_dimension_numbers<[1], [0], [0], [1], [0, 0, 1, 1], [], []>} : vector<8x32xbf16>, vector<32x32xbf16>, vector<8x32xf32> -> vector<8x32xf32>
    %249 = arith.addf %172, %248 : vector<8x32xf32>
    %250 = vector.broadcast %58 : vector<1x32xf32> to vector<8x32xf32>
    %251 = arith.addf %249, %250 : vector<8x32xf32>
    %cst_121 = arith.constant dense<0.000000e+00> : vector<8xf32>
    %252 = vector.multi_reduction <add>, %251, %cst_121 [1] : vector<8x32xf32> to vector<8xf32>
    %253 = vector.shape_cast %252 : vector<8xf32> to vector<8x1xf32>
    %cst_122 = arith.constant 3.200000e+01 : f32
    %254 = vector.broadcast %cst_122 : f32 to vector<8x1xf32>
    %255 = arith.divf %253, %254 : vector<8x1xf32>
    %256 = vector.broadcast %255 : vector<8x1xf32> to vector<8x32xf32>
    %257 = arith.subf %251, %256 : vector<8x32xf32>
    %258 = arith.mulf %257, %257 : vector<8x32xf32>
    %cst_123 = arith.constant dense<0.000000e+00> : vector<8xf32>
    %259 = vector.multi_reduction <add>, %258, %cst_123 [1] : vector<8x32xf32> to vector<8xf32>
    %260 = vector.shape_cast %259 : vector<8xf32> to vector<8x1xf32>
    %cst_124 = arith.constant 3.200000e+01 : f32
    %261 = vector.broadcast %cst_124 : f32 to vector<8x1xf32>
    %262 = arith.divf %260, %261 : vector<8x1xf32>
    %263 = vector.broadcast %255 : vector<8x1xf32> to vector<8x32xf32>
    %264 = arith.subf %251, %263 : vector<8x32xf32>
    %cst_125 = arith.constant 9.99999974E-6 : f32
    %265 = vector.broadcast %cst_125 : f32 to vector<8x1xf32>
    %266 = arith.addf %262, %265 : vector<8x1xf32>
    %267 = math.rsqrt %266 : vector<8x1xf32>
    %268 = vector.broadcast %267 : vector<8x1xf32> to vector<8x32xf32>
    %269 = arith.mulf %264, %268 : vector<8x32xf32>
    %270 = vector.broadcast %59 : vector<1x32xf32> to vector<8x32xf32>
    %271 = arith.mulf %269, %270 : vector<8x32xf32>
    %272 = vector.broadcast %60 : vector<1x32xf32> to vector<8x32xf32>
    %273 = arith.addf %271, %272 : vector<8x32xf32>
    %274 = arith.truncf %273 : vector<8x32xf32> to vector<8x32xbf16>
    %275 = arith.truncf %61 : vector<32x128xf32> to vector<32x128xbf16>
    %cst_126 = arith.constant dense<0.000000e+00> : vector<8x128xf32>
    %276 = tpu.matmul %274, %275, %cst_126 {dimension_numbers = #tpu.dot_dimension_numbers<[1], [0], [0], [1], [0, 0, 1, 1], [], []>} : vector<8x32xbf16>, vector<32x128xbf16>, vector<8x128xf32> -> vector<8x128xf32>
    %277 = vector.broadcast %62 : vector<1x128xf32> to vector<8x128xf32>
    %278 = arith.addf %276, %277 : vector<8x128xf32>
    %279 = arith.negf %278 : vector<8x128xf32>
    %280 = math.exp %279 : vector<8x128xf32>
    %cst_127 = arith.constant 1.000000e+00 : f32
    %281 = vector.broadcast %cst_127 : f32 to vector<8x128xf32>
    %282 = arith.addf %281, %280 : vector<8x128xf32>
    %283 = arith.divf %281, %282 : vector<8x128xf32>
    %284 = arith.mulf %278, %283 : vector<8x128xf32>
    %285 = arith.truncf %284 : vector<8x128xf32> to vector<8x128xbf16>
    %286 = arith.truncf %63 : vector<128x32xf32> to vector<128x32xbf16>
    %cst_128 = arith.constant dense<0.000000e+00> : vector<8x32xf32>
    %287 = tpu.matmul %285, %286, %cst_128 {dimension_numbers = #tpu.dot_dimension_numbers<[1], [0], [0], [1], [0, 0, 1, 1], [], []>} : vector<8x128xbf16>, vector<128x32xbf16>, vector<8x32xf32> -> vector<8x32xf32>
    %288 = vector.broadcast %64 : vector<1x32xf32> to vector<8x32xf32>
    %289 = arith.addf %287, %288 : vector<8x32xf32>
    %cst_129 = arith.constant 5.000000e-01 : f32
    %290 = vector.broadcast %cst_129 : f32 to vector<8x32xf32>
    %291 = arith.mulf %290, %289 : vector<8x32xf32>
    %292 = arith.addf %251, %291 : vector<8x32xf32>
    %cst_130 = arith.constant dense<0.000000e+00> : vector<8xf32>
    %293 = vector.multi_reduction <add>, %292, %cst_130 [1] : vector<8x32xf32> to vector<8xf32>
    %294 = vector.shape_cast %293 : vector<8xf32> to vector<8x1xf32>
    %cst_131 = arith.constant 3.200000e+01 : f32
    %295 = vector.broadcast %cst_131 : f32 to vector<8x1xf32>
    %296 = arith.divf %294, %295 : vector<8x1xf32>
    %297 = vector.broadcast %296 : vector<8x1xf32> to vector<8x32xf32>
    %298 = arith.subf %292, %297 : vector<8x32xf32>
    %299 = arith.mulf %298, %298 : vector<8x32xf32>
    %cst_132 = arith.constant dense<0.000000e+00> : vector<8xf32>
    %300 = vector.multi_reduction <add>, %299, %cst_132 [1] : vector<8x32xf32> to vector<8xf32>
    %301 = vector.shape_cast %300 : vector<8xf32> to vector<8x1xf32>
    %cst_133 = arith.constant 3.200000e+01 : f32
    %302 = vector.broadcast %cst_133 : f32 to vector<8x1xf32>
    %303 = arith.divf %301, %302 : vector<8x1xf32>
    %304 = vector.broadcast %296 : vector<8x1xf32> to vector<8x32xf32>
    %305 = arith.subf %292, %304 : vector<8x32xf32>
    %cst_134 = arith.constant 9.99999974E-6 : f32
    %306 = vector.broadcast %cst_134 : f32 to vector<8x1xf32>
    %307 = arith.addf %303, %306 : vector<8x1xf32>
    %308 = math.rsqrt %307 : vector<8x1xf32>
    %309 = vector.broadcast %308 : vector<8x1xf32> to vector<8x32xf32>
    %310 = arith.mulf %305, %309 : vector<8x32xf32>
    %311 = vector.broadcast %65 : vector<1x32xf32> to vector<8x32xf32>
    %312 = arith.mulf %310, %311 : vector<8x32xf32>
    %313 = vector.broadcast %66 : vector<1x32xf32> to vector<8x32xf32>
    %314 = arith.addf %312, %313 : vector<8x32xf32>
    %c0_135 = arith.constant 0 : index
    %c0_136 = arith.constant 0 : index
    %315 = vector.load %arg6[%c0_135, %c0_136] : memref<1x32xf32, #tpu.memory_space<vmem>>, vector<1x32xf32>
    %316 = arith.truncf %315 : vector<1x32xf32> to vector<1x32xbf16>
    %317 = arith.truncf %314 : vector<8x32xf32> to vector<8x32xbf16>
    %cst_137 = arith.constant dense<0.000000e+00> : vector<1x8xf32>
    %318 = tpu.matmul %316, %317, %cst_137 {dimension_numbers = #tpu.dot_dimension_numbers<[1], [1], [0], [0], [0, 0, 1, 0], [], []>} : vector<1x32xbf16>, vector<8x32xbf16>, vector<1x8xf32> -> vector<1x8xf32>
    %c0_138 = arith.constant 0 : index
    %c0_139 = arith.constant 0 : index
    %319 = vector.load %arg7[%c0_138, %c0_139] : memref<1x1xf32, #tpu.memory_space<vmem>>, vector<1x1xf32>
    %320 = vector.broadcast %319 : vector<1x1xf32> to vector<1x8xf32>
    %321 = arith.addf %318, %320 : vector<1x8xf32>
    %cst_140 = arith.constant dense<0xFF800000> : vector<1xf32>
    %322 = vector.multi_reduction <maximumf>, %321, %cst_140 [1] : vector<1x8xf32> to vector<1xf32>
    %323 = vector.shape_cast %322 : vector<1xf32> to vector<1x1xf32>
    %324 = arith.negf %323 : vector<1x1xf32>
    %325 = math.exp %324 : vector<1x1xf32>
    %cst_141 = arith.constant 1.000000e+00 : f32
    %326 = vector.broadcast %cst_141 : f32 to vector<1x1xf32>
    %327 = arith.addf %326, %325 : vector<1x1xf32>
    %328 = arith.divf %326, %327 : vector<1x1xf32>
    %cst_142 = arith.constant 1.000000e+00 : f32
    %329 = vector.broadcast %cst_142 : f32 to vector<1x1xf32>
    %330 = arith.subf %329, %328 : vector<1x1xf32>
    %cst_143 = arith.constant 5.000000e+00 : f32
    %331 = vector.broadcast %cst_143 : f32 to vector<1x1xf32>
    %332 = arith.mulf %331, %330 : vector<1x1xf32>
    %cst_144 = arith.constant 9.99999993E-9 : f32
    %333 = vector.broadcast %cst_144 : f32 to vector<1x1xf32>
    %334 = arith.addf %332, %333 : vector<1x1xf32>
    %335 = vector.broadcast %334 : vector<1x1xf32> to vector<1x8xf32>
    %336 = arith.divf %321, %335 : vector<1x8xf32>
    %cst_145 = arith.constant dense<0xFF800000> : vector<1xf32>
    %337 = vector.multi_reduction <maximumf>, %336, %cst_145 [1] : vector<1x8xf32> to vector<1xf32>
    %338 = vector.shape_cast %337 : vector<1xf32> to vector<1x1xf32>
    %339 = vector.broadcast %338 : vector<1x1xf32> to vector<1x8xf32>
    %340 = arith.subf %336, %339 : vector<1x8xf32>
    %341 = math.exp %340 : vector<1x8xf32>
    %cst_146 = arith.constant dense<0.000000e+00> : vector<1xf32>
    %342 = vector.multi_reduction <add>, %341, %cst_146 [1] : vector<1x8xf32> to vector<1xf32>
    %343 = vector.shape_cast %342 : vector<1xf32> to vector<1x1xf32>
    %344 = vector.broadcast %343 : vector<1x1xf32> to vector<1x8xf32>
    %345 = arith.divf %341, %344 : vector<1x8xf32>
    %346 = arith.mulf %321, %345 : vector<1x8xf32>
    %cst_147 = arith.constant dense<0.000000e+00> : vector<1xf32>
    %347 = vector.multi_reduction <add>, %346, %cst_147 [1] : vector<1x8xf32> to vector<1xf32>
    %348 = vector.shape_cast %347 : vector<1xf32> to vector<1x1xf32>
    %c0_148 = arith.constant 0 : index
    %c0_149 = arith.constant 0 : index
    %c0_150 = arith.constant 0 : index
    %349 = vector.load %arg73[%c0_148, %c0_149, %c0_150] : memref<1x1x1xf32, #tpu.memory_space<vmem>>, vector<1x1x1xf32>
    %350 = vector.shape_cast %349 : vector<1x1x1xf32> to vector<1x1xf32>
    %351 = vector.shape_cast %348 : vector<1x1xf32> to vector<1x1x1xf32>
    tpu.vector_store %arg73[%c0_148, %c0_149, %c0_150], %351 {strides = array<i32>} : memref<1x1x1xf32, #tpu.memory_space<vmem>>, vector<1x1x1xf32>,
    return
  }
  func.func @transform_0(%arg0: i32) -> (i32, i32, i32) {
    %c0_i32 = arith.constant 0 : i32
    %c0_i32_0 = arith.constant 0 : i32
    %c0_i32_1 = arith.constant 0 : i32
    return %arg0, %c0_i32, %c0_i32_0 : i32, i32, i32
  }
  func.func @transform_1(%arg0: i32) -> (i32, i32) {
    %c0_i32 = arith.constant 0 : i32
    %c0_i32_0 = arith.constant 0 : i32
    %c0_i32_1 = arith.constant 0 : i32
    return %c0_i32, %c0_i32_0 : i32, i32
  }
  func.func @transform_2(%arg0: i32) -> (i32, i32) {
    %c0_i32 = arith.constant 0 : i32
    %c0_i32_0 = arith.constant 0 : i32
    %c0_i32_1 = arith.constant 0 : i32
    return %c0_i32, %c0_i32_0 : i32, i32
  }
  func.func @transform_3(%arg0: i32) -> (i32, i32) {
    %c0_i32 = arith.constant 0 : i32
    %c0_i32_0 = arith.constant 0 : i32
    %c0_i32_1 = arith.constant 0 : i32
    return %c0_i32, %c0_i32_0 : i32, i32
  }
  func.func @transform_4(%arg0: i32) -> (i32, i32) {
    %c0_i32 = arith.constant 0 : i32
    %c0_i32_0 = arith.constant 0 : i32
    %c0_i32_1 = arith.constant 0 : i32
    return %c0_i32, %c0_i32_0 : i32, i32
  }
  func.func @transform_5(%arg0: i32) -> (i32, i32) {
    %c0_i32 = arith.constant 0 : i32
    %c0_i32_0 = arith.constant 0 : i32
    %c0_i32_1 = arith.constant 0 : i32
    return %c0_i32, %c0_i32_0 : i32, i32
  }
  func.func @transform_6(%arg0: i32) -> (i32, i32) {
    %c0_i32 = arith.constant 0 : i32
    %c0_i32_0 = arith.constant 0 : i32
    %c0_i32_1 = arith.constant 0 : i32
    return %c0_i32, %c0_i32_0 : i32, i32
  }
  func.func @transform_7(%arg0: i32) -> (i32, i32) {
    %c0_i32 = arith.constant 0 : i32
    %c0_i32_0 = arith.constant 0 : i32
    %c0_i32_1 = arith.constant 0 : i32
    return %c0_i32, %c0_i32_0 : i32, i32
  }
  func.func @transform_8(%arg0: i32) -> (i32, i32) {
    %c0_i32 = arith.constant 0 : i32
    %c0_i32_0 = arith.constant 0 : i32
    %c0_i32_1 = arith.constant 0 : i32
    return %c0_i32, %c0_i32_0 : i32, i32
  }
  func.func @transform_9(%arg0: i32) -> (i32, i32) {
    %c0_i32 = arith.constant 0 : i32
    %c0_i32_0 = arith.constant 0 : i32
    %c0_i32_1 = arith.constant 0 : i32
    return %c0_i32, %c0_i32_0 : i32, i32
  }
  func.func @transform_10(%arg0: i32) -> (i32, i32) {
    %c0_i32 = arith.constant 0 : i32
    %c0_i32_0 = arith.constant 0 : i32
    %c0_i32_1 = arith.constant 0 : i32
    return %c0_i32, %c0_i32_0 : i32, i32
  }
  func.func @transform_11(%arg0: i32) -> (i32, i32) {
    %c0_i32 = arith.constant 0 : i32
    %c0_i32_0 = arith.constant 0 : i32
    %c0_i32_1 = arith.constant 0 : i32
    return %c0_i32, %c0_i32_0 : i32, i32
  }
  func.func @transform_12(%arg0: i32) -> (i32, i32) {
    %c0_i32 = arith.constant 0 : i32
    %c0_i32_0 = arith.constant 0 : i32
    %c0_i32_1 = arith.constant 0 : i32
    return %c0_i32, %c0_i32_0 : i32, i32
  }
  func.func @transform_13(%arg0: i32) -> (i32, i32) {
    %c0_i32 = arith.constant 0 : i32
    %c0_i32_0 = arith.constant 0 : i32
    %c0_i32_1 = arith.constant 0 : i32
    return %c0_i32, %c0_i32_0 : i32, i32
  }
  func.func @transform_14(%arg0: i32) -> (i32, i32) {
    %c0_i32 = arith.constant 0 : i32
    %c0_i32_0 = arith.constant 0 : i32
    %c0_i32_1 = arith.constant 0 : i32
    return %c0_i32, %c0_i32_0 : i32, i32
  }
  func.func @transform_15(%arg0: i32) -> (i32, i32) {
    %c0_i32 = arith.constant 0 : i32
    %c0_i32_0 = arith.constant 0 : i32
    %c0_i32_1 = arith.constant 0 : i32
    return %c0_i32, %c0_i32_0 : i32, i32
  }
  func.func @transform_16(%arg0: i32) -> (i32, i32) {
    %c0_i32 = arith.constant 0 : i32
    %c0_i32_0 = arith.constant 0 : i32
    %c0_i32_1 = arith.constant 0 : i32
    return %c0_i32, %c0_i32_0 : i32, i32
  }
  func.func @transform_17(%arg0: i32) -> (i32, i32) {
    %c0_i32 = arith.constant 0 : i32
    %c0_i32_0 = arith.constant 0 : i32
    %c0_i32_1 = arith.constant 0 : i32
    return %c0_i32, %c0_i32_0 : i32, i32
  }
  func.func @transform_18(%arg0: i32) -> (i32, i32) {
    %c0_i32 = arith.constant 0 : i32
    %c0_i32_0 = arith.constant 0 : i32
    %c0_i32_1 = arith.constant 0 : i32
    return %c0_i32, %c0_i32_0 : i32, i32
  }
  func.func @transform_19(%arg0: i32) -> (i32, i32) {
    %c0_i32 = arith.constant 0 : i32
    %c0_i32_0 = arith.constant 0 : i32
    %c0_i32_1 = arith.constant 0 : i32
    return %c0_i32, %c0_i32_0 : i32, i32
  }
  func.func @transform_20(%arg0: i32) -> (i32, i32) {
    %c0_i32 = arith.constant 0 : i32
    %c0_i32_0 = arith.constant 0 : i32
    %c0_i32_1 = arith.constant 0 : i32
    return %c0_i32, %c0_i32_0 : i32, i32
  }
  func.func @transform_21(%arg0: i32) -> (i32, i32) {
    %c0_i32 = arith.constant 0 : i32
    %c0_i32_0 = arith.constant 0 : i32
    %c0_i32_1 = arith.constant 0 : i32
    return %c0_i32, %c0_i32_0 : i32, i32
  }
  func.func @transform_22(%arg0: i32) -> (i32, i32) {
    %c0_i32 = arith.constant 0 : i32
    %c0_i32_0 = arith.constant 0 : i32
    %c0_i32_1 = arith.constant 0 : i32
    return %c0_i32, %c0_i32_0 : i32, i32
  }
  func.func @transform_23(%arg0: i32) -> (i32, i32) {
    %c0_i32 = arith.constant 0 : i32
    %c0_i32_0 = arith.constant 0 : i32
    %c0_i32_1 = arith.constant 0 : i32
    return %c0_i32, %c0_i32_0 : i32, i32
  }
  func.func @transform_24(%arg0: i32) -> (i32, i32) {
    %c0_i32 = arith.constant 0 : i32
    %c0_i32_0 = arith.constant 0 : i32
    %c0_i32_1 = arith.constant 0 : i32
    return %c0_i32, %c0_i32_0 : i32, i32
  }
  func.func @transform_25(%arg0: i32) -> (i32, i32) {
    %c0_i32 = arith.constant 0 : i32
    %c0_i32_0 = arith.constant 0 : i32
    %c0_i32_1 = arith.constant 0 : i32
    return %c0_i32, %c0_i32_0 : i32, i32
  }
  func.func @transform_26(%arg0: i32) -> (i32, i32) {
    %c0_i32 = arith.constant 0 : i32
    %c0_i32_0 = arith.constant 0 : i32
    %c0_i32_1 = arith.constant 0 : i32
    return %c0_i32, %c0_i32_0 : i32, i32
  }
  func.func @transform_27(%arg0: i32) -> (i32, i32) {
    %c0_i32 = arith.constant 0 : i32
    %c0_i32_0 = arith.constant 0 : i32
    %c0_i32_1 = arith.constant 0 : i32
    return %c0_i32, %c0_i32_0 : i32, i32
  }
  func.func @transform_28(%arg0: i32) -> (i32, i32) {
    %c0_i32 = arith.constant 0 : i32
    %c0_i32_0 = arith.constant 0 : i32
    %c0_i32_1 = arith.constant 0 : i32
    return %c0_i32, %c0_i32_0 : i32, i32
  }
  func.func @transform_29(%arg0: i32) -> (i32, i32) {
    %c0_i32 = arith.constant 0 : i32
    %c0_i32_0 = arith.constant 0 : i32
    %c0_i32_1 = arith.constant 0 : i32
    return %c0_i32, %c0_i32_0 : i32, i32
  }
  func.func @transform_30(%arg0: i32) -> (i32, i32) {
    %c0_i32 = arith.constant 0 : i32
    %c0_i32_0 = arith.constant 0 : i32
    %c0_i32_1 = arith.constant 0 : i32
    return %c0_i32, %c0_i32_0 : i32, i32
  }
  func.func @transform_31(%arg0: i32) -> (i32, i32) {
    %c0_i32 = arith.constant 0 : i32
    %c0_i32_0 = arith.constant 0 : i32
    %c0_i32_1 = arith.constant 0 : i32
    return %c0_i32, %c0_i32_0 : i32, i32
  }
  func.func @transform_32(%arg0: i32) -> (i32, i32) {
    %c0_i32 = arith.constant 0 : i32
    %c0_i32_0 = arith.constant 0 : i32
    %c0_i32_1 = arith.constant 0 : i32
    return %c0_i32, %c0_i32_0 : i32, i32
  }
  func.func @transform_33(%arg0: i32) -> (i32, i32) {
    %c0_i32 = arith.constant 0 : i32
    %c0_i32_0 = arith.constant 0 : i32
    %c0_i32_1 = arith.constant 0 : i32
    return %c0_i32, %c0_i32_0 : i32, i32
  }
  func.func @transform_34(%arg0: i32) -> (i32, i32) {
    %c0_i32 = arith.constant 0 : i32
    %c0_i32_0 = arith.constant 0 : i32
    %c0_i32_1 = arith.constant 0 : i32
    return %c0_i32, %c0_i32_0 : i32, i32
  }
  func.func @transform_35(%arg0: i32) -> (i32, i32) {
    %c0_i32 = arith.constant 0 : i32
    %c0_i32_0 = arith.constant 0 : i32
    %c0_i32_1 = arith.constant 0 : i32
    return %c0_i32, %c0_i32_0 : i32, i32
  }
  func.func @transform_36(%arg0: i32) -> (i32, i32) {
    %c0_i32 = arith.constant 0 : i32
    %c0_i32_0 = arith.constant 0 : i32
    %c0_i32_1 = arith.constant 0 : i32
    return %c0_i32, %c0_i32_0 : i32, i32
  }
  func.func @transform_37(%arg0: i32) -> (i32, i32) {
    %c0_i32 = arith.constant 0 : i32
    %c0_i32_0 = arith.constant 0 : i32
    %c0_i32_1 = arith.constant 0 : i32
    return %c0_i32, %c0_i32_0 : i32, i32
  }
  func.func @transform_38(%arg0: i32) -> (i32, i32) {
    %c0_i32 = arith.constant 0 : i32
    %c0_i32_0 = arith.constant 0 : i32
    %c0_i32_1 = arith.constant 0 : i32
    return %c0_i32, %c0_i32_0 : i32, i32
  }
  func.func @transform_39(%arg0: i32) -> (i32, i32) {
    %c0_i32 = arith.constant 0 : i32
    %c0_i32_0 = arith.constant 0 : i32
    %c0_i32_1 = arith.constant 0 : i32
    return %c0_i32, %c0_i32_0 : i32, i32
  }
  func.func @transform_40(%arg0: i32) -> (i32, i32) {
    %c0_i32 = arith.constant 0 : i32
    %c0_i32_0 = arith.constant 0 : i32
    %c0_i32_1 = arith.constant 0 : i32
    return %c0_i32, %c0_i32_0 : i32, i32
  }
  func.func @transform_41(%arg0: i32) -> (i32, i32) {
    %c0_i32 = arith.constant 0 : i32
    %c0_i32_0 = arith.constant 0 : i32
    %c0_i32_1 = arith.constant 0 : i32
    return %c0_i32, %c0_i32_0 : i32, i32
  }
  func.func @transform_42(%arg0: i32) -> (i32, i32) {
    %c0_i32 = arith.constant 0 : i32
    %c0_i32_0 = arith.constant 0 : i32
    %c0_i32_1 = arith.constant 0 : i32
    return %c0_i32, %c0_i32_0 : i32, i32
  }
  func.func @transform_43(%arg0: i32) -> (i32, i32) {
    %c0_i32 = arith.constant 0 : i32
    %c0_i32_0 = arith.constant 0 : i32
    %c0_i32_1 = arith.constant 0 : i32
    return %c0_i32, %c0_i32_0 : i32, i32
  }
  func.func @transform_44(%arg0: i32) -> (i32, i32) {
    %c0_i32 = arith.constant 0 : i32
    %c0_i32_0 = arith.constant 0 : i32
    %c0_i32_1 = arith.constant 0 : i32
    return %c0_i32, %c0_i32_0 : i32, i32
  }
  func.func @transform_45(%arg0: i32) -> (i32, i32) {
    %c0_i32 = arith.constant 0 : i32
    %c0_i32_0 = arith.constant 0 : i32
    %c0_i32_1 = arith.constant 0 : i32
    return %c0_i32, %c0_i32_0 : i32, i32
  }
  func.func @transform_46(%arg0: i32) -> (i32, i32) {
    %c0_i32 = arith.constant 0 : i32
    %c0_i32_0 = arith.constant 0 : i32
    %c0_i32_1 = arith.constant 0 : i32
    return %c0_i32, %c0_i32_0 : i32, i32
  }
  func.func @transform_47(%arg0: i32) -> (i32, i32) {
    %c0_i32 = arith.constant 0 : i32
    %c0_i32_0 = arith.constant 0 : i32
    %c0_i32_1 = arith.constant 0 : i32
    return %c0_i32, %c0_i32_0 : i32, i32
  }
  func.func @transform_48(%arg0: i32) -> (i32, i32) {
    %c0_i32 = arith.constant 0 : i32
    %c0_i32_0 = arith.constant 0 : i32
    %c0_i32_1 = arith.constant 0 : i32
    return %c0_i32, %c0_i32_0 : i32, i32
  }
  func.func @transform_49(%arg0: i32) -> (i32, i32) {
    %c0_i32 = arith.constant 0 : i32
    %c0_i32_0 = arith.constant 0 : i32
    %c0_i32_1 = arith.constant 0 : i32
    return %c0_i32, %c0_i32_0 : i32, i32
  }
  func.func @transform_50(%arg0: i32) -> (i32, i32) {
    %c0_i32 = arith.constant 0 : i32
    %c0_i32_0 = arith.constant 0 : i32
    %c0_i32_1 = arith.constant 0 : i32
    return %c0_i32, %c0_i32_0 : i32, i32
  }
  func.func @transform_51(%arg0: i32) -> (i32, i32) {
    %c0_i32 = arith.constant 0 : i32
    %c0_i32_0 = arith.constant 0 : i32
    %c0_i32_1 = arith.constant 0 : i32
    return %c0_i32, %c0_i32_0 : i32, i32
  }
  func.func @transform_52(%arg0: i32) -> (i32, i32) {
    %c0_i32 = arith.constant 0 : i32
    %c0_i32_0 = arith.constant 0 : i32
    %c0_i32_1 = arith.constant 0 : i32
    return %c0_i32, %c0_i32_0 : i32, i32
  }
  func.func @transform_53(%arg0: i32) -> (i32, i32) {
    %c0_i32 = arith.constant 0 : i32
    %c0_i32_0 = arith.constant 0 : i32
    %c0_i32_1 = arith.constant 0 : i32
    return %c0_i32, %c0_i32_0 : i32, i32
  }
  func.func @transform_54(%arg0: i32) -> (i32, i32) {
    %c0_i32 = arith.constant 0 : i32
    %c0_i32_0 = arith.constant 0 : i32
    %c0_i32_1 = arith.constant 0 : i32
    return %c0_i32, %c0_i32_0 : i32, i32
  }
  func.func @transform_55(%arg0: i32) -> (i32, i32) {
    %c0_i32 = arith.constant 0 : i32
    %c0_i32_0 = arith.constant 0 : i32
    %c0_i32_1 = arith.constant 0 : i32
    return %c0_i32, %c0_i32_0 : i32, i32
  }
  func.func @transform_56(%arg0: i32) -> (i32, i32) {
    %c0_i32 = arith.constant 0 : i32
    %c0_i32_0 = arith.constant 0 : i32
    %c0_i32_1 = arith.constant 0 : i32
    return %c0_i32, %c0_i32_0 : i32, i32
  }
  func.func @transform_57(%arg0: i32) -> (i32, i32) {
    %c0_i32 = arith.constant 0 : i32
    %c0_i32_0 = arith.constant 0 : i32
    %c0_i32_1 = arith.constant 0 : i32
    return %c0_i32, %c0_i32_0 : i32, i32
  }
  func.func @transform_58(%arg0: i32) -> (i32, i32) {
    %c0_i32 = arith.constant 0 : i32
    %c0_i32_0 = arith.constant 0 : i32
    %c0_i32_1 = arith.constant 0 : i32
    return %c0_i32, %c0_i32_0 : i32, i32
  }
  func.func @transform_59(%arg0: i32) -> (i32, i32) {
    %c0_i32 = arith.constant 0 : i32
    %c0_i32_0 = arith.constant 0 : i32
    %c0_i32_1 = arith.constant 0 : i32
    return %c0_i32, %c0_i32_0 : i32, i32
  }
  func.func @transform_60(%arg0: i32) -> (i32, i32) {
    %c0_i32 = arith.constant 0 : i32
    %c0_i32_0 = arith.constant 0 : i32
    %c0_i32_1 = arith.constant 0 : i32
    return %c0_i32, %c0_i32_0 : i32, i32
  }
  func.func @transform_61(%arg0: i32) -> (i32, i32) {
    %c0_i32 = arith.constant 0 : i32
    %c0_i32_0 = arith.constant 0 : i32
    %c0_i32_1 = arith.constant 0 : i32
    return %c0_i32, %c0_i32_0 : i32, i32
  }
  func.func @transform_62(%arg0: i32) -> (i32, i32) {
    %c0_i32 = arith.constant 0 : i32
    %c0_i32_0 = arith.constant 0 : i32
    %c0_i32_1 = arith.constant 0 : i32
    return %c0_i32, %c0_i32_0 : i32, i32
  }
  func.func @transform_63(%arg0: i32) -> (i32, i32) {
    %c0_i32 = arith.constant 0 : i32
    %c0_i32_0 = arith.constant 0 : i32
    %c0_i32_1 = arith.constant 0 : i32
    return %c0_i32, %c0_i32_0 : i32, i32
  }
  func.func @transform_64(%arg0: i32) -> (i32, i32) {
    %c0_i32 = arith.constant 0 : i32
    %c0_i32_0 = arith.constant 0 : i32
    %c0_i32_1 = arith.constant 0 : i32
    return %c0_i32, %c0_i32_0 : i32, i32
  }
  func.func @transform_65(%arg0: i32) -> (i32, i32) {
    %c0_i32 = arith.constant 0 : i32
    %c0_i32_0 = arith.constant 0 : i32
    %c0_i32_1 = arith.constant 0 : i32
    return %c0_i32, %c0_i32_0 : i32, i32
  }
  func.func @transform_66(%arg0: i32) -> (i32, i32) {
    %c0_i32 = arith.constant 0 : i32
    %c0_i32_0 = arith.constant 0 : i32
    %c0_i32_1 = arith.constant 0 : i32
    return %c0_i32, %c0_i32_0 : i32, i32
  }
  func.func @transform_67(%arg0: i32) -> (i32, i32) {
    %c0_i32 = arith.constant 0 : i32
    %c0_i32_0 = arith.constant 0 : i32
    %c0_i32_1 = arith.constant 0 : i32
    return %c0_i32, %c0_i32_0 : i32, i32
  }
  func.func @transform_68(%arg0: i32) -> (i32, i32) {
    %c0_i32 = arith.constant 0 : i32
    %c0_i32_0 = arith.constant 0 : i32
    %c0_i32_1 = arith.constant 0 : i32
    return %c0_i32, %c0_i32_0 : i32, i32
  }
  func.func @transform_69(%arg0: i32) -> (i32, i32) {
    %c0_i32 = arith.constant 0 : i32
    %c0_i32_0 = arith.constant 0 : i32
    %c0_i32_1 = arith.constant 0 : i32
    return %c0_i32, %c0_i32_0 : i32, i32
  }
  func.func @transform_70(%arg0: i32) -> (i32, i32) {
    %c0_i32 = arith.constant 0 : i32
    %c0_i32_0 = arith.constant 0 : i32
    %c0_i32_1 = arith.constant 0 : i32
    return %c0_i32, %c0_i32_0 : i32, i32
  }
  func.func @transform_71(%arg0: i32) -> (i32, i32) {
    %c0_i32 = arith.constant 0 : i32
    %c0_i32_0 = arith.constant 0 : i32
    %c0_i32_1 = arith.constant 0 : i32
    return %c0_i32, %c0_i32_0 : i32, i32
  }
  func.func @transform_72(%arg0: i32) -> (i32, i32, i32) {
    %c0_i32 = arith.constant 0 : i32
    %c0_i32_0 = arith.constant 0 : i32
    %c0_i32_1 = arith.constant 0 : i32
    return %arg0, %c0_i32, %c0_i32_0 : i32, i32, i32
  }
}

</mosaic_0001>

<bundles_post_ra>
// kernel: model_forward.1
= control target key start
LH: loop header
LB: loop body
LE: loop exit
PB: predicated region body
PF: predicated region fallthrough
CT: control target
= control target key end

     0   :  { %s5175_s6 = smov 1   ;;  %s5176_s10 = smov 2   ;;  %s5936_s0 = inlined_call_operand.smem [shape: u32[73], index: -1, kind: input, shape index: {}] }
   0x1   :  { %s5246_s5 = sld [smem:[%s5936_s0]]   ;;  %s5177_s14 = smov 3  }
   0x2   :  { %s5251_s9 = sld [smem:[%s5936_s0 + %s5175_s6]]   ;;  %s5178_s18 = smov 4  }
   0x3   :  { %s5256_s13 = sld [smem:[%s5936_s0 + %s5176_s10]]   ;;  %s5179_s22 = smov 5  }
   0x4   :  { %s5261_s17 = sld [smem:[%s5936_s0 + %s5177_s14]]   ;;  %s5180_s26 = smov 6  }
   0x5   :  { %s5266_s21 = sld [smem:[%s5936_s0 + %s5178_s18]]   ;;  %s5181_s30 = smov 7  }
   0x6   :  { %s5271_s25 = sld [smem:[%s5936_s0 + %s5179_s22]]   ;;  %s5182_s4 = smov 8  }
   0x7   :  { %s4102_s29 = sld [smem:[%s5936_s0 + %s5180_s26]]   ;;  %s5183_s10 = smov 9  }
   0x8   :  { %5957 = sst [smem:[#allocation37_spill]] %s5251_s9  ;;  %s5184_s15 = smov 41  }
   0x9   :  { %5958 = sst [smem:[#allocation38_spill]] %s5256_s13  ;;  %s5185_s20 = smov 42  }
   0xa   :  { %5959 = sst [smem:[#allocation39_spill]] %s5261_s17  ;;  %s5186_s26 = smov 43  }
   0xb   :  { %5960 = sst [smem:[#allocation40_spill]] %s5266_s21  ;;  %s5187_s1 = smov 44  }
   0xc   :  { %5961 = sst [smem:[#allocation41_spill]] %s5271_s25  ;;  %s5188_s7 = smov 45  }
   0xd   :  { %s5279_s3 = sld [smem:[%s5936_s0 + %s5181_s30]]   ;;  %v150_v0 = vstv %s4102_s29  ;;  %s5190_s29 = smov 47  }
   0xe   :  { %s5284_s8 = sld [smem:[%s5936_s0 + %s5182_s4]]   ;;  %151 = vst [vmem:[#allocation2] sm:$0x1] %v150_v0  ;;  %s5191_s27 = smov 48  }
   0xf   :  { %s5289_s14 = sld [smem:[%s5936_s0 + %s5183_s10]]   ;;  %s5192_s4 = smov 49  }
  0x10   :  { %s5294_s19 = sld [smem:[%s5936_s0 + %s5184_s15]]   ;;  %s5189_s15 = smov 46  }
  0x11   :  { %s5299_s24 = sld [smem:[%s5936_s0 + %s5185_s20]]  }
  0x12   :  { %s5304_s30 = sld [smem:[%s5936_s0 + %s5186_s26]]  }
  0x13   :  { %5962 = sst [smem:[#allocation42_spill]] %s5279_s3 }
  0x14   :  { %5963 = sst [smem:[#allocation43_spill]] %s5284_s8 }
  0x15   :  { %5964 = sst [smem:[#allocation44_spill]] %s5289_s14 }
  0x16   :  { %5965 = sst [smem:[#allocation45_spill]] %s5294_s19 }
  0x17   :  { %5966 = sst [smem:[#allocation46_spill]] %s5299_s24 }
  0x18   :  { %5967 = sst [smem:[#allocation47_spill]] %s5304_s30 }
  0x19   :  { %s5309_s6 = sld [smem:[%s5936_s0 + %s5187_s1]]  }
  0x1a   :  { %s5314_s12 = sld [smem:[%s5936_s0 + %s5188_s7]]  }
  0x1b   :  { %s5319_s20 = sld [smem:[%s5936_s0 + %s5189_s15]]   ;;  %s5193_s15 = smov 50  }
  0x1c   :  { %s5324_s26 = sld [smem:[%s5936_s0 + %s5190_s29]]   ;;  %s5194_s29 = smov 51  }
  0x1d   :  { %s5329_s2 = sld [smem:[%s5936_s0 + %s5191_s27]]   ;;  %s5195_s27 = smov 52  }
  0x1e   :  { %s5334_s11 = sld [smem:[%s5936_s0 + %s5192_s4]]   ;;  %s5196_s4 = smov 53  }
  0x1f   :  { %s5339_s25 = sld [smem:[%s5936_s0 + %s5193_s15]]   ;;  %s5197_s15 = smov 54  }
  0x20   :  { %5968 = sst [smem:[#allocation48_spill]] %s5314_s12 }
  0x21   :  { %s5344_s8 = sld [smem:[%s5936_s0 + %s5194_s29]]   ;;  %s5198_s29 = smov 55  }
  0x22   :  { %s5349_s14 = sld [smem:[%s5936_s0 + %s5195_s27]]   ;;  %s5199_s27 = smov 56  }
  0x23   :  { %5969 = sst [smem:[#allocation49_spill]] %s5329_s2 }
  0x24   :  { %5970 = sst [smem:[#allocation50_spill]] %s5334_s11 }
  0x25   :  { %5971 = sst [smem:[#allocation51_spill]] %s5339_s25 }
  0x26   :  { %s5354_s3 = sld [smem:[%s5936_s0 + %s5196_s4]]   ;;  %s5200_s4 = smov 57  }
  0x27   :  { %5972 = sst [smem:[#allocation52_spill]] %s5344_s8 }
  0x28   :  { %5973 = sst [smem:[#allocation53_spill]] %s5349_s14 }
  0x29   :  { %s5359_s25 = sld [smem:[%s5936_s0 + %s5197_s15]]   ;;  %s5201_s15 = smov 58  }
  0x2a   :  { %s5364_s8 = sld [smem:[%s5936_s0 + %s5198_s29]]   ;;  %s5202_s29 = smov 59  }
  0x2b   :  { %s5369_s14 = sld [smem:[%s5936_s0 + %s5199_s27]]   ;;  %s5203_s27 = smov 60  }
  0x2c   :  { %5974 = sst [smem:[#allocation54_spill]] %s5354_s3 }
  0x2d   :  { %s5374_s3 = sld [smem:[%s5936_s0 + %s5200_s4]]   ;;  %s5204_s4 = smov 61  }
  0x2e   :  { %s5384_s11 = sld [smem:[%s5936_s0 + %s5202_s29]]   ;;  %s5206_s29 = smov 63  }
  0x2f   :  { %5975 = sst [smem:[#allocation55_spill]] %s5359_s25 }
  0x30   :  { %s5379_s25 = sld [smem:[%s5936_s0 + %s5201_s15]]   ;;  %s5205_s15 = smov 62  }
  0x31   :  { %s5389_s12 = sld [smem:[%s5936_s0 + %s5203_s27]]   ;;  %s5207_s27 = smov 64  }
  0x32   :  { %s5394_s24 = sld [smem:[%s5936_s0 + %s5204_s4]]   ;;  %s5208_s4 = smov 65  }
  0x33   :  { %s5404_s19 = sld [smem:[%s5936_s0 + %s5206_s29]]   ;;  %s5210_s29 = smov 67  }
  0x34   :  { %s5414_s30 = sld [smem:[%s5936_s0 + %s5208_s4]]   ;;  %s5212_s4 = smov 69  }
  0x35   :  { %s5424_s21 = sld [smem:[%s5936_s0 + %s5210_s29]]   ;;  %s5214_s29 = smov 71  }
  0x36   :  { %5976 = sst [smem:[#allocation56_spill]] %s5379_s25 }
  0x37   :  { %5977 = sst [smem:[#allocation57_spill]] %s5389_s12 }
  0x38   :  { %s5399_s25 = sld [smem:[%s5936_s0 + %s5205_s15]]   ;;  %s5209_s15 = smov 66  }
  0x39   :  { %s5409_s12 = sld [smem:[%s5936_s0 + %s5207_s27]]   ;;  %s5211_s27 = smov 68  }
  0x3a   :  { %s5429_s17 = sld [smem:[%s5936_s0 + %s5211_s27]]   ;;  %s5215_s27 = smov 72  }
  0x3b   :  { %s5434_s13 = sld [smem:[%s5936_s0 + %s5212_s4]]  }
  0x3c   :  { %s5444_s9 = sld [smem:[%s5936_s0 + %s5214_s29]]  }
  0x3e   :  { %5978 = sst [smem:[#allocation58_spill]] %s5399_s25 }
  0x3f   :  { %s5419_s25 = sld [smem:[%s5936_s0 + %s5209_s15]]   ;;  %s5213_s15 = smov 70  }
  0x40   :  { %5980 = sst [smem:[#allocation60_spill]] %s5429_s17 }
  0x41   :  { %s5449_s17 = sld [smem:[%s5936_s0 + %s5215_s27]]  }
  0x45   :  { %5979 = sst [smem:[#allocation59_spill]] %s5419_s25 }
  0x46   :  { %s5439_s25 = sld [smem:[%s5936_s0 + %s5213_s15]]  }
  0x47   :  { %152 = vsyncpa [#allocation4], 0 }
  0x48   :  { %153 = vsyncpa [#allocation6], 0 }
  0x49   :  { %154 = vsyncpa [#allocation9], 0 }
  0x4a   :  { %155 = vsyncpa [#allocation12], 0 }
  0x4b   :  { %156 = vsyncpa [#allocation15], 0 }
  0x4c   :  { %157 = vsyncpa [#allocation18], 0 }
  0x4d   :  { %158 = vsyncpa [#allocation21], 0 }
  0x4e   :  { %159 = vsyncpa [#allocation24], 0 }
  0x4f   :  { %160 = vsyncpa [#allocation27], 0  ;;  %s5451_s4 = smov 0  }
  0x50 LB: > { %s5216_s0 = smov [#allocation5]   ;;  %s5457_s10 = sadd.s32 4294967295, %s5173_s4   ;;  %s5173_s4 = sphi %s5451_s4, %s166_s4  }
  0x51   : > { %s1870_s7 = sshll.u32 %s5216_s0, 4  ;;  %p4140_p0 = scmp.ge.s32.totalorder %s5173_s4, 1  ;;  %s1871_s7 = int_to_ptr.vmem [resolvable:$true] %s1870_s7 }
  0x52   : > { %p1714_p1 = scmp.lt.s32.totalorder %s5173_s4, 3  ;;  %p5951_p2 = scmp.eq.s32.totalorder %s5457_s10, 0 }
  0x53   : > { %s5217_s16 = smov [#allocation8]   ;;  %s5218_s29 = smov [#allocation11]  }
  0x54   : > { %p5462_p3 = pnand %p4140_p0, %p1714_p1  ;;  %s1892_s18 = sshll.u32 %s5217_s16, 4  ;;  %s5468_s18 = int_to_ptr.vmem [resolvable:$true] %s1892_s18 }
  0x55   : > { %s1932_s22 = sshll.u32 %s5218_s29, 4  ;;  %s5219_s27 = smov [#allocation14]   ;;  %s5476_s22 = int_to_ptr.vmem [resolvable:$true] %s1932_s22 }
  0x56   : > { %s5981_s15 = scalar_select %p5462_p3, 1, 0 }
  0x57   : > { %p4520_p4 = pneg %p5462_p3  ;;  %s1957_s28 = sshll.u32 %s5219_s27, 4  ;;  %s5478_s28 = int_to_ptr.vmem [resolvable:$true] %s1957_s28 }
  0x58   : > { %s4726_s0 = scalar_lea.vmem %s1871_s7, 16  ;;  %s4733_s16 = scalar_lea.vmem %s1871_s7, 32 }
  0x59   : > { %p5472_p5 = pnand %p5951_p2, %p4520_p4  ;;  %p4727_p7 = scmp.ne.s32.totalorder %s1871_s7, %s4726_s0 }
  0x5a   : > { %p4734_p10 = scmp.lt.s32.totalorder %s1871_s7, %s1871_s7  ;;  %p4735_p11 = scmp.lt.s32.totalorder %s4733_s16, %s4726_s0 }
  0x5b   : > { %p5482_p6 = pneg %p5472_p5 }
  0x5c   : > { %p4736_p12 = por %p4735_p11, %p4734_p10 }
  0x5d   : > { %p4729_p8 = pnand %p4727_p7, %p5482_p6 }
  0x5f   : > { %p4730_p9 = pneg %p4729_p8 }
  0x61   : > { %p4737_p13 = pnand %p4736_p12, %p4730_p9 }
  0x63   : > { %4740 = shalt.err (!%p4737_p13)
}
  0x64   : > { %4526 = dma.hbm_to_vmem [thread:$0]  (!%p5472_p5), %s5319_s20, 16, %s1871_s7, [#allocation6]  }
  0x65   : > { %s4752_s29 = scalar_lea.vmem %s5468_s18, 16  ;;  %s4759_s27 = scalar_lea.vmem %s5468_s18, 32 }
  0x66   : > { %p4753_p0 = scmp.ne.s32.totalorder %s5468_s18, %s4752_s29  ;;  %p4760_p7 = scmp.lt.s32.totalorder %s5468_s18, %s5468_s18 }
  0x67   : > { %p4761_p8 = scmp.lt.s32.totalorder %s4759_s27, %s4752_s29 }
  0x68   : > { %p4755_p1 = pnand %p4753_p0, %p5482_p6 }
  0x69   : > { %p4762_p9 = por %p4761_p8, %p4760_p7 }
  0x6a   : > { %p4756_p4 = pneg %p4755_p1 }
  0x6c   : > { %p4763_p10 = pnand %p4762_p9, %p4756_p4 }
  0x6e   : > { %4766 = shalt.err (!%p4763_p10)
}
  0x6f   : > { %s5984_s2 = sld [smem:[#allocation49_spill]]  ;;  %s4778_s7 = scalar_lea.vmem %s5476_s22, 16 }
  0x70   : > { %p4779_p11 = scmp.ne.s32.totalorder %s5476_s22, %s4778_s7  ;;  %s4785_s0 = scalar_lea.vmem %s5476_s22, 32 }
  0x71   : > { %p4786_p0 = scmp.lt.s32.totalorder %s5476_s22, %s5476_s22  ;;  %p4787_p1 = scmp.lt.s32.totalorder %s4785_s0, %s4778_s7 }
  0x72   : > { %p4781_p12 = pnand %p4779_p11, %p5482_p6 }
  0x73   : > { %p4788_p4 = por %p4787_p1, %p4786_p0 }
  0x74   : > { %p4782_p13 = pneg %p4781_p12 }
  0x75   : > { %4532 = dma.hbm_to_vmem [thread:$0]  (!%p5472_p5), %s5984_s2, 16, %s5468_s18, [#allocation9]  }
  0x76   : > { %p4789_p7 = pnand %p4788_p4, %p4782_p13 }
  0x78   : > { %4792 = shalt.err (!%p4789_p7)
}
  0x79   : > { %4538 = dma.hbm_to_vmem [thread:$0]  (!%p5472_p5), %s5369_s14, 16, %s5476_s22, [#allocation12]  }
  0x7a   : > { %s4804_s18 = scalar_lea.vmem %s5478_s28, 16  ;;  %s4811_s16 = scalar_lea.vmem %s5478_s28, 32 }
  0x7b   : > { %p4805_p8 = scmp.ne.s32.totalorder %s5478_s28, %s4804_s18  ;;  %p4812_p11 = scmp.lt.s32.totalorder %s5478_s28, %s5478_s28 }
  0x7c   : > { %p4813_p12 = scmp.lt.s32.totalorder %s4811_s16, %s4804_s18 }
  0x7d   : > { %p4807_p9 = pnand %p4805_p8, %p5482_p6 }
  0x7e   : > { %p4814_p13 = por %p4813_p12, %p4812_p11 }
  0x7f   : > { %p4808_p10 = pneg %p4807_p9 }
  0x81   : > { %p4815_p0 = pnand %p4814_p13, %p4808_p10 }
  0x83   : > { %4818 = shalt.err (!%p4815_p0)
}
  0x84   : > { %4544 = dma.hbm_to_vmem [thread:$0]  (!%p5472_p5), %s5384_s11, 16, %s5478_s28, [#allocation15]  }
  0x85   : > { %s5220_s29 = smov [#allocation17]   ;;  %s5221_s27 = smov [#allocation20]  }
  0x86   : > { %s1985_s22 = sshll.u32 %s5220_s29, 4  ;;  %s2007_s7 = sshll.u32 %s5221_s27, 4  ;;  %s1986_s22 = int_to_ptr.vmem [resolvable:$true] %s1985_s22  ;;  %s2008_s7 = int_to_ptr.vmem [resolvable:$true] %s2007_s7 }
  0x87   : > { %s4830_s0 = scalar_lea.vmem %s1986_s22, 16  ;;  %s4837_s18 = scalar_lea.vmem %s1986_s22, 32 }
  0x88   : > { %p4831_p1 = scmp.ne.s32.totalorder %s1986_s22, %s4830_s0  ;;  %p4838_p8 = scmp.lt.s32.totalorder %s1986_s22, %s1986_s22 }
  0x89   : > { %p4839_p9 = scmp.lt.s32.totalorder %s4837_s18, %s4830_s0 }
  0x8a   : > { %p4833_p4 = pnand %p4831_p1, %p5482_p6 }
  0x8b   : > { %p4840_p10 = por %p4839_p9, %p4838_p8 }
  0x8c   : > { %p4834_p7 = pneg %p4833_p4 }
  0x8e   : > { %p4841_p11 = pnand %p4840_p10, %p4834_p7 }
  0x90   : > { %4844 = shalt.err (!%p4841_p11)
}
  0x91   : > { %4550 = dma.hbm_to_vmem [thread:$0]  (!%p5472_p5), %s5404_s19, 16, %s1986_s22, [#allocation18]  }
  0x92   : > { %s4856_s28 = scalar_lea.vmem %s2008_s7, 16  ;;  %s4863_s16 = scalar_lea.vmem %s2008_s7, 32 }
  0x93   : > { %p4857_p12 = scmp.ne.s32.totalorder %s2008_s7, %s4856_s28  ;;  %p4864_p1 = scmp.lt.s32.totalorder %s2008_s7, %s2008_s7 }
  0x94   : > { %p4865_p4 = scmp.lt.s32.totalorder %s4863_s16, %s4856_s28 }
  0x95   : > { %p4859_p13 = pnand %p4857_p12, %p5482_p6 }
  0x96   : > { %p4866_p2 = por %p4865_p4, %p4864_p1 }
  0x97   : > { %p4860_p0 = pneg %p4859_p13 }
  0x99   : > { %p4867_p3 = pnand %p4866_p2, %p4860_p0 }
  0x9b   : > { %4870 = shalt.err (!%p4867_p3)
}
  0x9c   : > { %4556 = dma.hbm_to_vmem [thread:$0]  (!%p5472_p5), %s5414_s30, 16, %s2008_s7, [#allocation21]  }
  0x9d   : > { %s5222_s29 = smov [#allocation23]   ;;  %s5223_s22 = smov [#allocation3]  }
  0x9e   : > { %s2035_s27 = sshll.u32 %s5222_s29, 4  ;;  %s1856_s0 = sshll.u32 %s5223_s22, 4  ;;  %s2036_s27 = int_to_ptr.vmem [resolvable:$true] %s2035_s27  ;;  %s1857_s0 = int_to_ptr.vmem [resolvable:$true] %s1856_s0 }
  0x9f   : > { %s4882_s18 = scalar_lea.vmem %s2036_s27, 16  ;;  %s4889_s2 = scalar_lea.vmem %s2036_s27, 32 }
  0xa0   : > { %p4883_p7 = scmp.ne.s32.totalorder %s2036_s27, %s4882_s18  ;;  %p4890_p10 = scmp.lt.s32.totalorder %s2036_s27, %s2036_s27 }
  0xa1   : > { %p4891_p11 = scmp.lt.s32.totalorder %s4889_s2, %s4882_s18 }
  0xa2   : > { %p4885_p8 = pnand %p4883_p7, %p5482_p6 }
  0xa3   : > { %p4892_p2 = por %p4891_p11, %p4890_p10 }
  0xa4   : > { %p4886_p9 = pneg %p4885_p8 }
  0xa6   : > { %p4893_p3 = pnand %p4892_p2, %p4886_p9 }
  0xa8   : > { %4896 = shalt.err (!%p4893_p3)
}
  0xa9   : > { %4562 = dma.hbm_to_vmem [thread:$0]  (!%p5472_p5), %s5434_s13, 16, %s2036_s27, [#allocation24]  }
  0xaa   : > { %s4908_s7 = scalar_lea.vmem %s1857_s0, 16  ;;  %s4915_s28 = scalar_lea.vmem %s1857_s0, 32 }
  0xab   : > { %p4909_p12 = scmp.ne.s32.totalorder %s1857_s0, %s4908_s7  ;;  %p4916_p1 = scmp.lt.s32.totalorder %s1857_s0, %s1857_s0 }
  0xac   : > { %p4917_p4 = scmp.lt.s32.totalorder %s4915_s28, %s4908_s7 }
  0xad   : > { %p4911_p13 = pnand %p4909_p12, %p5482_p6 }
  0xae   : > { %p4918_p7 = por %p4917_p4, %p4916_p1 }
  0xaf   : > { %p4912_p0 = pneg %p4911_p13 }
  0xb1   : > { %p4919_p8 = pnand %p4918_p7, %p4912_p0 }
  0xb3   : > { %4922 = shalt.err (!%p4919_p8)
}
  0xb4   : > { %4523 = dma.hbm_to_vmem [thread:$0]  (!%p5472_p5), %s5309_s6, 16, %s1857_s0, [#allocation4]  }
  0xb5   : > { %s5224_s2 = smov [#allocation7]   ;;  %s5225_s29 = smov [#allocation10]  }
  0xb6   : > { %s1881_s16 = sshll.u32 %s5224_s2, 4  ;;  %s1921_s27 = sshll.u32 %s5225_s29, 4  ;;  %s1882_s16 = int_to_ptr.vmem [resolvable:$true] %s1881_s16  ;;  %s1922_s27 = int_to_ptr.vmem [resolvable:$true] %s1921_s27 }
  0xb7   : > { %s4934_s22 = scalar_lea.vmem %s1882_s16, 16  ;;  %s4941_s18 = scalar_lea.vmem %s1882_s16, 32 }
  0xb8   : > { %p4935_p9 = scmp.ne.s32.totalorder %s1882_s16, %s4934_s22  ;;  %p4942_p2 = scmp.lt.s32.totalorder %s1882_s16, %s1882_s16 }
  0xb9   : > { %p4943_p3 = scmp.lt.s32.totalorder %s4941_s18, %s4934_s22 }
  0xba   : > { %p4937_p10 = pnand %p4935_p9, %p5482_p6 }
  0xbb   : > { %p4944_p12 = por %p4943_p3, %p4942_p2 }
  0xbc   : > { %p4938_p11 = pneg %p4937_p10 }
  0xbe   : > { %p4945_p13 = pnand %p4944_p12, %p4938_p11 }
  0xc0   : > { %4948 = shalt.err (!%p4945_p13)
}
  0xc1   : > { %4529 = dma.hbm_to_vmem [thread:$0]  (!%p5472_p5), %s5324_s26, 16, %s1882_s16, [#allocation6]  }
  0xc2   : > { %s4960_s0 = scalar_lea.vmem %s1922_s27, 16  ;;  %s4967_s7 = scalar_lea.vmem %s1922_s27, 32 }
  0xc3   : > { %p4961_p0 = scmp.ne.s32.totalorder %s1922_s27, %s4960_s0  ;;  %p4968_p7 = scmp.lt.s32.totalorder %s1922_s27, %s1922_s27 }
  0xc4   : > { %p4969_p8 = scmp.lt.s32.totalorder %s4967_s7, %s4960_s0 }
  0xc5   : > { %p4963_p1 = pnand %p4961_p0, %p5482_p6 }
  0xc6   : > { %p4970_p9 = por %p4969_p8, %p4968_p7 }
  0xc7   : > { %p4964_p4 = pneg %p4963_p1 }
  0xc9   : > { %p4971_p10 = pnand %p4970_p9, %p4964_p4 }
  0xcb   : > { %4974 = shalt.err (!%p4971_p10)
}
  0xcc   : > { %4535 = dma.hbm_to_vmem [thread:$0]  (!%p5472_p5), %s5364_s8, 16, %s1922_s27, [#allocation9]  }
  0xcd   : > { %s5226_s28 = smov [#allocation13]   ;;  %s5227_s16 = smov [#allocation16]  }
  0xce   : > { %s1943_s2 = sshll.u32 %s5226_s28, 4  ;;  %s1971_s29 = sshll.u32 %s5227_s16, 4  ;;  %s1944_s2 = int_to_ptr.vmem [resolvable:$true] %s1943_s2  ;;  %s1972_s29 = int_to_ptr.vmem [resolvable:$true] %s1971_s29 }
  0xcf   : > { %s4986_s22 = scalar_lea.vmem %s1944_s2, 16  ;;  %s4993_s18 = scalar_lea.vmem %s1944_s2, 32 }
  0xd0   : > { %p4987_p11 = scmp.ne.s32.totalorder %s1944_s2, %s4986_s22  ;;  %p4994_p12 = scmp.lt.s32.totalorder %s1944_s2, %s1944_s2 }
  0xd1   : > { %p4995_p13 = scmp.lt.s32.totalorder %s4993_s18, %s4986_s22 }
  0xd2   : > { %p4989_p2 = pnand %p4987_p11, %p5482_p6 }
  0xd3   : > { %p4996_p0 = por %p4995_p13, %p4994_p12 }
  0xd4   : > { %p4990_p3 = pneg %p4989_p2 }
  0xd6   : > { %p4997_p1 = pnand %p4996_p0, %p4990_p3 }
  0xd8   : > { %5000 = shalt.err (!%p4997_p1)
}
  0xd9   : > { %4541 = dma.hbm_to_vmem [thread:$0]  (!%p5472_p5), %s5374_s3, 16, %s1944_s2, [#allocation12]  }
  0xda   : > { %s5012_s27 = scalar_lea.vmem %s1972_s29, 16  ;;  %s5019_s0 = scalar_lea.vmem %s1972_s29, 32 }
  0xdb   : > { %p5013_p4 = scmp.ne.s32.totalorder %s1972_s29, %s5012_s27  ;;  %p5020_p9 = scmp.lt.s32.totalorder %s1972_s29, %s1972_s29 }
  0xdc   : > { %p5021_p10 = scmp.lt.s32.totalorder %s5019_s0, %s5012_s27 }
  0xdd   : > { %p5015_p7 = pnand %p5013_p4, %p5482_p6 }
  0xde   : > { %p5022_p11 = por %p5021_p10, %p5020_p9 }
  0xdf   : > { %p5016_p8 = pneg %p5015_p7 }
  0xe1   : > { %p5023_p2 = pnand %p5022_p11, %p5016_p8 }
  0xe3   : > { %5026 = shalt.err (!%p5023_p2)
}
  0xe4   : > { %4547 = dma.hbm_to_vmem [thread:$0]  (!%p5472_p5), %s5394_s24, 16, %s1972_s29, [#allocation15]  }
  0xe5   : > { %s5228_s7 = smov [#allocation19]   ;;  %s5229_s2 = smov [#allocation22]  }
  0xe6   : > { %s1996_s28 = sshll.u32 %s5228_s7, 4  ;;  %s2021_s16 = sshll.u32 %s5229_s2, 4  ;;  %s1997_s28 = int_to_ptr.vmem [resolvable:$true] %s1996_s28  ;;  %s2022_s16 = int_to_ptr.vmem [resolvable:$true] %s2021_s16 }
  0xe7   : > { %s5038_s22 = scalar_lea.vmem %s1997_s28, 16  ;;  %s5045_s18 = scalar_lea.vmem %s1997_s28, 32 }
  0xe8   : > { %p5039_p3 = scmp.ne.s32.totalorder %s1997_s28, %s5038_s22  ;;  %p5046_p0 = scmp.lt.s32.totalorder %s1997_s28, %s1997_s28 }
  0xe9   : > { %p5047_p1 = scmp.lt.s32.totalorder %s5045_s18, %s5038_s22 }
  0xea   : > { %p5041_p12 = pnand %p5039_p3, %p5482_p6 }
  0xeb   : > { %p5048_p4 = por %p5047_p1, %p5046_p0 }
  0xec   : > { %p5042_p13 = pneg %p5041_p12 }
  0xee   : > { %p5049_p7 = pnand %p5048_p4, %p5042_p13 }
  0xf0   : > { %5052 = shalt.err (!%p5049_p7)
}
  0xf1   : > { %4553 = dma.hbm_to_vmem [thread:$0]  (!%p5472_p5), %s5409_s12, 16, %s1997_s28, [#allocation18]  }
  0xf2   : > { %s5064_s29 = scalar_lea.vmem %s2022_s16, 16  ;;  %s5071_s27 = scalar_lea.vmem %s2022_s16, 32 }
  0xf3   : > { %p5065_p8 = scmp.ne.s32.totalorder %s2022_s16, %s5064_s29  ;;  %p5072_p11 = scmp.lt.s32.totalorder %s2022_s16, %s2022_s16 }
  0xf4   : > { %p5073_p2 = scmp.lt.s32.totalorder %s5071_s27, %s5064_s29 }
  0xf5   : > { %p5067_p9 = pnand %p5065_p8, %p5482_p6 }
  0xf6   : > { %p5074_p3 = por %p5073_p2, %p5072_p11 }
  0xf7   : > { %p5068_p10 = pneg %p5067_p9 }
  0xf9   : > { %p5075_p12 = pnand %p5074_p3, %p5068_p10 }
  0xfb   : > { %5078 = shalt.err (!%p5075_p12)
}
  0xfc   : > { %4559 = dma.hbm_to_vmem [thread:$0]  (!%p5472_p5), %s5424_s21, 16, %s2022_s16, [#allocation21]  }
  0xfd   : > { %s5230_s0 = smov [#allocation25]   ;;  %s5231_s28 = smov [#allocation26]  }
  0xfe   : > { %s2046_s7 = sshll.u32 %s5230_s0, 4  ;;  %s2057_s2 = sshll.u32 %s5231_s28, 4  ;;  %s2047_s7 = int_to_ptr.vmem [resolvable:$true] %s2046_s7  ;;  %s2058_s2 = int_to_ptr.vmem [resolvable:$true] %s2057_s2 }
  0xff   : > { %s5090_s22 = scalar_lea.vmem %s2047_s7, 16  ;;  %s5097_s18 = scalar_lea.vmem %s2047_s7, 32 }
 0x100   : > { %p5091_p13 = scmp.ne.s32.totalorder %s2047_s7, %s5090_s22  ;;  %p5098_p4 = scmp.lt.s32.totalorder %s2047_s7, %s2047_s7 }
 0x101   : > { %p5099_p7 = scmp.lt.s32.totalorder %s5097_s18, %s5090_s22 }
 0x102   : > { %p5093_p0 = pnand %p5091_p13, %p5482_p6 }
 0x103   : > { %p5100_p8 = por %p5099_p7, %p5098_p4 }
 0x104   : > { %p5094_p1 = pneg %p5093_p0 }
 0x106   : > { %p5101_p9 = pnand %p5100_p8, %p5094_p1 }
 0x108   : > { %5104 = shalt.err (!%p5101_p9)
}
 0x109   : > { %4565 = dma.hbm_to_vmem [thread:$0]  (!%p5472_p5), %s5439_s25, 16, %s2047_s7, [#allocation24]  }
 0x10a   : > { %s5116_s16 = scalar_lea.vmem %s2058_s2, 16  ;;  %s5123_s29 = scalar_lea.vmem %s2058_s2, 32 }
 0x10b   : > { %p5117_p10 = scmp.ne.s32.totalorder %s2058_s2, %s5116_s16  ;;  %p5124_p3 = scmp.lt.s32.totalorder %s2058_s2, %s2058_s2 }
 0x10c   : > { %p5125_p12 = scmp.lt.s32.totalorder %s5123_s29, %s5116_s16 }
 0x10d   : > { %p5119_p11 = pnand %p5117_p10, %p5482_p6 }
 0x10e   : > { %p5126_p13 = por %p5125_p12, %p5124_p3 }
 0x10f   : > { %p5120_p2 = pneg %p5119_p11 }
 0x111   : > { %p5127_p0 = pnand %p5126_p13, %p5120_p2 }
 0x113   : > { %5130 = shalt.err (!%p5127_p0)
}
 0x114   : > { %4568 = dma.hbm_to_vmem [thread:$0]  (!%p5472_p5), %s5444_s9, 16, %s2058_s2, [#allocation27]  }
 0x115   : > { %p5985_p1 = scmp.ne.s32.totalorder %s5981_s15, 0 }
 0x116   : > { %p5986_p4 = scmp.eq.s32.totalorder (!%p5985_p1), %s5457_s10, 0 }
 0x117   : > { %2077 = sbr.rel (%p5985_p1) target bundleno = 6081 (0x17c1), region = 308 }
 0x11c   : > { %5136 = dma.done.wait (%p5986_p4), [#allocation4], 16   ;;  %p5987_p7 = pmov %p5986_p4 }
 0x11d   : > { %p5988_p6 = pmov %p5986_p4 }
 0x11e   : > { %5138 = vsyncadd (%p5987_p7), [#allocation4], 4294967280 }
 0x11f   : > { %5140 = dma.done.wait (%p5988_p6), [#allocation6], 32   ;;  %p5989_p8 = pmov %p5986_p4 }
 0x120   : > { %p5990_p9 = pmov %p5986_p4 }
 0x121   : > { %5142 = vsyncadd (%p5989_p8), [#allocation6], 4294967264 }
 0x122   : > { %5144 = dma.done.wait (%p5990_p9), [#allocation9], 32   ;;  %p5991_p5 = pmov %p5986_p4 }
 0x123   : > { %p5992_p10 = pmov %p5986_p4 }
 0x124   : > { %5146 = vsyncadd (%p5991_p5), [#allocation9], 4294967264 }
 0x125   : > { %5148 = dma.done.wait (%p5992_p10), [#allocation12], 32   ;;  %p5993_p11 = pmov %p5986_p4 }
 0x126   : > { %p5994_p2 = pmov %p5986_p4 }
 0x127   : > { %5150 = vsyncadd (%p5993_p11), [#allocation12], 4294967264 }
 0x128   : > { %5152 = dma.done.wait (%p5994_p2), [#allocation15], 32   ;;  %p5995_p3 = pmov %p5994_p2 }
 0x129   : > { %p5996_p12 = pmov %p5994_p2 }
 0x12a   : > { %5154 = vsyncadd (%p5995_p3), [#allocation15], 4294967264 }
 0x12b   : > { %5156 = dma.done.wait (%p5996_p12), [#allocation18], 32   ;;  %p5997_p13 = pmov %p5994_p2 }
 0x12c   : > { %p5998_p0 = pmov %p5994_p2 }
 0x12d   : > { %5158 = vsyncadd (%p5997_p13), [#allocation18], 4294967264 }
 0x12e   : > { %5160 = dma.done.wait (%p5998_p0), [#allocation21], 32   ;;  %p5999_p1 = pmov %p5998_p0 }
 0x12f   : > { %p6000_p4 = pmov %p5998_p0 }
 0x130   : > { %5162 = vsyncadd (%p5999_p1), [#allocation21], 4294967264 }
 0x131   : > { %5164 = dma.done.wait (%p6000_p4), [#allocation24], 32   ;;  %p6001_p7 = pmov %p5998_p0 }
 0x132   : > { %p6002_p6 = pmov %p5998_p0 }
 0x133   : > { %5166 = vsyncadd (%p6001_p7), [#allocation24], 4294967264 }
 0x134   : > { %5168 = dma.done.wait (%p6002_p6), [#allocation27], 16   ;;  %p6003_p8 = pmov %p5998_p0 }
 0x135   : > { %s6004_s15 = sld [smem:[#allocation37_spill]]  ;;  %p2296_p9 = scmp.lt.s32.totalorder %s5457_s10, 1  ;;  %v5232_v1 = vmov 0.0   ;;  %vm5233_vm0 = vmmov 0   ;;  %vm2308_vm1 = vcmask 130048   ;;  %vm2480_vm2 = vcmask 1043456  }
 0x136   : > { %5170 = vsyncadd (%p6003_p8), [#allocation27], 4294967280  ;;  %4305 = vmatprep.subr.mxu0 %v5232_v1  ;;  %4312 = vmatprep.subr.mxu1 %v5232_v1  ;;  %s6005_s27 = sld [smem:[#allocation38_spill]]  ;;  %vm2476_vm3 = vcmask 31744   ;;  %v2627_v36 = vlaneseq  ;;  %vm2811_vm4 = vcmask 261120   ;;  %vm3099_vm5 = vcmask 523264  }
 0x137   : > { %4309 = vmatprep.mubr.msk.f32.mxu0 %vm5233_vm0, %v5232_v1  ;;  %s6029_s10 = smov (!%p2296_p9, %s5457_s10), 1  ;;  %4316 = vmatprep.mubr.msk.f32.mxu1 %vm5233_vm0, %v5232_v1  ;;  %s6006_s0 = sld [smem:[#allocation39_spill]]  ;;  %vm3101_vm6 = vcmask 785408   ;;  %vm3501_vm7 = vcmask 1041408   ;;  %vm3518_vm8 = vcmask 1046528   ;;  %vm3532_vm9 = vcmask 1045504  }
 0x138   : > { %s4175_s23 = sshll.u32 %s6029_s10, 3  ;;  %s6007_s7 = sld [smem:[#allocation40_spill]]  ;;  %v5660_v37 = vshrl.u32 %v2627_v36, 7  ;;  %vm3546_vm10 = vcmask 1044480   ;;  %vm3863_vm11 = vcmask 57344   ;;  %vm3893_vm12 = vcmask 0  }
 0x139   : > { %s2299_s1 = scalar_lea.vmem %s5246_s5, %s4175_s23  ;;  %s6008_s28 = sld [smem:[#allocation47_spill]] }
 0x13a   : > { %v2304_v4 = vld [vmem:[%s2299_s1] sm:$0xff]  ;;  %v5663_v38 = vsub.s32 0, %v5660_v37  ;;  %s6009_s2 = sld [smem:[#allocation45_spill]]  ;;  %s5234_s23 = smov 32  }
 0x13b   : > { %v2306_v2 = vld [vmem:[%s6004_s15 + $0x8] sm:$0xff]  ;;  %v2305_v3 = vld [vmem:[%s6004_s15] sm:$0xff]  ;;  %v2309_v5 = vsel %vm2308_vm1, %v2304_v4, 0.0  ;;  %v2316_v6 = vmul.f32 %v2304_v4, %v2304_v4  ;;  %s6010_s22 = sld [smem:[#allocation46_spill]] }
 0x13c   : > { %4306 = vmatpush3.msra.mxu0 %v2306_v2  ;;  %4313 = vmatpush3.msra.mxu1 %v2306_v2  ;;  %v2310_v7 = vrot.slane %v2309_v5, 4  ;;  %v2307_v20 = vld [vmem:[%s6005_s27] sm:$0xf]  ;;  %s6011_s18 = sld [smem:[#allocation48_spill]] }
 0x13d   : > { %4307 = vmatprep.subr.mxu0 %v5232_v1  ;;  %4314 = vmatprep.subr.mxu1 %v5232_v1  ;;  %v2317_v8 = vsel %vm2308_vm1, %v2316_v6, 0.0  ;;  %v2637_v31 = vld [vmem:[%s6006_s0] sm:$0xff]  ;;  %v2638_v32 = vld [vmem:[%s6006_s0 + $0x8] sm:$0xff]  ;;  %s6012_s16 = sld [smem:[#allocation50_spill]] }
 0x13e   : > { %4308 = vmatpush3.msra.mxu0 %v2305_v3  ;;  %4315 = vmatpush3.msra.mxu1 %v2305_v3  ;;  %v2311_v9 = vadd.f32 %v2310_v7, %v2309_v5  ;;  %v2318_v10 = vrot.slane %v2317_v8, 4  ;;  %v2640_v33 = vpack.c.bf16 %v2638_v32, %v2637_v31  ;;  %v4182_v46 = vld [vmem:[%s6007_s7] ss:$0 sm:$0xff]  ;;  %s6013_s29 = sld [smem:[#allocation42_spill]] }
 0x13f   : > { %4319 = vmatprep.subr.mxu0 %v5232_v1  ;;  %4324 = vmatprep.subr.mxu1 %v5232_v1  ;;  %v2705_v58 = vld [vmem:[%s6008_s28 + $0x10] sm:$0xff]  ;;  %v2706_v59 = vld [vmem:[%s6008_s28 + $0x18] sm:$0xff]  ;;  %v2703_v61 = vld [vmem:[%s6008_s28] sm:$0xff]  ;;  %s6014_s1 = sld [smem:[#allocation54_spill]] }
 0x140   : > { %v2312_v11 = vrot.slane %v2311_v9, 2  ;;  %v2319_v12 = vadd.f32 %v2318_v10, %v2317_v8  ;;  %v2842_v60 = vpack.c.bf16 %v2706_v59, %v2705_v58  ;;  %v2704_v62 = vld [vmem:[%s6008_s28 + $0x8] sm:$0xff]  ;;  %v4184_v5 = vld [vmem:[%s6009_s2] ss:$0 sm:$0xff]  ;;  %s6015_s27 = sld [smem:[#allocation51_spill]]  ;;  %s5953_s2 = smov 96  }
 0x141   : > { %v2841_v63 = vpack.c.bf16 %v2704_v62, %v2703_v61  ;;  %v4185_v7 = vld [vmem:[%s6010_s22] ss:$0 sm:$0xff]  ;;  %s6016_s7 = sld [smem:[#allocation53_spill]]  ;;  %s5236_s22 = smov 64  }
 0x142   : > { %v2313_v13 = vadd.f32 %v2312_v11, %v2311_v9  ;;  %v2320_v14 = vrot.slane %v2319_v12, 2  ;;  %v2722_v11 = vld [vmem:[%s6011_s18 + $0x70] sm:$0xff]  ;;  %v2708_v32 = vld [vmem:[%s6011_s18] sm:$0xff]  ;;  %s6023_s0 = sld [smem:[#allocation57_spill]] }
 0x144   : > { %v2314_v15 = vrot.slane %v2313_v13, 1  ;;  %v2321_v16 = vadd.f32 %v2320_v14, %v2319_v12  ;;  %v2723_v12 = vld [vmem:[%s6011_s18 + $0x78] sm:$0xff]  ;;  %v2720_v14 = vld [vmem:[%s6011_s18 + $0x60] sm:$0xff] }
 0x146   : > { %v2315_v17 = vadd.f32 %v2314_v15, %v2313_v13  ;;  %v2322_v18 = vrot.slane %v2321_v16, 1  ;;  %v2907_v13 = vpack.c.bf16 %v2723_v12, %v2722_v11  ;;  %v2721_v15 = vld [vmem:[%s6011_s18 + $0x68] sm:$0xff] }
 0x148   : > { %4310 = vmatmul.mubr.msk.f32.vlgmr.msra.gmra.mxu0 %vm2308_vm1, %v2315_v17  ;;  %v2323_v19 = vadd.f32 %v2322_v18, %v2321_v16  ;;  %v2906_v16 = vpack.c.bf16 %v2721_v15, %v2720_v14  ;;  %v2718_v17 = vld [vmem:[%s6011_s18 + $0x50] sm:$0xff]  ;;  %v2719_v18 = vld [vmem:[%s6011_s18 + $0x58] sm:$0xff]  ;;  %v4190_v14 = vld [vmem:[#allocation7] ss:$0 sm:$0xff] }
 0x149   : > { %4321 = vmatprep.mubr.msk.f32.mxu0 %vm5233_vm0, %v5232_v1  ;;  %4320 = vmatpush3.msk.msra.mxu0 %vm2480_vm2, %v2307_v20 }
 0x14a   : > { %4317 = vmatmul.mubr.msk.f32.vlgmr.msra.gmra.mxu1 %vm2308_vm1, %v2323_v19  ;;  %4329 = vmatprep.subr.bf16.mxu0 %v5232_v1  ;;  %v2905_v19 = vpack.c.bf16 %v2719_v18, %v2718_v17 }
 0x14b   : > { %4326 = vmatprep.mubr.msk.f32.mxu1 %vm5233_vm0, %v5232_v1  ;;  %4325 = vmatpush3.msk.msra.mxu1 %vm2480_vm2, %v2307_v20  ;;  %v2716_v20 = vld [vmem:[%s6011_s18 + $0x40] sm:$0xff] }
 0x14c   : > { %4363 = vmatprep.subr.bf16.mxu1 %v5232_v1 }
 0x208   : > { %v2393_v21 = vpop.f32.mrf.mxu0 }
 0x209   : > { %v2397_v22 = vmul.f32 0.03125, %v2393_v21  ;;  %v2717_v21 = vld [vmem:[%s6011_s18 + $0x48] sm:$0xff] }
 0x20a   : > { %v4311_v23 = vpop.f32.mrf.mxu0  ;;  %v2467_v24 = vpop.f32.mrf.mxu1 }
 0x20b   : > { %v2472_v25 = vmul.f32 %v2397_v22, %v2397_v22  ;;  %v2471_v26 = vmul.f32 0.03125, %v2467_v24  ;;  %4322 = vmatmul.mubr.msk.f32.vlgmr.msra.gmra.mxu0 %vm2476_vm3, %v2397_v22  ;;  %v2904_v22 = vpack.c.bf16 %v2717_v21, %v2716_v20  ;;  %v2714_v23 = vld [vmem:[%s6011_s18 + $0x30] sm:$0xff]  ;;  %v2715_v24 = vld [vmem:[%s6011_s18 + $0x38] sm:$0xff] }
 0x20c   : > { %v4318_v27 = vpop.f32.mrf.mxu1  ;;  %4331 = vmatprep.mubr.msk.bf16.mxu0 %vm5233_vm0, %v5232_v1  ;;  %4330 = vmatpush3.bf16.msra.mxu0 %v2640_v33  ;;  %v2709_v33 = vld [vmem:[%s6011_s18 + $0x8] sm:$0xff]  ;;  %v2764_v20 = vld [vmem:[%s6014_s1 + $0xf0] sm:$0xff]  ;;  %v2765_v21 = vld [vmem:[%s6014_s1 + $0xf8] sm:$0xff] }
 0x20d   : > { %v2473_v28 = vsub.f32 %v2471_v26, %v2472_v25  ;;  %4335 = vmatprep.subr.bf16.mxu0 %v5232_v1  ;;  %v2903_v25 = vpack.c.bf16 %v2715_v24, %v2714_v23  ;;  %v2712_v26 = vld [vmem:[%s6011_s18 + $0x20] sm:$0xff]  ;;  %v2713_v27 = vld [vmem:[%s6011_s18 + $0x28] sm:$0xff]  ;;  %v3122_v23 = vpack.c.bf16 %v2765_v21, %v2764_v20  ;;  %v2749_v24 = vld [vmem:[%s6014_s1 + $0x78] sm:$0xff] }
 0x20f   : > { %v2474_v29 = vadd.f32 1e-05, %v2473_v28  ;;  %v2902_v28 = vpack.c.bf16 %v2713_v27, %v2712_v26  ;;  %v2763_v26 = vld [vmem:[%s6014_s1 + $0xe8] sm:$0xff] }
 0x211   : > { %4673 = vrsqrt.f32 %v2474_v29  ;;  %v2710_v29 = vld [vmem:[%s6011_s18 + $0x10] sm:$0xff] }
 0x21e   : > { %v4674_v30 = vpop.eup %4673 }
 0x21f   : > { %4327 = vmatmul.mubr.msk.f32.vlgmr.msra.gmra.mxu1 %vm2476_vm3, %v4674_v30  ;;  %v2711_v30 = vld [vmem:[%s6011_s18 + $0x18] sm:$0xff] }
 0x220   : > { %4367 = vmatprep.mubr.msk.bf16.mxu1 %vm5233_vm0, %v5232_v1  ;;  %v2901_v31 = vpack.c.bf16 %v2711_v30, %v2710_v29  ;;  %v2746_v29 = vld [vmem:[%s6014_s1 + $0x60] sm:$0xff]  ;;  %v2747_v30 = vld [vmem:[%s6014_s1 + $0x68] sm:$0xff] }
 0x2cb   : > { %v2550_v34 = vpop.f32.mrf.mxu0 }
 0x2cc   : > { %v2630_v39 = vrot.slane %v2550_v34, %v5663_v38  ;;  %v2900_v34 = vpack.c.bf16 %v2709_v33, %v2708_v32  ;;  %v2761_v32 = vld [vmem:[%s6014_s1 + $0xd8] sm:$0xff]  ;;  %v3113_v33 = vpack.c.bf16 %v2747_v30, %v2746_v29 }
 0x2cd   : > { %v4323_v35 = vpop.f32.mrf.mxu0 }
 0x2ce   : > { %v2631_v41 = vsub.f32 %v2304_v4, %v2630_v39  ;;  %v4186_v35 = vld [vmem:[#allocation3] ss:$0 sm:$0xff] }
 0x2df   : > { %v2623_v40 = vpop.f32.mrf.mxu1 }
 0x2e0   : > { %v2635_v42 = vrot.slane %v2623_v40, %v5663_v38 }
 0x2e1   : > { %v4328_v43 = vpop.f32.mrf.mxu1 }
 0x2e2   : > { %v2636_v44 = vmul.f32 %v2635_v42, %v2631_v41 }
 0x2e4   : > { %v2639_v45 = vpack.c.bf16 %v2636_v44, %v2636_v44 }
 0x2e6   : > { %4332 = vmatmul.mubr.msk.bf16.vlgmr.msra.gmra.mxu0 %vm2308_vm1, %v2639_v45 }
 0x2e7   : > { %4339 = vmatprep.mubr.msk.bf16.mxu0 %vm5233_vm0, %v5232_v1  ;;  %4336 = vmatpush3.bf16.msra.mxu0 %v2842_v60 }
 0x2e8   : > { %4337 = vmatprep.subr.bf16.mxu0 %v5232_v1 }
 0x2eb   : > { %4338 = vmatpush3.bf16.msra.mxu0 %v2841_v63 }
 0x2ec   : > { %4343 = vmatprep.subr.bf16.mxu0 %v5232_v1 }
 0x3a6   : > { %v2685_v47 = vpop.f32.mrf.mxu0 }
 0x3a7   : > { %v5671_v48 = vadd.f32 %v4182_v46, %v2685_v47 }
 0x3a8   : > { %v4333_v49 = vpop.f32.mrf.mxu0 }
 0x3a9   : > { %v2812_v50 = vsel %vm2811_vm4, %v5671_v48, 0.0 }
 0x3aa   : > { %2813 = vadd.xlane.f32.xlu0 %v2812_v50  ;;  %v2688_v51 = vpop.f32.mrf.mxu0  ;;  %v4189_v50 = vld [vmem:[#allocation5] ss:$0 sm:$0xff] }
 0x3ac   : > { %v4334_v52 = vpop.f32.mrf.mxu0 }
 0x433   : > { %v2814_v53 = vpop.xlane.xlu0 %2813 }
 0x434   : > { %v2816_v54 = vmul.f32 0.03125, %v2814_v53 }
 0x436   : > { %v2817_v55 = vsub.f32 %v5671_v48, %v2816_v54 }
 0x438   : > { %v2818_v56 = vmul.f32 %v2817_v55, %v2817_v55 }
 0x43a   : > { %v2819_v57 = vsel %vm2811_vm4, %v2818_v56, 0.0 }
 0x43b   : > { %2820 = vadd.xlane.f32.xlu0 %v2819_v57 }
 0x4c4   : > { %v2821_v0 = vpop.xlane.xlu0 %2820 }
 0x4c5   : > { %v2822_v2 = vmul.f32 0.03125, %v2821_v0  ;;  %v2729_v0 = vld [vmem:[%s6012_s16 + $0x10] sm:$0xff] }
 0x4c7   : > { %v2823_v3 = vadd.f32 1e-05, %v2822_v2 }
 0x4c9   : > { %4675 = vrsqrt.f32 %v2823_v3  ;;  %v2727_v3 = vld [vmem:[%s6012_s16] sm:$0xff] }
 0x4d6   : > { %v4676_v4 = vpop.eup %4675 }
 0x4d7   : > { %v2825_v6 = vmul.f32 %v4676_v4, %v2817_v55  ;;  %v2728_v4 = vld [vmem:[%s6012_s16 + $0x8] sm:$0xff] }
 0x4d9   : > { %v2832_v8 = vmul.f32 %v4184_v5, %v2825_v6  ;;  %v2984_v5 = vpack.c.bf16 %v2728_v4, %v2727_v3  ;;  %v5727_v6 = vld [vmem:[%s6013_s29 + $0x18] sm:$0xff]  ;;  %v4192_v3 = vld [vmem:[%s6015_s27] ss:$0 sm:$0xff]  ;;  %s6017_s27 = sld [smem:[#allocation44_spill]] }
 0x4db   : > { %v2839_v9 = vadd.f32 %v4185_v7, %v2832_v8  ;;  %v5730_v7 = vld [vmem:[%s6013_s29 + $0x10] sm:$0xff]  ;;  %v5737_v8 = vld [vmem:[%s6013_s29] sm:$0xff] }
 0x4dc   : > { %3057 = vrot.lane.b32.xlu0 %v5730_v7, %s5234_s23 }
 0x4dd   : > { %v2840_v10 = vpack.c.bf16 %v2839_v9, %v2839_v9  ;;  %v5742_v9 = vld [vmem:[%s6013_s29 + $0x8] sm:$0xff] }
 0x4df   : > { %4340 = vmatmul.mubr.msk.bf16.vlgmr.msra.gmra.mxu0 %vm2811_vm4, %v2840_v10 }
 0x4e0   : > { %4359 = vmatprep.mubr.msk.bf16.mxu0 %vm5233_vm0, %v5232_v1  ;;  %4344 = vmatpush3.bf16.msra.mxu0 %v2907_v13 }
 0x4e1   : > { %4345 = vmatprep.subr.bf16.mxu0 %v5232_v1 }
 0x4e4   : > { %4346 = vmatpush3.bf16.msra.mxu0 %v2906_v16  ;;  %v4191_v16 = vld [vmem:[#allocation8] ss:$0 sm:$0xff] }
 0x4e5   : > { %4347 = vmatprep.subr.bf16.mxu0 %v5232_v1 }
 0x4e8   : > { %4348 = vmatpush3.bf16.msra.mxu0 %v2905_v19 }
 0x4e9   : > { %4349 = vmatprep.subr.bf16.mxu0 %v5232_v1 }
 0x4ec   : > { %4350 = vmatpush3.bf16.msra.mxu0 %v2904_v22  ;;  %v2748_v22 = vld [vmem:[%s6014_s1 + $0x70] sm:$0xff] }
 0x4ed   : > { %4351 = vmatprep.subr.bf16.mxu0 %v5232_v1  ;;  %v3114_v27 = vpack.c.bf16 %v2749_v24, %v2748_v22 }
 0x4f0   : > { %4352 = vmatpush3.bf16.msra.mxu0 %v2903_v25  ;;  %v2762_v25 = vld [vmem:[%s6014_s1 + $0xe0] sm:$0xff] }
 0x4f1   : > { %4353 = vmatprep.subr.bf16.mxu0 %v5232_v1 }
 0x4f4   : > { %4354 = vmatpush3.bf16.msra.mxu0 %v2902_v28  ;;  %v3121_v28 = vpack.c.bf16 %v2763_v26, %v2762_v25 }
 0x4f5   : > { %4355 = vmatprep.subr.bf16.mxu0 %v5232_v1 }
 0x4f8   : > { %4356 = vmatpush3.bf16.msra.mxu0 %v2901_v31  ;;  %v2760_v31 = vld [vmem:[%s6014_s1 + $0xd0] sm:$0xff] }
 0x4f9   : > { %4357 = vmatprep.subr.bf16.mxu0 %v5232_v1 }
 0x4fc   : > { %4358 = vmatpush3.bf16.msra.mxu0 %v2900_v34  ;;  %v3120_v34 = vpack.c.bf16 %v2761_v32, %v2760_v31 }
 0x4fd   : > { %4371 = vmatprep.subr.bf16.mxu0 %v5232_v1 }
 0x59f   : > { %v2886_v36 = vpop.f32.mrf.mxu0 }
 0x5a0   : > { %v2887_v39 = vadd.f32 %v4186_v35, %v2886_v36  ;;  %v2744_v35 = vld [vmem:[%s6014_s1 + $0x50] sm:$0xff]  ;;  %v2745_v36 = vld [vmem:[%s6014_s1 + $0x58] sm:$0xff] }
 0x5a1   : > { %v4341_v40 = vpop.f32.mrf.mxu0 }
 0x5a2   : > { %v4188_v41 = vmul.f32 -1.442695, %v2887_v39  ;;  %v2759_v40 = vld [vmem:[%s6014_s1 + $0xc8] sm:$0xff] }
 0x5a3   : > { %v2889_v42 = vpop.f32.mrf.mxu0 }
 0x5a4   : > { %4677 = vpow2.f32 %v4188_v41  ;;  %v3112_v41 = vpack.c.bf16 %v2745_v36, %v2744_v35 }
 0x5a5   : > { %v4342_v43 = vpop.f32.mrf.mxu0 }
 0x5a6   : > { %v2742_v43 = vld [vmem:[%s6014_s1 + $0x40] sm:$0xff] }
 0x5b1   : > { %v4678_v44 = vpop.eup %4677 }
 0x5b2   : > { %v2895_v45 = vadd.f32 1.0, %v4678_v44  ;;  %v2743_v44 = vld [vmem:[%s6014_s1 + $0x48] sm:$0xff] }
 0x5b4   : > { %4679 = vrcp.f32 %v2895_v45  ;;  %v2756_v45 = vld [vmem:[%s6014_s1 + $0xb0] sm:$0xff] }
 0x5c1   : > { %v4680_v46 = vpop.eup %4679 }
 0x5c2   : > { %v2898_v47 = vmul.f32 %v4680_v46, %v2887_v39  ;;  %v2758_v39 = vld [vmem:[%s6014_s1 + $0xc0] sm:$0xff]  ;;  %v2757_v46 = vld [vmem:[%s6014_s1 + $0xb8] sm:$0xff] }
 0x5c3   : > { %v3119_v42 = vpack.c.bf16 %v2759_v40, %v2758_v39 }
 0x5c4   : > { %v2899_v49 = vpack.c.bf16 %v2898_v47, %v2898_v47  ;;  %v3111_v47 = vpack.c.bf16 %v2743_v44, %v2742_v43 }
 0x5c6   : > { %4360 = vmatmul.mubr.bf16.vlgmr.msra.gmra.mxu0 %v2899_v49  ;;  %v3118_v49 = vpack.c.bf16 %v2757_v46, %v2756_v45 }
 0x5c7   : > { %4375 = vmatprep.mubr.msk.bf16.mxu0 %vm5233_vm0, %v5232_v1 }
 0x686   : > { %v2948_v51 = vpop.f32.mrf.mxu0 }
 0x687   : > { %v2949_v52 = vadd.f32 %v4189_v50, %v2948_v51  ;;  %v2740_v50 = vld [vmem:[%s6014_s1 + $0x30] sm:$0xff]  ;;  %v2741_v51 = vld [vmem:[%s6014_s1 + $0x38] sm:$0xff] }
 0x688   : > { %v4361_v53 = vpop.f32.mrf.mxu0 }
 0x689   : > { %v2954_v54 = vmul.f32 0.5, %v2949_v52  ;;  %v3110_v52 = vpack.c.bf16 %v2741_v51, %v2740_v50  ;;  %v2754_v53 = vld [vmem:[%s6014_s1 + $0xa0] sm:$0xff] }
 0x68a   : > { %v2951_v55 = vpop.f32.mrf.mxu0 }
 0x68b   : > { %v5715_v56 = vadd.f32 %v2954_v54, %v5671_v48  ;;  %v2730_v48 = vld [vmem:[%s6012_s16 + $0x18] sm:$0xff]  ;;  %v2755_v54 = vld [vmem:[%s6014_s1 + $0xa8] sm:$0xff] }
 0x68c   : > { %v4362_v57 = vpop.f32.mrf.mxu0  ;;  %v2985_v2 = vpack.c.bf16 %v2730_v48, %v2729_v0  ;;  %v3117_v55 = vpack.c.bf16 %v2755_v54, %v2754_v53  ;;  %v2736_v0 = vld [vmem:[%s6014_s1 + $0x10] sm:$0xff]  ;;  %v2737_v48 = vld [vmem:[%s6014_s1 + $0x18] sm:$0xff] }
 0x68d   : > { %v2956_v58 = vsel %vm2811_vm4, %v5715_v56, 0.0  ;;  %v2738_v57 = vld [vmem:[%s6014_s1 + $0x20] sm:$0xff] }
 0x68e   : > { %2957 = vadd.xlane.f32.xlu1 %v2956_v58  ;;  %4364 = vmatpush3.bf16.msra.mxu1 %v2985_v2  ;;  %v2739_v58 = vld [vmem:[%s6014_s1 + $0x28] sm:$0xff]  ;;  %v3108_v2 = vpack.c.bf16 %v2737_v48, %v2736_v0 }
 0x68f   : > { %4365 = vmatprep.subr.bf16.mxu1 %v5232_v1 }
 0x692   : > { %4366 = vmatpush3.bf16.msra.mxu1 %v2984_v5  ;;  %v2750_v5 = vld [vmem:[%s6014_s1 + $0x80] sm:$0xff] }
 0x693   : > { %4249 = vmatprep.subr.bf16.mxu1 %v3122_v23 }
 0x717   : > { %v2958_v59 = vpop.xlane.xlu1 %2957 }
 0x718   : > { %v2959_v60 = vmul.f32 0.03125, %v2958_v59 }
 0x71a   : > { %v2960_v61 = vsub.f32 %v5715_v56, %v2959_v60  ;;  %v3109_v60 = vpack.c.bf16 %v2739_v58, %v2738_v57 }
 0x71c   : > { %v2961_v62 = vmul.f32 %v2960_v61, %v2960_v61 }
 0x71e   : > { %v2962_v63 = vsel %vm2811_vm4, %v2961_v62, 0.0  ;;  %v2753_v62 = vld [vmem:[%s6014_s1 + $0x98] sm:$0xff] }
 0x71f   : > { %2963 = vadd.xlane.f32.xlu1 %v2962_v63 }
 0x730   : > { %3059 = vrot.lane.b32.xlu1 %v5727_v6, %s5234_s23 }
 0x734   : > { %3053 = vrot.lane.b32.xlu1 %v5737_v8, %s5234_s23 }
 0x738   : > { %3055 = vrot.lane.b32.xlu1 %v5742_v9, %s5234_s23 }
 0x7a8   : > { %v2964_v10 = vpop.xlane.xlu1 %2963 }
 0x7a9   : > { %v2965_v11 = vmul.f32 0.03125, %v2964_v10  ;;  %v2751_v10 = vld [vmem:[%s6014_s1 + $0x88] sm:$0xff] }
 0x7ab   : > { %v2966_v12 = vadd.f32 1e-05, %v2965_v11 }
 0x7ac   : > { %v3060_v59 = vpop.permute.xlu1 %3059 }
 0x7ad   : > { %4681 = vrsqrt.f32 %v2966_v12  ;;  %v3058_v12 = vpop.permute.xlu0 %3057 }
 0x7b0   : > { %v3054_v4 = vpop.permute.xlu1 %3053 }
 0x7b4   : > { %v3056_v25 = vpop.permute.xlu1 %3055 }
 0x7ba   : > { %v4682_v13 = vpop.eup %4681 }
 0x7bb   : > { %v2968_v15 = vmul.f32 %v4682_v13, %v2960_v61  ;;  %v2752_v61 = vld [vmem:[%s6014_s1 + $0x90] sm:$0xff]  ;;  %v3115_v13 = vpack.c.bf16 %v2751_v10, %v2750_v5 }
 0x7bc   : > { %v3116_v63 = vpack.c.bf16 %v2753_v62, %v2752_v61 }
 0x7bd   : > { %v2975_v17 = vmul.f32 %v4190_v14, %v2968_v15  ;;  %v2734_v14 = vld [vmem:[%s6014_s1] sm:$0xff]  ;;  %v2735_v15 = vld [vmem:[%s6014_s1 + $0x8] sm:$0xff]  ;;  %s6024_s1 = smov 96  }
 0x7bf   : > { %v2982_v18 = vadd.f32 %v4191_v16, %v2975_v17  ;;  %v4195_v17 = vld [vmem:[%s6016_s7] ss:$0 sm:$0xff]  ;;  %s6019_s7 = sld [smem:[#allocation43_spill]] }
 0x7c1   : > { %v2983_v19 = vpack.c.bf16 %v2982_v18, %v2982_v18  ;;  %v3107_v18 = vpack.c.bf16 %v2735_v15, %v2734_v14 }
 0x7c3   : > { %4368 = vmatmul.mubr.msk.bf16.vlgmr.msra.gmra.mxu1 %vm2811_vm4, %v2983_v19 }
 0x7c4   : > { %4250 = vmatpush3.bf16.msra.mxu1 %v3114_v27 }
 0x7c5   : > { %4251 = vmatprep.subr.bf16.mxu1 %v3121_v28  ;;  %v2697_v14 = vld [vmem:[%s6019_s7 + $0x10] sm:$0xff]  ;;  %v2696_v15 = vld [vmem:[%s6019_s7 + $0x8] sm:$0xff] }
 0x7c8   : > { %4252 = vmatpush3.bf16.msra.mxu1 %v3113_v33  ;;  %v2699_v33 = vld [vmem:[%s6017_s27] sm:$0xff] }
 0x7c9   : > { %4253 = vmatprep.subr.bf16.mxu1 %v3120_v34  ;;  %v2700_v34 = vld [vmem:[%s6017_s27 + $0x8] sm:$0xff] }
 0x7cc   : > { %4254 = vmatpush3.bf16.msra.mxu1 %v3112_v41 }
 0x7cd   : > { %4255 = vmatprep.subr.bf16.mxu1 %v3119_v42 }
 0x7d0   : > { %4256 = vmatpush3.bf16.msra.mxu1 %v3111_v47 }
 0x7d1   : > { %4257 = vmatprep.subr.bf16.mxu1 %v3118_v49 }
 0x7d4   : > { %4258 = vmatpush3.bf16.msra.mxu1 %v3110_v52 }
 0x7d5   : > { %4259 = vmatprep.subr.bf16.mxu1 %v3117_v55 }
 0x7d8   : > { %4260 = vmatpush3.bf16.msra.mxu1 %v3109_v60 }
 0x7d9   : > { %4261 = vmatprep.subr.bf16.mxu1 %v3116_v63 }
 0x7dc   : > { %4262 = vmatpush3.bf16.msra.mxu1 %v3108_v2 }
 0x7dd   : > { %4263 = vmatprep.subr.bf16.mxu1 %v3115_v13  ;;  %v2698_v13 = vld [vmem:[%s6019_s7 + $0x18] sm:$0xff] }
 0x7e0   : > { %4264 = vmatpush3.bf16.msra.mxu1 %v3107_v18 }
 0x7e1   : > { %4379 = vmatprep.subr.mxu1 %v5232_v1 }
 0x883   : > { %v3029_v11 = vpop.f32.mrf.mxu1 }
 0x884   : > { %v5780_v16 = vadd.f32 %v4192_v3, %v3029_v11 }
 0x885   : > { %v4369_v19 = vpop.f32.mrf.mxu1 }
 0x886   : > { %v3067_v20 = vmul.f32 %v3058_v12, %v5780_v16  ;;  %v3068_v21 = vmul.f32 %v3060_v59, %v5780_v16  ;;  %v3048_v23 = vadd.f32 %v4195_v17, %v5780_v16  ;;  %v3065_v27 = vmul.f32 %v3054_v4, %v5780_v16 }
 0x887   : > { %v3032_v22 = vpop.f32.mrf.mxu1  ;;  %v3066_v28 = vmul.f32 %v3056_v25, %v5780_v16 }
 0x888   : > { %v3087_v24 = vpack.c.bf16 %v3068_v21, %v3067_v20  ;;  %3089 = vrot.lane.b32.xlu1 %v3048_v23, %s5234_s23  ;;  %s6018_s23 = sld [smem:[#allocation52_spill]] }
 0x889   : > { %v4370_v26 = vpop.f32.mrf.mxu1  ;;  %v3086_v29 = vpack.c.bf16 %v3066_v28, %v3065_v27 }
 0x88a   : > { %3167 = vrot.lane.b32.xlu0 %v3087_v24, %s5953_s2 }
 0x88c   : > { %3095 = vrot.lane.b32.xlu1 %v3048_v23, %s5953_s2 }
 0x88e   : > { %3092 = vrot.lane.b32.xlu0 %v3048_v23, %s5236_s22  ;;  %v4194_v41 = vld [vmem:[%s6018_s23] ss:$0 sm:$0xff]  ;;  %s6021_s23 = sld [smem:[#allocation56_spill]] }
 0x88f   : > { %v3041_v45 = vadd.f32 %v4194_v41, %v5780_v16 }
 0x891   : > { %v3085_v47 = vpack.c.bf16 %v3041_v45, %v3041_v45 }
 0x892   : > { %3165 = vrot.lane.b32.xlu0 %v3086_v29, %s5953_s2  ;;  %s6022_s2 = sld [smem:[#allocation58_spill]] }
 0x896   : > { %3073 = vrot.lane.b32.xlu0 %v5730_v7, %s5236_s22 }
 0x89a   : > { %3075 = vrot.lane.b32.xlu0 %v5727_v6, %s5236_s22 }
 0x89e   : > { %3069 = vrot.lane.b32.xlu0 %v5737_v8, %s5236_s22 }
 0x8a2   : > { %3071 = vrot.lane.b32.xlu0 %v5742_v9, %s5236_s22 }
 0x8fa   : > { %v3090_v30 = vpop.permute.xlu1 %3089 }
 0x8fb   : > { %v3098_v7 = vsel %vm2811_vm4, %v3048_v23, %v3090_v30 }
 0x8fc   : > { %v3168_v31 = vpop.permute.xlu0 %3167 }
 0x8fd   : > { %v3176_v32 = vsel %vm2811_vm4, %v3168_v31, 0 }
 0x8fe   : > { %4372 = vmatpush3.bf16.xpose.msra.mxu0 %v3176_v32  ;;  %v3096_v35 = vpop.permute.xlu1 %3095 }
 0x8ff   : > { %4373 = vmatprep.subr.bf16.mxu0 %v5232_v1 }
 0x900   : > { %v3093_v6 = vpop.permute.xlu0 %3092 }
 0x901   : > { %v3100_v8 = vsel %vm3099_vm5, %v3098_v7, %v3093_v6 }
 0x902   : > { %v3102_v36 = vsel %vm3101_vm6, %v3100_v8, %v3096_v35  ;;  %v4200_v35 = vld [vmem:[#allocation10] ss:$0 sm:$0xff] }
 0x903   : > { %v3103_v39 = vmul.f32 %v3102_v36, %v2699_v33  ;;  %v3104_v9 = vmul.f32 %v3102_v36, %v2700_v34 }
 0x904   : > { %v3166_v40 = vpop.permute.xlu0 %3165 }
 0x905   : > { %v3105_v42 = vpack.c.bf16 %v3103_v39, %v3103_v39  ;;  %v3173_v43 = vsel %vm2811_vm4, %v3166_v40, 0  ;;  %v3106_v44 = vpack.c.bf16 %v3104_v9, %v3104_v9 }
 0x906   : > { %4374 = vmatpush3.bf16.xpose.msra.mxu0 %v3173_v43 }
 0x907   : > { %3155 = vmatprep.mubr.bf16.mxu1 %v3106_v44  ;;  %4390 = vmatprep.subr.bf16.mxu0 %v5232_v1 }
 0x908   : > { %v3074_v46 = vpop.permute.xlu0 %3073  ;;  %3156 = vmatmul.mubr.bf16.vlgmr.msra.gmra.mxu1 %v3105_v42 }
 0x909   : > { %4387 = vmatprep.mubr.msk.f32.mxu1 %vm5233_vm0, %v5232_v1  ;;  %v3083_v50 = vmul.f32 %v3074_v46, %v5780_v16  ;;  %4380 = vmatpush3.msra.mxu1 %v2698_v13 }
 0x90a   : > { %4381 = vmatprep.subr.mxu1 %v5232_v1 }
 0x90b   : > { %4382 = vmatpush3.msra.mxu1 %v2697_v14 }
 0x90c   : > { %v3076_v49 = vpop.permute.xlu0 %3075  ;;  %4383 = vmatprep.subr.mxu1 %v5232_v1 }
 0x90d   : > { %v3084_v51 = vmul.f32 %v3076_v49, %v5780_v16  ;;  %4376 = vmatmul.mubr.msk.bf16.vlgmr.msra.gmra.mxu0 %vm2811_vm4, %v3085_v47  ;;  %4384 = vmatpush3.msra.mxu1 %v2696_v15  ;;  %v2776_v49 = vld [vmem:[%s6021_s23 + $0x18] sm:$0xff]  ;;  %v2782_v15 = vld [vmem:[%s6022_s2 + $0x10] sm:$0xff] }
 0x90e   : > { %4394 = vmatprep.mubr.msk.bf16.mxu0 %vm5233_vm0, %v5232_v1  ;;  %4385 = vmatprep.subr.mxu1 %v5232_v1 }
 0x90f   : > { %v3302_v52 = vpack.c.bf16 %v3084_v51, %v3083_v50  ;;  %v2773_v51 = vld [vmem:[%s6021_s23] sm:$0xff] }
 0x910   : > { %v3070_v53 = vpop.permute.xlu0 %3069 }
 0x911   : > { %3307 = vrot.lane.b32.xlu0 %v3302_v52, %s5236_s22  ;;  %v3081_v55 = vmul.f32 %v3070_v53, %v5780_v16  ;;  %v2774_v52 = vld [vmem:[%s6021_s23 + $0x8] sm:$0xff] }
 0x912   : > { %v3436_v53 = vpack.c.bf16 %v2774_v52, %v2773_v51 }
 0x914   : > { %v3072_v54 = vpop.permute.xlu0 %3071 }
 0x915   : > { %v3082_v57 = vmul.f32 %v3072_v54, %v5780_v16  ;;  %v2695_v16 = vld [vmem:[%s6019_s7] sm:$0xff] }
 0x916   : > { %4386 = vmatpush3.msra.mxu1 %v2695_v16  ;;  %v2783_v16 = vld [vmem:[%s6022_s2 + $0x18] sm:$0xff] }
 0x917   : > { %v3301_v58 = vpack.c.bf16 %v3082_v57, %v3081_v55  ;;  %4398 = vmatprep.subr.bf16.mxu1 %v5232_v1 }
 0x919   : > { %3305 = vrot.lane.b32.xlu0 %v3301_v58, %s5236_s22  ;;  %s6020_s22 = sld [smem:[#allocation55_spill]] }
 0x91f   : > { %v2768_v21 = vld [vmem:[%s6020_s22 + $0x10] sm:$0xff]  ;;  %v2769_v22 = vld [vmem:[%s6020_s22 + $0x18] sm:$0xff]  ;;  %v2766_v29 = vld [vmem:[%s6020_s22] sm:$0xff] }
 0x920   : > { %v3356_v23 = vpack.c.bf16 %v2769_v22, %v2768_v21  ;;  %v2767_v30 = vld [vmem:[%s6020_s22 + $0x8] sm:$0xff]  ;;  %v3512_v21 = vsub.s32 1, %v5660_v37  ;;  %v3526_v22 = vsub.s32 2, %v5660_v37 }
 0x921   : > { %v3355_v31 = vpack.c.bf16 %v2767_v30, %v2766_v29 }
 0x983   : > { %v3308_v59 = vpop.permute.xlu0 %3307 }
 0x984   : > { %4391 = vmatpush3.bf16.msra.mxu0 %v3308_v59  ;;  %v4201_v59 = vld [vmem:[#allocation11] ss:$0 sm:$0xff] }
 0x985   : > { %4392 = vmatprep.subr.bf16.mxu0 %v5232_v1 }
 0x98b   : > { %v3306_v60 = vpop.permute.xlu0 %3305 }
 0x98c   : > { %4393 = vmatpush3.bf16.msra.mxu0 %v3306_v60 }
 0x98d   : > { %4406 = vmatprep.subr.bf16.mxu0 %v5232_v1 }
 0x9c8   : > { %v4265_v61 = vpop.f32.mrf.mxu1 }
 0x9ca   : > { %v4266_v62 = vpop.f32.mrf.mxu1 }
 0x9cb   : > { %v4267_v63 = vadd.f32 %v4266_v62, %v4265_v61  ;;  %v4202_v61 = vld [vmem:[#allocation13] ss:$0 sm:$0xff] }
 0x9cc   : > { %v4268_v0 = vpop.f32.mrf.mxu1 }
 0x9cd   : > { %v3212_v48 = vpop.f32.mrf.mxu0 }
 0x9ce   : > { %v3213_v2 = vadd.f32 %v4267_v63, %v3212_v48  ;;  %v4269_v3 = vpop.f32.mrf.mxu1  ;;  %v4203_v48 = vld [vmem:[#allocation14] ss:$0 sm:$0xff] }
 0x9cf   : > { %v4377_v4 = vpop.f32.mrf.mxu0 }
 0x9d0   : > { %v3218_v5 = vmul.f32 0.35355338, %v3213_v2 }
 0x9d1   : > { %v3215_v10 = vpop.f32.mrf.mxu0 }
 0x9d2   : > { %v3219_v11 = vsel %vm2811_vm4, %v3218_v5, -inf }
 0x9d3   : > { %3220 = vmax.xlane.f32.xlu1 %v3219_v11  ;;  %v4378_v12 = vpop.f32.mrf.mxu0 }
 0xa5c   : > { %v3221_v17 = vpop.xlane.xlu1 %3220 }
 0xa5d   : > { %v3222_v18 = vsub.f32 %v3218_v5, %v3221_v17  ;;  %v2780_v17 = vld [vmem:[%s6022_s2] sm:$0xff] }
 0xa5f   : > { %v3223_v19 = vmul.f32 1.442695, %v3222_v18  ;;  %v3582_v18 = vpack.c.bf16 %v2783_v16, %v2782_v15 }
 0xa61   : > { %4683 = vpow2.f32 %v3223_v19  ;;  %v2781_v19 = vld [vmem:[%s6022_s2 + $0x8] sm:$0xff] }
 0xa6e   : > { %v4684_v20 = vpop.eup %4683 }
 0xa6f   : > { %4388 = vmatmul.mubr.msk.f32.vlgmr.msra.gmra.mxu1 %vm2811_vm4, %v4684_v20 }
 0xa70   : > { %4402 = vmatprep.mubr.msk.bf16.mxu1 %vm5233_vm0, %v5232_v1  ;;  %4399 = vmatpush3.bf16.msra.mxu1 %v3356_v23  ;;  %v2778_v23 = vld [vmem:[%s6023_s0] sm:$0x1f]  ;;  %s6025_s0 = sld [smem:[#allocation59_spill]] }
 0xa71   : > { %4400 = vmatprep.subr.bf16.mxu1 %v5232_v1  ;;  %v3527_v29 = vrot.slane %v2778_v23, %v3526_v22 }
 0xa74   : > { %4401 = vmatpush3.bf16.msra.mxu1 %v3355_v31 }
 0xa75   : > { %4414 = vmatprep.subr.bf16.mxu1 %v5232_v1 }
 0xb2f   : > { %v3294_v24 = vpop.f32.mrf.mxu1 }
 0xb30   : > { %4685 = vrcp.f32 %v3294_v24  ;;  %v3540_v24 = vsub.s32 3, %v5660_v37 }
 0xb31   : > { %v4389_v25 = vpop.f32.mrf.mxu1 }
 0xb32   : > { %v3554_v25 = vsub.s32 4, %v5660_v37  ;;  %v3541_v30 = vrot.slane %v2778_v23, %v3540_v24  ;;  %v2787_v24 = vld [vmem:[%s6025_s0] sm:$0xff] }
 0xb34   : > { %v3555_v31 = vrot.slane %v2778_v23, %v3554_v25 }
 0xb3d   : > { %v4686_v26 = vpop.eup %4685 }
 0xb3e   : > { %v3299_v27 = vmul.f32 %v4686_v26, %v4684_v20  ;;  %v3581_v20 = vpack.c.bf16 %v2781_v19, %v2780_v17 }
 0xb40   : > { %v3300_v28 = vpack.c.bf16 %v3299_v27, %v3299_v27 }
 0xb42   : > { %4395 = vmatmul.mubr.msk.bf16.vlgmr.msra.gmra.mxu0 %vm2811_vm4, %v3300_v28  ;;  %v3513_v28 = vrot.slane %v2778_v23, %v3512_v21 }
 0xb43   : > { %4410 = vmatprep.mubr.msk.bf16.mxu0 %vm5233_vm0, %v5232_v1 }
 0xc02   : > { %v3348_v32 = vpop.f32.mrf.mxu0 }
 0xc03   : > { %v3354_v7 = vpack.c.bf16 %v3348_v32, %v3348_v32 }
 0xc04   : > { %v4396_v33 = vpop.f32.mrf.mxu0 }
 0xc05   : > { %4403 = vmatmul.mubr.msk.bf16.vlgmr.msra.gmra.mxu1 %vm2811_vm4, %v3354_v7  ;;  %v3507_v7 = vrot.slane %v2778_v23, %v5663_v38  ;;  %v2789_v23 = vld [vmem:[%s6025_s0 + $0x10] sm:$0xff] }
 0xc06   : > { %v3351_v6 = vpop.f32.mrf.mxu0  ;;  %4418 = vmatprep.mubr.msk.bf16.mxu1 %vm5233_vm0, %v5232_v1  ;;  %4415 = vmatpush3.bf16.msra.mxu1 %v3582_v18 }
 0xc07   : > { %4416 = vmatprep.subr.bf16.mxu1 %v5232_v1 }
 0xc08   : > { %v4397_v34 = vpop.f32.mrf.mxu0 }
 0xc0a   : > { %4417 = vmatpush3.bf16.msra.mxu1 %v3581_v20 }
 0xc0b   : > { %4430 = vmatprep.subr.bf16.mxu1 %v5232_v1 }
 0xcc5   : > { %v3394_v8 = vpop.f32.mrf.mxu1 }
 0xcc6   : > { %v3400_v36 = vadd.f32 %v3394_v8, %v5715_v56  ;;  %v2775_v56 = vld [vmem:[%s6021_s23 + $0x10] sm:$0xff] }
 0xcc7   : > { %v4404_v39 = vpop.f32.mrf.mxu1  ;;  %v3437_v50 = vpack.c.bf16 %v2776_v49, %v2775_v56 }
 0xcc8   : > { %v5849_v9 = vadd.f32 %v4200_v35, %v3400_v36 }
 0xcc9   : > { %v3397_v40 = vpop.f32.mrf.mxu1  ;;  %4407 = vmatpush3.bf16.msra.mxu0 %v3437_v50 }
 0xcca   : > { %v3408_v41 = vsel %vm2811_vm4, %v5849_v9, 0.0  ;;  %4408 = vmatprep.subr.bf16.mxu0 %v5232_v1 }
 0xccb   : > { %3409 = vadd.xlane.f32.xlu0 %v3408_v41  ;;  %v4405_v42 = vpop.f32.mrf.mxu1 }
 0xccd   : > { %4409 = vmatpush3.bf16.msra.mxu0 %v3436_v53 }
 0xcce   : > { %4422 = vmatprep.subr.bf16.mxu0 %v5232_v1 }
 0xd54   : > { %v3410_v43 = vpop.xlane.xlu0 %3409 }
 0xd55   : > { %v3411_v44 = vmul.f32 0.03125, %v3410_v43 }
 0xd57   : > { %v3412_v45 = vsub.f32 %v5849_v9, %v3411_v44 }
 0xd59   : > { %v3413_v46 = vmul.f32 %v3412_v45, %v3412_v45 }
 0xd5b   : > { %v3414_v47 = vsel %vm2811_vm4, %v3413_v46, 0.0 }
 0xd5c   : > { %3415 = vadd.xlane.f32.xlu1 %v3414_v47 }
 0xde5   : > { %v3416_v54 = vpop.xlane.xlu1 %3415 }
 0xde6   : > { %v3417_v55 = vmul.f32 0.03125, %v3416_v54 }
 0xde8   : > { %v3418_v57 = vadd.f32 1e-05, %v3417_v55 }
 0xdea   : > { %4687 = vrsqrt.f32 %v3418_v57 }
 0xdf7   : > { %v4688_v58 = vpop.eup %4687 }
 0xdf8   : > { %v3420_v60 = vmul.f32 %v4688_v58, %v3412_v45  ;;  %v4206_v58 = vld [vmem:[#allocation16] ss:$0 sm:$0xff] }
 0xdfa   : > { %v3427_v62 = vmul.f32 %v4201_v59, %v3420_v60 }
 0xdfc   : > { %v3434_v63 = vadd.f32 %v4202_v61, %v3427_v62 }
 0xdfe   : > { %v3435_v0 = vpack.c.bf16 %v3434_v63, %v3434_v63 }
 0xe00   : > { %4411 = vmatmul.mubr.msk.bf16.vlgmr.msra.gmra.mxu0 %vm2811_vm4, %v3435_v0 }
 0xe01   : > { %4426 = vmatprep.mubr.msk.bf16.mxu0 %vm5233_vm0, %v5232_v1 }
 0xec0   : > { %v3481_v2 = vpop.f32.mrf.mxu0 }
 0xec1   : > { %v3482_v3 = vadd.f32 %v4203_v48, %v3481_v2 }
 0xec2   : > { %v4412_v4 = vpop.f32.mrf.mxu0 }
 0xec3   : > { %v4205_v5 = vmul.f32 -1.442695, %v3482_v3 }
 0xec4   : > { %v3484_v10 = vpop.f32.mrf.mxu0 }
 0xec5   : > { %4689 = vpow2.f32 %v4205_v5  ;;  %v4209_v10 = vld [vmem:[#allocation17] ss:$0 sm:$0xff] }
 0xec6   : > { %v4413_v11 = vpop.f32.mrf.mxu0 }
 0xed2   : > { %v4690_v12 = vpop.eup %4689 }
 0xed3   : > { %v3490_v13 = vadd.f32 1.0, %v4690_v12 }
 0xed5   : > { %4691 = vrcp.f32 %v3490_v13 }
 0xee2   : > { %v4692_v14 = vpop.eup %4691 }
 0xee3   : > { %3494 = vrot.lane.b32.xlu1 %v4692_v14, %s6024_s1  ;;  %s6026_s1 = sld [smem:[#allocation60_spill]] }
 0xf55   : > { %v3495_v26 = vpop.permute.xlu1 %3494 }
 0xf56   : > { %v3497_v27 = vmul.f32 %v3495_v26, %v3482_v3  ;;  %v2788_v26 = vld [vmem:[%s6025_s0 + $0x8] sm:$0xff] }
 0xf58   : > { %v3499_v32 = vrot.slane %v3497_v27, 6  ;;  %v3662_v27 = vpack.c.bf16 %v2788_v26, %v2787_v24  ;;  %v3807_v26 = vld [vmem:[#allocation2] sm:$0x1] }
 0xf5a   : > { %v3502_v33 = vsel %vm3501_vm7, 0.0, %v3499_v32  ;;  %v3503_v6 = vsel %vm3501_vm7, %v3499_v32, 0.0  ;;  %v4210_v32 = vld [vmem:[#allocation19] ss:$0 sm:$0xff] }
 0xf5b   : > { %v3514_v34 = vmul.f32 %v3513_v28, %v3502_v33  ;;  %v3515_v35 = vmul.f32 %v3513_v28, %v3503_v6  ;;  %v3528_v8 = vmul.f32 %v3527_v29, %v3502_v33  ;;  %v3529_v36 = vmul.f32 %v3527_v29, %v3503_v6 }
 0xf5c   : > { %v3542_v39 = vmul.f32 %v3541_v30, %v3502_v33  ;;  %v3543_v40 = vmul.f32 %v3541_v30, %v3503_v6  ;;  %v3556_v37 = vmul.f32 %v3555_v31, %v3502_v33  ;;  %v3557_v44 = vmul.f32 %v3555_v31, %v3503_v6 }
 0xf5d   : > { %v3519_v41 = vrot.slane %v3514_v34, 1  ;;  %v3520_v42 = vrot.slane %v3515_v35, 1  ;;  %v3533_v43 = vrot.slane %v3528_v8, 2  ;;  %v3508_v45 = vmul.f32 %v3507_v7, %v3502_v33  ;;  %v4211_v33 = vld [vmem:[#allocation20] ss:$0 sm:$0xff] }
 0xf5e   : > { %v3534_v46 = vrot.slane %v3529_v36, 2  ;;  %v3547_v56 = vrot.slane %v3542_v39, 3  ;;  %v3548_v49 = vrot.slane %v3543_v40, 3  ;;  %v3560_v52 = vrot.slane %v3556_v37, 4  ;;  %v2806_v8 = vld [vmem:[%s6026_s1 + $0x70] sm:$0xff]  ;;  %v2807_v36 = vld [vmem:[%s6026_s1 + $0x78] sm:$0xff] }
 0xf5f   : > { %v3521_v47 = vsel %vm3518_vm8, %v3519_v41, %v3520_v42  ;;  %v3561_v53 = vrot.slane %v3557_v44, 4  ;;  %v3728_v39 = vpack.c.bf16 %v2807_v36, %v2806_v8  ;;  %v2804_v40 = vld [vmem:[%s6026_s1 + $0x60] sm:$0xff]  ;;  %v2805_v37 = vld [vmem:[%s6026_s1 + $0x68] sm:$0xff]  ;;  %v2802_v42 = vld [vmem:[%s6026_s1 + $0x50] sm:$0xff] }
 0xf60   : > { %v3523_v50 = vadd.f32 %v3521_v47, %v3508_v45  ;;  %v3535_v51 = vsel %vm3532_vm9, %v3533_v43, %v3534_v46  ;;  %v3549_v55 = vsel %vm3546_vm10, %v3547_v56, %v3548_v49  ;;  %v3727_v41 = vpack.c.bf16 %v2805_v37, %v2804_v40  ;;  %v2803_v43 = vld [vmem:[%s6026_s1 + $0x58] sm:$0xff]  ;;  %v2800_v45 = vld [vmem:[%s6026_s1 + $0x40] sm:$0xff]  ;;  %v2801_v46 = vld [vmem:[%s6026_s1 + $0x48] sm:$0xff] }
 0xf61   : > { %v3562_v59 = vsel %vm2480_vm2, %v3560_v52, %v3561_v53  ;;  %v3726_v44 = vpack.c.bf16 %v2803_v43, %v2802_v42  ;;  %v3725_v47 = vpack.c.bf16 %v2801_v46, %v2800_v45  ;;  %v2798_v56 = vld [vmem:[%s6026_s1 + $0x30] sm:$0xff]  ;;  %v2799_v49 = vld [vmem:[%s6026_s1 + $0x38] sm:$0xff]  ;;  %v2797_v52 = vld [vmem:[%s6026_s1 + $0x28] sm:$0xff] }
 0xf62   : > { %v3537_v54 = vadd.f32 %v3535_v51, %v3523_v50  ;;  %v3724_v50 = vpack.c.bf16 %v2799_v49, %v2798_v56  ;;  %v2796_v51 = vld [vmem:[%s6026_s1 + $0x20] sm:$0xff] }
 0xf63   : > { %v3723_v53 = vpack.c.bf16 %v2797_v52, %v2796_v51 }
 0xf64   : > { %v3551_v57 = vadd.f32 %v3549_v55, %v3537_v54  ;;  %v2794_v54 = vld [vmem:[%s6026_s1 + $0x10] sm:$0xff]  ;;  %v2795_v55 = vld [vmem:[%s6026_s1 + $0x18] sm:$0xff] }
 0xf66   : > { %v3564_v60 = vadd.f32 %v3562_v59, %v3551_v57  ;;  %v3722_v57 = vpack.c.bf16 %v2795_v55, %v2794_v54  ;;  %v2793_v59 = vld [vmem:[%s6026_s1 + $0x8] sm:$0xff] }
 0xf68   : > { %v3571_v61 = vadd.f32 %v4206_v58, %v3564_v60  ;;  %v2792_v58 = vld [vmem:[%s6026_s1] sm:$0xff] }
 0xf69   : > { %v3721_v60 = vpack.c.bf16 %v2793_v59, %v2792_v58 }
 0xf6a   : > { %v4207_v62 = vmul.f32 -0.999995, %v3571_v61  ;;  %v3572_v2 = vmul.f32 0.999995, %v3571_v61  ;;  %v4212_v61 = vld [vmem:[#allocation22] ss:$0 sm:$0xff] }
 0xf6c   : > { %v3574_v63 = vmul.f32 1.442695, %v4207_v62 }
 0xf6e   : > { %4693 = vpow2.f32 %v3574_v63 }
 0xf7b   : > { %v4694_v0 = vpop.eup %4693 }
 0xf7c   : > { %v3576_v48 = vadd.f32 1.0, %v4694_v0 }
 0xf7e   : > { %4695 = vrcp.f32 %v3576_v48 }
 0xf8b   : > { %v4696_v3 = vpop.eup %4695 }
 0xf8c   : > { %v3579_v4 = vmul.f32 %v4696_v3, %v3572_v2 }
 0xf8e   : > { %v3580_v5 = vpack.c.bf16 %v3579_v4, %v3579_v4 }
 0xf90   : > { %4419 = vmatmul.mubr.msk.bf16.vlgmr.msra.gmra.mxu1 %vm2811_vm4, %v3580_v5 }
 0xf91   : > { %4446 = vmatprep.mubr.msk.bf16.mxu1 %vm5233_vm0, %v5232_v1  ;;  %4431 = vmatpush3.bf16.msra.mxu1 %v3728_v39 }
 0xf92   : > { %4432 = vmatprep.subr.bf16.mxu1 %v5232_v1 }
 0xf95   : > { %4433 = vmatpush3.bf16.msra.mxu1 %v3727_v41 }
 0xf96   : > { %4434 = vmatprep.subr.bf16.mxu1 %v5232_v1 }
 0xf99   : > { %4435 = vmatpush3.bf16.msra.mxu1 %v3726_v44 }
 0xf9a   : > { %4436 = vmatprep.subr.bf16.mxu1 %v5232_v1 }
 0xf9d   : > { %4437 = vmatpush3.bf16.msra.mxu1 %v3725_v47 }
 0xf9e   : > { %4438 = vmatprep.subr.bf16.mxu1 %v5232_v1 }
 0xfa1   : > { %4439 = vmatpush3.bf16.msra.mxu1 %v3724_v50 }
 0xfa2   : > { %4440 = vmatprep.subr.bf16.mxu1 %v5232_v1 }
 0xfa5   : > { %4441 = vmatpush3.bf16.msra.mxu1 %v3723_v53 }
 0xfa6   : > { %4442 = vmatprep.subr.bf16.mxu1 %v5232_v1 }
 0xfa9   : > { %4443 = vmatpush3.bf16.msra.mxu1 %v3722_v57 }
 0xfaa   : > { %4444 = vmatprep.subr.bf16.mxu1 %v5232_v1 }
 0xfad   : > { %4445 = vmatpush3.bf16.msra.mxu1 %v3721_v60 }
0x1050   : > { %v3620_v11 = vpop.f32.mrf.mxu1 }
0x1051   : > { %v3626_v12 = vadd.f32 %v3620_v11, %v5849_v9  ;;  %v2790_v9 = vld [vmem:[%s6025_s0 + $0x18] sm:$0xff]  ;;  %s6027_s0 = sld [smem:[#allocation41_spill]] }
0x1052   : > { %v4420_v13 = vpop.f32.mrf.mxu1  ;;  %v3663_v25 = vpack.c.bf16 %v2790_v9, %v2789_v23 }
0x1053   : > { %v5882_v14 = vadd.f32 %v4209_v10, %v3626_v12 }
0x1054   : > { %v3623_v15 = vpop.f32.mrf.mxu1  ;;  %4423 = vmatpush3.bf16.msra.mxu0 %v3663_v25 }
0x1055   : > { %v3634_v16 = vsel %vm2811_vm4, %v5882_v14, 0.0  ;;  %4424 = vmatprep.subr.bf16.mxu0 %v5232_v1 }
0x1056   : > { %3635 = vadd.xlane.f32.xlu0 %v3634_v16  ;;  %v4421_v17 = vpop.f32.mrf.mxu1 }
0x1057   : > { %v3804_v8 = vld [vmem:[%s6027_s0] sm:$0x1]  ;;  %s2302_s0 = scalar_lea.vmem %s5449_s17, %s6029_s10 }
0x1058   : > { %4425 = vmatpush3.bf16.msra.mxu0 %v3662_v27  ;;  %v5237_v27 = vmov 0   ;;  %v3805_v36 = vpack.c.bf16 %v3804_v8, %v3804_v8 }
0x1059   : > { %4450 = vmatprep.subr.bf16.mxu0 %v5232_v1  ;;  %4672 = vset.pattern.permute.xlu0 %v5237_v27 }
0x10df   : > { %v3636_v18 = vpop.xlane.xlu0 %3635 }
0x10e0   : > { %v3637_v19 = vmul.f32 0.03125, %v3636_v18 }
0x10e2   : > { %v3638_v20 = vsub.f32 %v5882_v14, %v3637_v19 }
0x10e4   : > { %v3639_v21 = vmul.f32 %v3638_v20, %v3638_v20 }
0x10e6   : > { %v3640_v22 = vsel %vm2811_vm4, %v3639_v21, 0.0 }
0x10e7   : > { %3641 = vadd.xlane.f32.xlu1 %v3640_v22 }
0x1170   : > { %v3642_v28 = vpop.xlane.xlu1 %3641 }
0x1171   : > { %v3643_v29 = vmul.f32 0.03125, %v3642_v28 }
0x1173   : > { %v3644_v30 = vadd.f32 1e-05, %v3643_v29 }
0x1175   : > { %4697 = vrsqrt.f32 %v3644_v30 }
0x1182   : > { %v4698_v31 = vpop.eup %4697 }
0x1183   : > { %v3646_v7 = vmul.f32 %v4698_v31, %v3638_v20  ;;  %v4216_v31 = vld [vmem:[#allocation25] ss:$0 sm:$0xff] }
0x1185   : > { %v3653_v6 = vmul.f32 %v4210_v32, %v3646_v7  ;;  %v4217_v7 = vld [vmem:[#allocation26] ss:$0 sm:$0xff] }
0x1187   : > { %v3660_v34 = vadd.f32 %v4211_v33, %v3653_v6 }
0x1189   : > { %v3661_v35 = vpack.c.bf16 %v3660_v34, %v3660_v34 }
0x118b   : > { %4427 = vmatmul.mubr.msk.bf16.vlgmr.msra.gmra.mxu0 %vm2811_vm4, %v3661_v35 }
0x118c   : > { %4452 = vmatprep.mubr.msk.bf16.mxu0 %vm5233_vm0, %v5232_v1  ;;  %v4215_v1 = vld [vmem:[#allocation23] ss:$0 sm:$0xff] }
0x124b   : > { %v3707_v62 = vpop.f32.mrf.mxu0 }
0x124c   : > { %v3708_v63 = vadd.f32 %v4212_v61, %v3707_v62 }
0x124d   : > { %v4428_v0 = vpop.f32.mrf.mxu0 }
0x124e   : > { %v4214_v48 = vmul.f32 -1.442695, %v3708_v63 }
0x124f   : > { %v3710_v2 = vpop.f32.mrf.mxu0 }
0x1250   : > { %4699 = vpow2.f32 %v4214_v48 }
0x1251   : > { %v4429_v3 = vpop.f32.mrf.mxu0 }
0x125d   : > { %v4700_v4 = vpop.eup %4699 }
0x125e   : > { %v3716_v5 = vadd.f32 1.0, %v4700_v4 }
0x1260   : > { %4701 = vrcp.f32 %v3716_v5 }
0x126d   : > { %v4702_v10 = vpop.eup %4701 }
0x126e   : > { %v3719_v11 = vmul.f32 %v4702_v10, %v3708_v63 }
0x1270   : > { %v3720_v12 = vpack.c.bf16 %v3719_v11, %v3719_v11 }
0x1272   : > { %4447 = vmatmul.mubr.bf16.vlgmr.msra.gmra.mxu1 %v3720_v12 }
0x1332   : > { %v3769_v13 = vpop.f32.mrf.mxu1 }
0x1333   : > { %v3770_v15 = vadd.f32 %v4215_v1, %v3769_v13 }
0x1334   : > { %v4448_v16 = vpop.f32.mrf.mxu1 }
0x1335   : > { %v3775_v17 = vmul.f32 0.5, %v3770_v15 }
0x1336   : > { %v3772_v18 = vpop.f32.mrf.mxu1 }
0x1337   : > { %v3776_v19 = vadd.f32 %v3775_v17, %v5882_v14 }
0x1338   : > { %v4449_v20 = vpop.f32.mrf.mxu1 }
0x1339   : > { %v3777_v21 = vsel %vm2811_vm4, %v3776_v19, 0.0 }
0x133a   : > { %3778 = vadd.xlane.f32.xlu0 %v3777_v21 }
0x13c3   : > { %v3779_v22 = vpop.xlane.xlu0 %3778 }
0x13c4   : > { %v3780_v23 = vmul.f32 0.03125, %v3779_v22 }
0x13c6   : > { %v3781_v9 = vsub.f32 %v3776_v19, %v3780_v23 }
0x13c8   : > { %v3782_v24 = vmul.f32 %v3781_v9, %v3781_v9 }
0x13ca   : > { %v3783_v25 = vsel %vm2811_vm4, %v3782_v24, 0.0 }
0x13cb   : > { %3784 = vadd.xlane.f32.xlu0 %v3783_v25 }
0x13e1   : > { %3810 = vperm.xlu0 %4672, %v3807_v26  }
0x1454   : > { %v3785_v28 = vpop.xlane.xlu0 %3784 }
0x1455   : > { %v3786_v29 = vmul.f32 0.03125, %v3785_v28 }
0x1457   : > { %v3787_v30 = vadd.f32 1e-05, %v3786_v29 }
0x1459   : > { %4703 = vrsqrt.f32 %v3787_v30 }
0x145c   : > { %v3811_v39 = vpop.permute.xlu0 %3810 }
0x145d   : > { %v3816_v40 = vrot.slane %v3811_v39, %v5663_v38 }
0x1466   : > { %v4704_v14 = vpop.eup %4703 }
0x1467   : > { %v3789_v32 = vmul.f32 %v4704_v14, %v3781_v9 }
0x1469   : > { %v3796_v33 = vmul.f32 %v4216_v31, %v3789_v32 }
0x146b   : > { %v3803_v6 = vadd.f32 %v4217_v7, %v3796_v33 }
0x146d   : > { %v3806_v34 = vpack.c.bf16 %v3803_v6, %v3803_v6 }
0x146f   : > { %v3821_v35 = vsel %vm2811_vm4, %v3806_v34, 0 }
0x1470   : > { %4451 = vmatpush3.bf16.xpose.msra.mxu0 %v3821_v35 }
0x1477   : > { %4453 = vmatmul.mubr.msk.bf16.vlgmr.msra.gmra.mxu0 %vm2811_vm4, %v3805_v36 }
0x1537   : > { %v3857_v37 = vpop.f32.mrf.mxu0 }
0x1538   : > { %v3858_v41 = vadd.f32 %v3857_v37, %v3816_v40 }
0x1539   : > { %v4454_v42 = vpop.f32.mrf.mxu0 }
0x153a   : > { %v3864_v43 = vsel %vm3863_vm11, %v3858_v41, -inf }
0x153b   : > { %3865 = vmax.xlane.f32.xlu1 %v3864_v43  ;;  %v3860_v44 = vpop.f32.mrf.mxu0 }
0x153d   : > { %v4455_v45 = vpop.f32.mrf.mxu0 }
0x15c4   : > { %v3866_v46 = vpop.xlane.xlu1 %3865 }
0x15c5   : > { %v4219_v47 = vmul.f32 -1.442695, %v3866_v46 }
0x15c7   : > { %4705 = vpow2.f32 %v4219_v47 }
0x15d4   : > { %v4706_v56 = vpop.eup %4705 }
0x15d5   : > { %v3870_v49 = vadd.f32 1.0, %v4706_v56 }
0x15d7   : > { %4707 = vrcp.f32 %v3870_v49 }
0x15e4   : > { %v4708_v50 = vpop.eup %4707 }
0x15e5   : > { %v3873_v51 = vsub.f32 1.0, %v4708_v50 }
0x15e7   : > { %v3874_v52 = vmul.f32 5.0, %v3873_v51 }
0x15e9   : > { %v3875_v53 = vadd.f32 1e-08, %v3874_v52 }
0x15eb   : > { %4709 = vrcp.f32 %v3875_v53 }
0x15f8   : > { %v4710_v38 = vpop.eup %4709 }
0x15f9   : > { %v3877_v54 = vmul.f32 %v4710_v38, %v3858_v41 }
0x15fb   : > { %v3878_v55 = vsel %vm3863_vm11, %v3877_v54, -inf }
0x15fc   : > { %3879 = vmax.xlane.f32.xlu1 %v3878_v55 }
0x1685   : > { %v3880_v57 = vpop.xlane.xlu1 %3879 }
0x1686   : > { %v3881_v58 = vsub.f32 %v3877_v54, %v3880_v57 }
0x1688   : > { %v3882_v59 = vmul.f32 1.442695, %v3881_v58 }
0x168a   : > { %4711 = vpow2.f32 %v3882_v59 }
0x1697   : > { %v4712_v60 = vpop.eup %4711 }
0x1698   : > { %v3884_v61 = vsel %vm3863_vm11, %v4712_v60, 0.0 }
0x1699   : > { %3885 = vadd.xlane.f32.xlu1 %v3884_v61 }
0x1722   : > { %v3886_v62 = vpop.xlane.xlu1 %3885 }
0x1723   : > { %4713 = vrcp.f32 %v3886_v62 }
0x1730   : > { %v4714_v63 = vpop.eup %4713 }
0x1731   : > { %v3888_v0 = vmul.f32 %v4714_v63, %v4712_v60 }
0x1733   : > { %v3889_v48 = vmul.f32 %v3888_v0, %v3858_v41 }
0x1735   : > { %v3890_v2 = vsel %vm3863_vm11, %v3889_v48, 0.0 }
0x1736   : > { %3891 = vadd.xlane.f32.xlu1 %v3890_v2 }
0x17bf   : > { %v3892_v3 = vpop.xlane.xlu1 %3891 }
0x17c0   : > { %3894 = vst.msk [vmem:[%s2302_s0] sm:$0x1] %vm3893_vm12, %v3892_v3 }
0x17c1 PF: > { %s166_s4 = sadd.s32 1, %s5173_s4  }
0x17c2   : > { %p163_p5 = scmp.ge.s32.totalorder %s166_s4, 4  }
0x17c4   :  { %165 = sbr.rel (!%p163_p5) target bundleno = 80 (0x50), region = 475 }
0x17c9   :  { %3912 = vsyncpa [#allocation4], 1 }
0x17ca   :  { %3914 = vsyncpa [#allocation4 + $0x1], 1 }
0x17cb   :  { %3915 = vsyncpa [#allocation6], 1 }
0x17cc   :  { %3916 = vsyncpa [#allocation9], 1 }
0x17cd   :  { %3917 = vsyncpa [#allocation12], 1 }
0x17ce   :  { %3918 = vsyncpa [#allocation15], 1 }
0x17cf   :  { %3919 = vsyncpa [#allocation18], 1 }
0x17d0   :  { %3920 = vsyncpa [#allocation21], 1 }
0x17d1   :  { %3921 = vsyncpa [#allocation24], 1 }
0x17d2   :  { %3922 = vsyncpa [#allocation27], 1 }

</bundles_post_ra>
